<compile_context>
chip_gen: v5e
topology: v5e:2x2
jax: 0.10.0
libtpu: 0.0.40
codegen_flags: <defaults>
</compile_context>

<pallas_src>
import functools

import jax
import jax.numpy as jnp
from jax.experimental import pallas as pl
from jax.experimental.pallas import tpu as pltpu

EPS = 1e-5          # nn.InstanceNorm2d default eps
NEG_SLOPE = 0.01    # F.leaky_relu default negative_slope


# ---------------------------------------------------------------- kernel math
def _leaky_relu(x):
    return jnp.where(x >= 0, x, NEG_SLOPE * x)


def _instance_norm(xf, gamma, beta):
    # xf: (C, HW); gamma/beta: (C, 1).  Biased variance, matches InstanceNorm2d.
    mean = jnp.mean(xf, axis=1, keepdims=True)
    var = jnp.mean((xf - mean) ** 2, axis=1, keepdims=True)
    return (xf - mean) * jax.lax.rsqrt(var + EPS) * gamma + beta


def _conv1x1(xf, w, b):
    # xf: (Cin, HW), w: (Cout, Cin), b: (Cout, 1)
    return jnp.dot(w, xf, preferred_element_type=jnp.float32) + b


def _conv3x3(xf, w_packed, b, masks, W, HW):
    # Fused 3x3, stride 1, padding 1 conv on a flattened (Cin, HW) map.
    #   xf:       (Cin, HW)
    #   w_packed: (Cout, 9*Cin); column tap*Cin+cin holds weight[co, ci, dy+1, dx+1]
    #             with tap = (dy+1)*3 + (dx+1)  (packed host-side in init_params)
    #   b:        (Cout, 1)
    #   masks:    (8, HW) 0/1 validity masks for the 8 non-center taps
    # Each tap = lane roll (+ precomputed boundary mask); the 9 taps are stacked
    # on the sublane axis so the whole conv is a single MXU matmul with K=9*Cin.
    taps = []
    mi = 0
    for dy in (-1, 0, 1):
        for dx in (-1, 0, 1):
            o = dy * W + dx
            if o == 0:
                taps.append(xf)                          # center tap: always valid
            else:
                s = pltpu.roll(xf, shift=(-o) % HW, axis=1)
                taps.append(s * masks[mi:mi + 1, :])
                mi += 1
    stacked = jnp.concatenate(taps, axis=0)              # (9*Cin, HW)
    return jnp.dot(w_packed, stacked, preferred_element_type=jnp.float32) + b


def cnn_kernel(W, HW, bt,
               x_ref, m_ref,
               w1_ref, b1_ref, w2_ref, b2_ref, w3_ref, b3_ref, w4_ref, b4_ref,
               g1_ref, be1_ref, g2_ref, be2_ref, g3_ref, be3_ref, g4_ref, be4_ref,
               out_ref):
    # Load masks/params once per grid step; reused across all bt samples.
    masks = m_ref[...]
    w1, b1 = w1_ref[...], b1_ref[...]
    w2, b2 = w2_ref[...], b2_ref[...]
    w3, b3 = w3_ref[...], b3_ref[...]
    w4, b4 = w4_ref[...], b4_ref[...]
    g1, be1 = g1_ref[...], be1_ref[...]
    g2, be2 = g2_ref[...], be2_ref[...]
    g3, be3 = g3_ref[...], be3_ref[...]
    g4, be4 = g4_ref[...], be4_ref[...]

    for bl in range(bt):                                  # static unroll, bt kept small
        x = x_ref[bl]                                     # (Cin, HW)

        # ln1(leaky_relu(conv1(x)))
        h = _instance_norm(_leaky_relu(_conv1x1(x, w1, b1)), g1, be1)

        # ln2(leaky_relu(x + conv2(x)))
        h = _instance_norm(
            _leaky_relu(h + _conv3x3(h, w2, b2, masks, W, HW)), g2, be2)

        # ln3(leaky_relu(x + conv3(x)))
        h = _instance_norm(
            _leaky_relu(h + _conv3x3(h, w3, b3, masks, W, HW)), g3, be3)

        # ln4(relu(conv4(x)))
        h4 = _instance_norm(
            jnp.maximum(_conv3x3(h, w4, b4, masks, W, HW), 0.0), g4, be4)  # (1, HW)

        out_ref[pl.ds(bl, 1), :] = h4.astype(out_ref.dtype)


# ---------------------------------------------------------------- host helpers
def _build_masks(H, W):
    # (8, HW) 0/1 masks for the 8 non-center taps, (dy, dx) row-major order.
    HW = H * W
    pos = jnp.arange(HW, dtype=jnp.int32)
    row = pos // W
    col = pos % W
    rows = []
    for dy in (-1, 0, 1):
        for dx in (-1, 0, 1):
            if dy == 0 and dx == 0:
                continue
            valid = ((row + dy >= 0) & (row + dy < H) &
                     (col + dx >= 0) & (col + dx < W))
            rows.append(valid.astype(jnp.float32))
    return jnp.stack(rows, axis=0)


def _pick_block_batch(B):
    # Output block is (bt, HW): keep bt == B (full dim) or a multiple of 8 so the
    # second-minor block dim stays layout-legal.  Small batches run in a single
    # grid step (amortizes per-step overhead); aligned larger batches split into
    # bt=8 blocks so the "parallel" batch axis can shard across v7x's two cores.
    # (Very large batches not divisible by 8 would be padded host-side.)
    if B % 8 == 0:
        return min(B, 8)
    return B


# ---------------------------------------------------------------- wrapper
def cnn_forward(x, kp):
    B, Cin, H, W = x.shape
    HW = H * W
    xf = x.reshape(B, Cin, HW)
    masks = _build_masks(H, W)

    bt = _pick_block_batch(B)
    assert B % bt == 0
    grid = (B // bt,)

    ordered = [kp[k] for k in
               ("w1", "b1", "w2", "b2", "w3", "b3", "w4", "b4",
                "g1", "be1", "g2", "be2", "g3", "be3", "g4", "be4")]

    def whole(a):
        nd = a.ndim
        return pl.BlockSpec(a.shape, lambda b, _nd=nd: (0,) * _nd)

    in_specs = ([pl.BlockSpec((bt, Cin, HW), lambda b: (b, 0, 0)), whole(masks)]
                + [whole(a) for a in ordered])
    out_spec = pl.BlockSpec((bt, HW), lambda b: (b, 0))

    out = pl.pallas_call(
        functools.partial(cnn_kernel, W, HW, bt),
        out_shape=jax.ShapeDtypeStruct((B, HW), jnp.float32),
        grid_spec=pltpu.PrefetchScalarGridSpec(
            num_scalar_prefetch=0,
            grid=grid,
            in_specs=in_specs,
            out_specs=out_spec,
        ),
        compiler_params=pltpu.CompilerParams(
            dimension_semantics=("parallel",)),
    )(xf, masks, *ordered)
    return out


# ---------------------------------------------------------------- params
def init_params(key, in_channels):
    ks = jax.random.split(key, 16)

    def conv_w(k, co, ci, kh, kw):
        bound = 1.0 / ((ci * kh * kw) ** 0.5)
        return jax.random.uniform(k, (co, ci, kh, kw), jnp.float32, -bound, bound)

    def conv_b(k, co, fan_in):
        bound = 1.0 / (fan_in ** 0.5)
        return jax.random.uniform(k, (co,), jnp.float32, -bound, bound)

    raw = dict(
        W1=conv_w(ks[0], 12, in_channels, 1, 1), B1=conv_b(ks[1], 12, in_channels),
        W2=conv_w(ks[2], 12, 12, 3, 3),          B2=conv_b(ks[3], 12, 12 * 9),
        W3=conv_w(ks[4], 12, 12, 3, 3),          B3=conv_b(ks[5], 12, 12 * 9),
        W4=conv_w(ks[6], 1, 12, 3, 3),           B4=conv_b(ks[7], 1, 12 * 9),
        G1=1.0 + 0.1 * jax.random.normal(ks[8], (12,), jnp.float32),
        BE1=0.1 * jax.random.normal(ks[9], (12,), jnp.float32),
        G2=1.0 + 0.1 * jax.random.normal(ks[10], (12,), jnp.float32),
        BE2=0.1 * jax.random.normal(ks[11], (12,), jnp.float32),
        G3=1.0 + 0.1 * jax.random.normal(ks[12], (12,), jnp.float32),
        BE3=0.1 * jax.random.normal(ks[13], (12,), jnp.float32),
        G4=1.0 + 0.1 * jax.random.normal(ks[14], (1,), jnp.float32),
        BE4=0.1 * jax.random.normal(ks[15], (1,), jnp.float32),
    )

    def pack3x3(w):
        # (Cout, Cin, 3, 3) -> (Cout, 9*Cin); column tap*Cin+cin = w[co, ci, ky, kx]
        # with tap = ky*3 + kx, matching the in-kernel tap stacking order.
        co, ci = w.shape[0], w.shape[1]
        return jnp.transpose(w, (0, 2, 3, 1)).reshape(co, 9 * ci)

    kp = dict(
        w1=raw["W1"][:, :, 0, 0], b1=raw["B1"].reshape(12, 1),
        w2=pack3x3(raw["W2"]),    b2=raw["B2"].reshape(12, 1),
        w3=pack3x3(raw["W3"]),    b3=raw["B3"].reshape(12, 1),
        w4=pack3x3(raw["W4"]),    b4=raw["B4"].reshape(1, 1),
        g1=raw["G1"].reshape(12, 1), be1=raw["BE1"].reshape(12, 1),
        g2=raw["G2"].reshape(12, 1), be2=raw["BE2"].reshape(12, 1),
        g3=raw["G3"].reshape(12, 1), be3=raw["BE3"].reshape(12, 1),
        g4=raw["G4"].reshape(1, 1),  be4=raw["BE4"].reshape(1, 1),
    )
    return raw, kp


# ---------------------------------------------------------------- pure-JAX ref
def ref_forward(x, p):
    def conv(h, w, b, pad):
        y = jax.lax.conv_general_dilated(
            h, w, (1, 1), [(pad, pad), (pad, pad)],
            dimension_numbers=("NCHW", "OIHW", "NCHW"))
        return y + b.reshape(1, -1, 1, 1)

    def inorm(h, g, be):
        m = h.mean(axis=(2, 3), keepdims=True)
        v = ((h - m) ** 2).mean(axis=(2, 3), keepdims=True)
        return (h - m) * jax.lax.rsqrt(v + EPS) * g.reshape(1, -1, 1, 1) \
            + be.reshape(1, -1, 1, 1)

    def lrelu(h):
        return jnp.where(h >= 0, h, NEG_SLOPE * h)

    h = inorm(lrelu(conv(x, p["W1"], p["B1"], 0)), p["G1"], p["BE1"])
    h = inorm(lrelu(h + conv(h, p["W2"], p["B2"], 1)), p["G2"], p["BE2"])
    h = inorm(lrelu(h + conv(h, p["W3"], p["B3"], 1)), p["G3"], p["BE3"])
    h = inorm(jnp.maximum(conv(h, p["W4"], p["B4"], 1), 0.0), p["G4"], p["BE4"])
    return h.reshape(x.shape[0], -1)


# ---------------------------------------------------------------- main
if __name__ == "__main__":
    key = jax.random.PRNGKey(0)
    k_x, k_p = jax.random.split(key)

    B, Cin, H, W = 2, 4, 16, 16                 # hidden_size unused in forward
    x = jax.random.normal(k_x, (B, Cin, H, W), jnp.float32)

    raw, kp = init_params(k_p, Cin)

    out = cnn_forward(x, kp)
    out = jax.block_until_ready(out)
    assert out.shape == (B, H * W), out.shape

    ref = jax.block_until_ready(ref_forward(x, raw))
    max_err = float(jnp.max(jnp.abs(out - ref)))
    # All-f32 path: tight tolerance (was 5e-2).
    assert max_err < 1e-3, f"max abs error {max_err}"

    print("KERNEL_OK")
</pallas_src>

<mosaic_0001>
module attributes {stable_mosaic.version = 11 : i64} {
  func.func @cnn_kernel(%arg0: i32, %arg1: memref<2x4x256xf32, #tpu.memory_space<vmem>>, %arg2: memref<8x256xf32, #tpu.memory_space<vmem>>, %arg3: memref<12x4xf32, #tpu.memory_space<vmem>>, %arg4: memref<12x1xf32, #tpu.memory_space<vmem>>, %arg5: memref<12x108xf32, #tpu.memory_space<vmem>>, %arg6: memref<12x1xf32, #tpu.memory_space<vmem>>, %arg7: memref<12x108xf32, #tpu.memory_space<vmem>>, %arg8: memref<12x1xf32, #tpu.memory_space<vmem>>, %arg9: memref<1x108xf32, #tpu.memory_space<vmem>>, %arg10: memref<1x1xf32, #tpu.memory_space<vmem>>, %arg11: memref<12x1xf32, #tpu.memory_space<vmem>>, %arg12: memref<12x1xf32, #tpu.memory_space<vmem>>, %arg13: memref<12x1xf32, #tpu.memory_space<vmem>>, %arg14: memref<12x1xf32, #tpu.memory_space<vmem>>, %arg15: memref<12x1xf32, #tpu.memory_space<vmem>>, %arg16: memref<12x1xf32, #tpu.memory_space<vmem>>, %arg17: memref<1x1xf32, #tpu.memory_space<vmem>>, %arg18: memref<1x1xf32, #tpu.memory_space<vmem>>, %arg19: memref<2x256xf32, #tpu.memory_space<vmem>>) attributes {dimension_semantics = [#tpu.dimension_semantics<parallel>], iteration_bounds = array<i64: 1>, scalar_prefetch = 0 : i64, scratch_operands = 0 : i64, tpu.core_type = #tpu.core_type<tc>, window_params = [{transform_indices = @transform_0, window_bounds = array<i64: 2, 4, 256>}, {pipeline_mode = #tpu.pipeline_mode<synchronous>, transform_indices = @transform_1, window_bounds = array<i64: 8, 256>}, {pipeline_mode = #tpu.pipeline_mode<synchronous>, transform_indices = @transform_2, window_bounds = array<i64: 12, 4>}, {pipeline_mode = #tpu.pipeline_mode<synchronous>, transform_indices = @transform_3, window_bounds = array<i64: 12, 1>}, {pipeline_mode = #tpu.pipeline_mode<synchronous>, transform_indices = @transform_4, window_bounds = array<i64: 12, 108>}, {pipeline_mode = #tpu.pipeline_mode<synchronous>, transform_indices = @transform_5, window_bounds = array<i64: 12, 1>}, {pipeline_mode = #tpu.pipeline_mode<synchronous>, transform_indices = @transform_6, window_bounds = array<i64: 12, 108>}, {pipeline_mode = #tpu.pipeline_mode<synchronous>, transform_indices = @transform_7, window_bounds = array<i64: 12, 1>}, {pipeline_mode = #tpu.pipeline_mode<synchronous>, transform_indices = @transform_8, window_bounds = array<i64: 1, 108>}, {pipeline_mode = #tpu.pipeline_mode<synchronous>, transform_indices = @transform_9, window_bounds = array<i64: 1, 1>}, {pipeline_mode = #tpu.pipeline_mode<synchronous>, transform_indices = @transform_10, window_bounds = array<i64: 12, 1>}, {pipeline_mode = #tpu.pipeline_mode<synchronous>, transform_indices = @transform_11, window_bounds = array<i64: 12, 1>}, {pipeline_mode = #tpu.pipeline_mode<synchronous>, transform_indices = @transform_12, window_bounds = array<i64: 12, 1>}, {pipeline_mode = #tpu.pipeline_mode<synchronous>, transform_indices = @transform_13, window_bounds = array<i64: 12, 1>}, {pipeline_mode = #tpu.pipeline_mode<synchronous>, transform_indices = @transform_14, window_bounds = array<i64: 12, 1>}, {pipeline_mode = #tpu.pipeline_mode<synchronous>, transform_indices = @transform_15, window_bounds = array<i64: 12, 1>}, {pipeline_mode = #tpu.pipeline_mode<synchronous>, transform_indices = @transform_16, window_bounds = array<i64: 1, 1>}, {pipeline_mode = #tpu.pipeline_mode<synchronous>, transform_indices = @transform_17, window_bounds = array<i64: 1, 1>}, {transform_indices = @transform_18, window_bounds = array<i64: 2, 256>}]} {
    %c0 = arith.constant 0 : index
    %c0_0 = arith.constant 0 : index
    %0 = vector.load %arg2[%c0, %c0_0] : memref<8x256xf32, #tpu.memory_space<vmem>>, vector<8x256xf32>
    %c0_1 = arith.constant 0 : index
    %c0_2 = arith.constant 0 : index
    %1 = vector.load %arg3[%c0_1, %c0_2] : memref<12x4xf32, #tpu.memory_space<vmem>>, vector<12x4xf32>
    %c0_3 = arith.constant 0 : index
    %c0_4 = arith.constant 0 : index
    %2 = vector.load %arg4[%c0_3, %c0_4] : memref<12x1xf32, #tpu.memory_space<vmem>>, vector<12x1xf32>
    %c0_5 = arith.constant 0 : index
    %c0_6 = arith.constant 0 : index
    %3 = vector.load %arg5[%c0_5, %c0_6] : memref<12x108xf32, #tpu.memory_space<vmem>>, vector<12x108xf32>
    %c0_7 = arith.constant 0 : index
    %c0_8 = arith.constant 0 : index
    %4 = vector.load %arg6[%c0_7, %c0_8] : memref<12x1xf32, #tpu.memory_space<vmem>>, vector<12x1xf32>
    %c0_9 = arith.constant 0 : index
    %c0_10 = arith.constant 0 : index
    %5 = vector.load %arg7[%c0_9, %c0_10] : memref<12x108xf32, #tpu.memory_space<vmem>>, vector<12x108xf32>
    %c0_11 = arith.constant 0 : index
    %c0_12 = arith.constant 0 : index
    %6 = vector.load %arg8[%c0_11, %c0_12] : memref<12x1xf32, #tpu.memory_space<vmem>>, vector<12x1xf32>
    %c0_13 = arith.constant 0 : index
    %c0_14 = arith.constant 0 : index
    %7 = vector.load %arg9[%c0_13, %c0_14] : memref<1x108xf32, #tpu.memory_space<vmem>>, vector<1x108xf32>
    %c0_15 = arith.constant 0 : index
    %c0_16 = arith.constant 0 : index
    %8 = vector.load %arg10[%c0_15, %c0_16] : memref<1x1xf32, #tpu.memory_space<vmem>>, vector<1x1xf32>
    %c0_17 = arith.constant 0 : index
    %c0_18 = arith.constant 0 : index
    %9 = vector.load %arg11[%c0_17, %c0_18] : memref<12x1xf32, #tpu.memory_space<vmem>>, vector<12x1xf32>
    %c0_19 = arith.constant 0 : index
    %c0_20 = arith.constant 0 : index
    %10 = vector.load %arg12[%c0_19, %c0_20] : memref<12x1xf32, #tpu.memory_space<vmem>>, vector<12x1xf32>
    %c0_21 = arith.constant 0 : index
    %c0_22 = arith.constant 0 : index
    %11 = vector.load %arg13[%c0_21, %c0_22] : memref<12x1xf32, #tpu.memory_space<vmem>>, vector<12x1xf32>
    %c0_23 = arith.constant 0 : index
    %c0_24 = arith.constant 0 : index
    %12 = vector.load %arg14[%c0_23, %c0_24] : memref<12x1xf32, #tpu.memory_space<vmem>>, vector<12x1xf32>
    %c0_25 = arith.constant 0 : index
    %c0_26 = arith.constant 0 : index
    %13 = vector.load %arg15[%c0_25, %c0_26] : memref<12x1xf32, #tpu.memory_space<vmem>>, vector<12x1xf32>
    %c0_27 = arith.constant 0 : index
    %c0_28 = arith.constant 0 : index
    %14 = vector.load %arg16[%c0_27, %c0_28] : memref<12x1xf32, #tpu.memory_space<vmem>>, vector<12x1xf32>
    %c0_29 = arith.constant 0 : index
    %c0_30 = arith.constant 0 : index
    %15 = vector.load %arg17[%c0_29, %c0_30] : memref<1x1xf32, #tpu.memory_space<vmem>>, vector<1x1xf32>
    %c0_31 = arith.constant 0 : index
    %c0_32 = arith.constant 0 : index
    %16 = vector.load %arg18[%c0_31, %c0_32] : memref<1x1xf32, #tpu.memory_space<vmem>>, vector<1x1xf32>
    %c0_33 = arith.constant 0 : index
    %c0_34 = arith.constant 0 : index
    %c0_35 = arith.constant 0 : index
    %17 = vector.load %arg1[%c0_33, %c0_34, %c0_35] : memref<2x4x256xf32, #tpu.memory_space<vmem>>, vector<1x4x256xf32>
    %18 = vector.shape_cast %17 : vector<1x4x256xf32> to vector<4x256xf32>
    %cst = arith.constant dense<0.000000e+00> : vector<12x256xf32>
    %19 = tpu.matmul %1, %18, %cst {dimension_numbers = #tpu.dot_dimension_numbers<[1], [0], [0], [1], [0, 0, 1, 1], [], []>} : vector<12x4xf32>, vector<4x256xf32>, vector<12x256xf32> -> vector<12x256xf32>
    %20 = vector.broadcast %2 : vector<12x1xf32> to vector<12x256xf32>
    %21 = arith.addf %19, %20 : vector<12x256xf32>
    %cst_36 = arith.constant 0.000000e+00 : f32
    %22 = vector.broadcast %cst_36 : f32 to vector<12x256xf32>
    %23 = arith.cmpf oge, %21, %22 : vector<12x256xf32>
    %cst_37 = arith.constant 0.00999999977 : f32
    %24 = vector.broadcast %cst_37 : f32 to vector<12x256xf32>
    %25 = arith.mulf %24, %21 : vector<12x256xf32>
    %26 = arith.select %23, %21, %25 : vector<12x256xi1>, vector<12x256xf32>
    %cst_38 = arith.constant dense<0.000000e+00> : vector<12xf32>
    %27 = vector.multi_reduction <add>, %26, %cst_38 [1] : vector<12x256xf32> to vector<12xf32>
    %28 = vector.shape_cast %27 : vector<12xf32> to vector<12x1xf32>
    %cst_39 = arith.constant 2.560000e+02 : f32
    %29 = vector.broadcast %cst_39 : f32 to vector<12x1xf32>
    %30 = arith.divf %28, %29 : vector<12x1xf32>
    %31 = vector.broadcast %30 : vector<12x1xf32> to vector<12x256xf32>
    %32 = arith.subf %26, %31 : vector<12x256xf32>
    %33 = arith.mulf %32, %32 : vector<12x256xf32>
    %cst_40 = arith.constant dense<0.000000e+00> : vector<12xf32>
    %34 = vector.multi_reduction <add>, %33, %cst_40 [1] : vector<12x256xf32> to vector<12xf32>
    %35 = vector.shape_cast %34 : vector<12xf32> to vector<12x1xf32>
    %cst_41 = arith.constant 2.560000e+02 : f32
    %36 = vector.broadcast %cst_41 : f32 to vector<12x1xf32>
    %37 = arith.divf %35, %36 : vector<12x1xf32>
    %38 = vector.broadcast %30 : vector<12x1xf32> to vector<12x256xf32>
    %39 = arith.subf %26, %38 : vector<12x256xf32>
    %cst_42 = arith.constant 9.99999974E-6 : f32
    %40 = vector.broadcast %cst_42 : f32 to vector<12x1xf32>
    %41 = arith.addf %37, %40 : vector<12x1xf32>
    %42 = math.rsqrt %41 : vector<12x1xf32>
    %43 = vector.broadcast %42 : vector<12x1xf32> to vector<12x256xf32>
    %44 = arith.mulf %39, %43 : vector<12x256xf32>
    %45 = vector.broadcast %9 : vector<12x1xf32> to vector<12x256xf32>
    %46 = arith.mulf %44, %45 : vector<12x256xf32>
    %47 = vector.broadcast %10 : vector<12x1xf32> to vector<12x256xf32>
    %48 = arith.addf %46, %47 : vector<12x256xf32>
    %c17_i32 = arith.constant 17 : i32
    %49 = tpu.dynamic_rotate %48 by %c17_i32 dim 1 : vector<12x256xf32>, i32 -> vector<12x256xf32>
    %50 = vector.extract_strided_slice %0 {offsets = [0, 0], sizes = [1, 256], strides = [1, 1]} : vector<8x256xf32> to vector<1x256xf32>
    %51 = vector.broadcast %50 : vector<1x256xf32> to vector<12x256xf32>
    %52 = arith.mulf %49, %51 : vector<12x256xf32>
    %c16_i32 = arith.constant 16 : i32
    %53 = tpu.dynamic_rotate %48 by %c16_i32 dim 1 : vector<12x256xf32>, i32 -> vector<12x256xf32>
    %54 = vector.extract_strided_slice %0 {offsets = [1, 0], sizes = [1, 256], strides = [1, 1]} : vector<8x256xf32> to vector<1x256xf32>
    %55 = vector.broadcast %54 : vector<1x256xf32> to vector<12x256xf32>
    %56 = arith.mulf %53, %55 : vector<12x256xf32>
    %c15_i32 = arith.constant 15 : i32
    %57 = tpu.dynamic_rotate %48 by %c15_i32 dim 1 : vector<12x256xf32>, i32 -> vector<12x256xf32>
    %58 = vector.extract_strided_slice %0 {offsets = [2, 0], sizes = [1, 256], strides = [1, 1]} : vector<8x256xf32> to vector<1x256xf32>
    %59 = vector.broadcast %58 : vector<1x256xf32> to vector<12x256xf32>
    %60 = arith.mulf %57, %59 : vector<12x256xf32>
    %c1_i32 = arith.constant 1 : i32
    %61 = tpu.dynamic_rotate %48 by %c1_i32 dim 1 : vector<12x256xf32>, i32 -> vector<12x256xf32>
    %62 = vector.extract_strided_slice %0 {offsets = [3, 0], sizes = [1, 256], strides = [1, 1]} : vector<8x256xf32> to vector<1x256xf32>
    %63 = vector.broadcast %62 : vector<1x256xf32> to vector<12x256xf32>
    %64 = arith.mulf %61, %63 : vector<12x256xf32>
    %c255_i32 = arith.constant 255 : i32
    %65 = tpu.dynamic_rotate %48 by %c255_i32 dim 1 : vector<12x256xf32>, i32 -> vector<12x256xf32>
    %66 = vector.extract_strided_slice %0 {offsets = [4, 0], sizes = [1, 256], strides = [1, 1]} : vector<8x256xf32> to vector<1x256xf32>
    %67 = vector.broadcast %66 : vector<1x256xf32> to vector<12x256xf32>
    %68 = arith.mulf %65, %67 : vector<12x256xf32>
    %c241_i32 = arith.constant 241 : i32
    %69 = tpu.dynamic_rotate %48 by %c241_i32 dim 1 : vector<12x256xf32>, i32 -> vector<12x256xf32>
    %70 = vector.extract_strided_slice %0 {offsets = [5, 0], sizes = [1, 256], strides = [1, 1]} : vector<8x256xf32> to vector<1x256xf32>
    %71 = vector.broadcast %70 : vector<1x256xf32> to vector<12x256xf32>
    %72 = arith.mulf %69, %71 : vector<12x256xf32>
    %c240_i32 = arith.constant 240 : i32
    %73 = tpu.dynamic_rotate %48 by %c240_i32 dim 1 : vector<12x256xf32>, i32 -> vector<12x256xf32>
    %74 = vector.extract_strided_slice %0 {offsets = [6, 0], sizes = [1, 256], strides = [1, 1]} : vector<8x256xf32> to vector<1x256xf32>
    %75 = vector.broadcast %74 : vector<1x256xf32> to vector<12x256xf32>
    %76 = arith.mulf %73, %75 : vector<12x256xf32>
    %c239_i32 = arith.constant 239 : i32
    %77 = tpu.dynamic_rotate %48 by %c239_i32 dim 1 : vector<12x256xf32>, i32 -> vector<12x256xf32>
    %78 = vector.extract_strided_slice %0 {offsets = [7, 0], sizes = [1, 256], strides = [1, 1]} : vector<8x256xf32> to vector<1x256xf32>
    %79 = vector.broadcast %78 : vector<1x256xf32> to vector<12x256xf32>
    %80 = arith.mulf %77, %79 : vector<12x256xf32>
    %81 = tpu.concatenate %52, %56, %60, %64, %48, %68, %72, %76, %80 in 0 : vector<12x256xf32>, vector<12x256xf32>, vector<12x256xf32>, vector<12x256xf32>, vector<12x256xf32>, vector<12x256xf32>, vector<12x256xf32>, vector<12x256xf32>, vector<12x256xf32> -> vector<108x256xf32>
    %cst_43 = arith.constant dense<0.000000e+00> : vector<12x256xf32>
    %82 = tpu.matmul %3, %81, %cst_43 {dimension_numbers = #tpu.dot_dimension_numbers<[1], [0], [0], [1], [0, 0, 1, 1], [], []>} : vector<12x108xf32>, vector<108x256xf32>, vector<12x256xf32> -> vector<12x256xf32>
    %83 = vector.broadcast %4 : vector<12x1xf32> to vector<12x256xf32>
    %84 = arith.addf %82, %83 : vector<12x256xf32>
    %85 = arith.addf %48, %84 : vector<12x256xf32>
    %cst_44 = arith.constant 0.000000e+00 : f32
    %86 = vector.broadcast %cst_44 : f32 to vector<12x256xf32>
    %87 = arith.cmpf oge, %85, %86 : vector<12x256xf32>
    %cst_45 = arith.constant 0.00999999977 : f32
    %88 = vector.broadcast %cst_45 : f32 to vector<12x256xf32>
    %89 = arith.mulf %88, %85 : vector<12x256xf32>
    %90 = arith.select %87, %85, %89 : vector<12x256xi1>, vector<12x256xf32>
    %cst_46 = arith.constant dense<0.000000e+00> : vector<12xf32>
    %91 = vector.multi_reduction <add>, %90, %cst_46 [1] : vector<12x256xf32> to vector<12xf32>
    %92 = vector.shape_cast %91 : vector<12xf32> to vector<12x1xf32>
    %cst_47 = arith.constant 2.560000e+02 : f32
    %93 = vector.broadcast %cst_47 : f32 to vector<12x1xf32>
    %94 = arith.divf %92, %93 : vector<12x1xf32>
    %95 = vector.broadcast %94 : vector<12x1xf32> to vector<12x256xf32>
    %96 = arith.subf %90, %95 : vector<12x256xf32>
    %97 = arith.mulf %96, %96 : vector<12x256xf32>
    %cst_48 = arith.constant dense<0.000000e+00> : vector<12xf32>
    %98 = vector.multi_reduction <add>, %97, %cst_48 [1] : vector<12x256xf32> to vector<12xf32>
    %99 = vector.shape_cast %98 : vector<12xf32> to vector<12x1xf32>
    %cst_49 = arith.constant 2.560000e+02 : f32
    %100 = vector.broadcast %cst_49 : f32 to vector<12x1xf32>
    %101 = arith.divf %99, %100 : vector<12x1xf32>
    %102 = vector.broadcast %94 : vector<12x1xf32> to vector<12x256xf32>
    %103 = arith.subf %90, %102 : vector<12x256xf32>
    %cst_50 = arith.constant 9.99999974E-6 : f32
    %104 = vector.broadcast %cst_50 : f32 to vector<12x1xf32>
    %105 = arith.addf %101, %104 : vector<12x1xf32>
    %106 = math.rsqrt %105 : vector<12x1xf32>
    %107 = vector.broadcast %106 : vector<12x1xf32> to vector<12x256xf32>
    %108 = arith.mulf %103, %107 : vector<12x256xf32>
    %109 = vector.broadcast %11 : vector<12x1xf32> to vector<12x256xf32>
    %110 = arith.mulf %108, %109 : vector<12x256xf32>
    %111 = vector.broadcast %12 : vector<12x1xf32> to vector<12x256xf32>
    %112 = arith.addf %110, %111 : vector<12x256xf32>
    %c17_i32_51 = arith.constant 17 : i32
    %113 = tpu.dynamic_rotate %112 by %c17_i32_51 dim 1 : vector<12x256xf32>, i32 -> vector<12x256xf32>
    %114 = vector.extract_strided_slice %0 {offsets = [0, 0], sizes = [1, 256], strides = [1, 1]} : vector<8x256xf32> to vector<1x256xf32>
    %115 = vector.broadcast %114 : vector<1x256xf32> to vector<12x256xf32>
    %116 = arith.mulf %113, %115 : vector<12x256xf32>
    %c16_i32_52 = arith.constant 16 : i32
    %117 = tpu.dynamic_rotate %112 by %c16_i32_52 dim 1 : vector<12x256xf32>, i32 -> vector<12x256xf32>
    %118 = vector.extract_strided_slice %0 {offsets = [1, 0], sizes = [1, 256], strides = [1, 1]} : vector<8x256xf32> to vector<1x256xf32>
    %119 = vector.broadcast %118 : vector<1x256xf32> to vector<12x256xf32>
    %120 = arith.mulf %117, %119 : vector<12x256xf32>
    %c15_i32_53 = arith.constant 15 : i32
    %121 = tpu.dynamic_rotate %112 by %c15_i32_53 dim 1 : vector<12x256xf32>, i32 -> vector<12x256xf32>
    %122 = vector.extract_strided_slice %0 {offsets = [2, 0], sizes = [1, 256], strides = [1, 1]} : vector<8x256xf32> to vector<1x256xf32>
    %123 = vector.broadcast %122 : vector<1x256xf32> to vector<12x256xf32>
    %124 = arith.mulf %121, %123 : vector<12x256xf32>
    %c1_i32_54 = arith.constant 1 : i32
    %125 = tpu.dynamic_rotate %112 by %c1_i32_54 dim 1 : vector<12x256xf32>, i32 -> vector<12x256xf32>
    %126 = vector.extract_strided_slice %0 {offsets = [3, 0], sizes = [1, 256], strides = [1, 1]} : vector<8x256xf32> to vector<1x256xf32>
    %127 = vector.broadcast %126 : vector<1x256xf32> to vector<12x256xf32>
    %128 = arith.mulf %125, %127 : vector<12x256xf32>
    %c255_i32_55 = arith.constant 255 : i32
    %129 = tpu.dynamic_rotate %112 by %c255_i32_55 dim 1 : vector<12x256xf32>, i32 -> vector<12x256xf32>
    %130 = vector.extract_strided_slice %0 {offsets = [4, 0], sizes = [1, 256], strides = [1, 1]} : vector<8x256xf32> to vector<1x256xf32>
    %131 = vector.broadcast %130 : vector<1x256xf32> to vector<12x256xf32>
    %132 = arith.mulf %129, %131 : vector<12x256xf32>
    %c241_i32_56 = arith.constant 241 : i32
    %133 = tpu.dynamic_rotate %112 by %c241_i32_56 dim 1 : vector<12x256xf32>, i32 -> vector<12x256xf32>
    %134 = vector.extract_strided_slice %0 {offsets = [5, 0], sizes = [1, 256], strides = [1, 1]} : vector<8x256xf32> to vector<1x256xf32>
    %135 = vector.broadcast %134 : vector<1x256xf32> to vector<12x256xf32>
    %136 = arith.mulf %133, %135 : vector<12x256xf32>
    %c240_i32_57 = arith.constant 240 : i32
    %137 = tpu.dynamic_rotate %112 by %c240_i32_57 dim 1 : vector<12x256xf32>, i32 -> vector<12x256xf32>
    %138 = vector.extract_strided_slice %0 {offsets = [6, 0], sizes = [1, 256], strides = [1, 1]} : vector<8x256xf32> to vector<1x256xf32>
    %139 = vector.broadcast %138 : vector<1x256xf32> to vector<12x256xf32>
    %140 = arith.mulf %137, %139 : vector<12x256xf32>
    %c239_i32_58 = arith.constant 239 : i32
    %141 = tpu.dynamic_rotate %112 by %c239_i32_58 dim 1 : vector<12x256xf32>, i32 -> vector<12x256xf32>
    %142 = vector.extract_strided_slice %0 {offsets = [7, 0], sizes = [1, 256], strides = [1, 1]} : vector<8x256xf32> to vector<1x256xf32>
    %143 = vector.broadcast %142 : vector<1x256xf32> to vector<12x256xf32>
    %144 = arith.mulf %141, %143 : vector<12x256xf32>
    %145 = tpu.concatenate %116, %120, %124, %128, %112, %132, %136, %140, %144 in 0 : vector<12x256xf32>, vector<12x256xf32>, vector<12x256xf32>, vector<12x256xf32>, vector<12x256xf32>, vector<12x256xf32>, vector<12x256xf32>, vector<12x256xf32>, vector<12x256xf32> -> vector<108x256xf32>
    %cst_59 = arith.constant dense<0.000000e+00> : vector<12x256xf32>
    %146 = tpu.matmul %5, %145, %cst_59 {dimension_numbers = #tpu.dot_dimension_numbers<[1], [0], [0], [1], [0, 0, 1, 1], [], []>} : vector<12x108xf32>, vector<108x256xf32>, vector<12x256xf32> -> vector<12x256xf32>
    %147 = vector.broadcast %6 : vector<12x1xf32> to vector<12x256xf32>
    %148 = arith.addf %146, %147 : vector<12x256xf32>
    %149 = arith.addf %112, %148 : vector<12x256xf32>
    %cst_60 = arith.constant 0.000000e+00 : f32
    %150 = vector.broadcast %cst_60 : f32 to vector<12x256xf32>
    %151 = arith.cmpf oge, %149, %150 : vector<12x256xf32>
    %cst_61 = arith.constant 0.00999999977 : f32
    %152 = vector.broadcast %cst_61 : f32 to vector<12x256xf32>
    %153 = arith.mulf %152, %149 : vector<12x256xf32>
    %154 = arith.select %151, %149, %153 : vector<12x256xi1>, vector<12x256xf32>
    %cst_62 = arith.constant dense<0.000000e+00> : vector<12xf32>
    %155 = vector.multi_reduction <add>, %154, %cst_62 [1] : vector<12x256xf32> to vector<12xf32>
    %156 = vector.shape_cast %155 : vector<12xf32> to vector<12x1xf32>
    %cst_63 = arith.constant 2.560000e+02 : f32
    %157 = vector.broadcast %cst_63 : f32 to vector<12x1xf32>
    %158 = arith.divf %156, %157 : vector<12x1xf32>
    %159 = vector.broadcast %158 : vector<12x1xf32> to vector<12x256xf32>
    %160 = arith.subf %154, %159 : vector<12x256xf32>
    %161 = arith.mulf %160, %160 : vector<12x256xf32>
    %cst_64 = arith.constant dense<0.000000e+00> : vector<12xf32>
    %162 = vector.multi_reduction <add>, %161, %cst_64 [1] : vector<12x256xf32> to vector<12xf32>
    %163 = vector.shape_cast %162 : vector<12xf32> to vector<12x1xf32>
    %cst_65 = arith.constant 2.560000e+02 : f32
    %164 = vector.broadcast %cst_65 : f32 to vector<12x1xf32>
    %165 = arith.divf %163, %164 : vector<12x1xf32>
    %166 = vector.broadcast %158 : vector<12x1xf32> to vector<12x256xf32>
    %167 = arith.subf %154, %166 : vector<12x256xf32>
    %cst_66 = arith.constant 9.99999974E-6 : f32
    %168 = vector.broadcast %cst_66 : f32 to vector<12x1xf32>
    %169 = arith.addf %165, %168 : vector<12x1xf32>
    %170 = math.rsqrt %169 : vector<12x1xf32>
    %171 = vector.broadcast %170 : vector<12x1xf32> to vector<12x256xf32>
    %172 = arith.mulf %167, %171 : vector<12x256xf32>
    %173 = vector.broadcast %13 : vector<12x1xf32> to vector<12x256xf32>
    %174 = arith.mulf %172, %173 : vector<12x256xf32>
    %175 = vector.broadcast %14 : vector<12x1xf32> to vector<12x256xf32>
    %176 = arith.addf %174, %175 : vector<12x256xf32>
    %c17_i32_67 = arith.constant 17 : i32
    %177 = tpu.dynamic_rotate %176 by %c17_i32_67 dim 1 : vector<12x256xf32>, i32 -> vector<12x256xf32>
    %178 = vector.extract_strided_slice %0 {offsets = [0, 0], sizes = [1, 256], strides = [1, 1]} : vector<8x256xf32> to vector<1x256xf32>
    %179 = vector.broadcast %178 : vector<1x256xf32> to vector<12x256xf32>
    %180 = arith.mulf %177, %179 : vector<12x256xf32>
    %c16_i32_68 = arith.constant 16 : i32
    %181 = tpu.dynamic_rotate %176 by %c16_i32_68 dim 1 : vector<12x256xf32>, i32 -> vector<12x256xf32>
    %182 = vector.extract_strided_slice %0 {offsets = [1, 0], sizes = [1, 256], strides = [1, 1]} : vector<8x256xf32> to vector<1x256xf32>
    %183 = vector.broadcast %182 : vector<1x256xf32> to vector<12x256xf32>
    %184 = arith.mulf %181, %183 : vector<12x256xf32>
    %c15_i32_69 = arith.constant 15 : i32
    %185 = tpu.dynamic_rotate %176 by %c15_i32_69 dim 1 : vector<12x256xf32>, i32 -> vector<12x256xf32>
    %186 = vector.extract_strided_slice %0 {offsets = [2, 0], sizes = [1, 256], strides = [1, 1]} : vector<8x256xf32> to vector<1x256xf32>
    %187 = vector.broadcast %186 : vector<1x256xf32> to vector<12x256xf32>
    %188 = arith.mulf %185, %187 : vector<12x256xf32>
    %c1_i32_70 = arith.constant 1 : i32
    %189 = tpu.dynamic_rotate %176 by %c1_i32_70 dim 1 : vector<12x256xf32>, i32 -> vector<12x256xf32>
    %190 = vector.extract_strided_slice %0 {offsets = [3, 0], sizes = [1, 256], strides = [1, 1]} : vector<8x256xf32> to vector<1x256xf32>
    %191 = vector.broadcast %190 : vector<1x256xf32> to vector<12x256xf32>
    %192 = arith.mulf %189, %191 : vector<12x256xf32>
    %c255_i32_71 = arith.constant 255 : i32
    %193 = tpu.dynamic_rotate %176 by %c255_i32_71 dim 1 : vector<12x256xf32>, i32 -> vector<12x256xf32>
    %194 = vector.extract_strided_slice %0 {offsets = [4, 0], sizes = [1, 256], strides = [1, 1]} : vector<8x256xf32> to vector<1x256xf32>
    %195 = vector.broadcast %194 : vector<1x256xf32> to vector<12x256xf32>
    %196 = arith.mulf %193, %195 : vector<12x256xf32>
    %c241_i32_72 = arith.constant 241 : i32
    %197 = tpu.dynamic_rotate %176 by %c241_i32_72 dim 1 : vector<12x256xf32>, i32 -> vector<12x256xf32>
    %198 = vector.extract_strided_slice %0 {offsets = [5, 0], sizes = [1, 256], strides = [1, 1]} : vector<8x256xf32> to vector<1x256xf32>
    %199 = vector.broadcast %198 : vector<1x256xf32> to vector<12x256xf32>
    %200 = arith.mulf %197, %199 : vector<12x256xf32>
    %c240_i32_73 = arith.constant 240 : i32
    %201 = tpu.dynamic_rotate %176 by %c240_i32_73 dim 1 : vector<12x256xf32>, i32 -> vector<12x256xf32>
    %202 = vector.extract_strided_slice %0 {offsets = [6, 0], sizes = [1, 256], strides = [1, 1]} : vector<8x256xf32> to vector<1x256xf32>
    %203 = vector.broadcast %202 : vector<1x256xf32> to vector<12x256xf32>
    %204 = arith.mulf %201, %203 : vector<12x256xf32>
    %c239_i32_74 = arith.constant 239 : i32
    %205 = tpu.dynamic_rotate %176 by %c239_i32_74 dim 1 : vector<12x256xf32>, i32 -> vector<12x256xf32>
    %206 = vector.extract_strided_slice %0 {offsets = [7, 0], sizes = [1, 256], strides = [1, 1]} : vector<8x256xf32> to vector<1x256xf32>
    %207 = vector.broadcast %206 : vector<1x256xf32> to vector<12x256xf32>
    %208 = arith.mulf %205, %207 : vector<12x256xf32>
    %209 = tpu.concatenate %180, %184, %188, %192, %176, %196, %200, %204, %208 in 0 : vector<12x256xf32>, vector<12x256xf32>, vector<12x256xf32>, vector<12x256xf32>, vector<12x256xf32>, vector<12x256xf32>, vector<12x256xf32>, vector<12x256xf32>, vector<12x256xf32> -> vector<108x256xf32>
    %cst_75 = arith.constant dense<0.000000e+00> : vector<1x256xf32>
    %210 = tpu.matmul %7, %209, %cst_75 {dimension_numbers = #tpu.dot_dimension_numbers<[1], [0], [0], [1], [0, 0, 1, 1], [], []>} : vector<1x108xf32>, vector<108x256xf32>, vector<1x256xf32> -> vector<1x256xf32>
    %211 = vector.broadcast %8 : vector<1x1xf32> to vector<1x256xf32>
    %212 = arith.addf %210, %211 : vector<1x256xf32>
    %cst_76 = arith.constant 0.000000e+00 : f32
    %213 = vector.broadcast %cst_76 : f32 to vector<1x256xf32>
    %214 = arith.maximumf %212, %213 : vector<1x256xf32>
    %cst_77 = arith.constant dense<0.000000e+00> : vector<1xf32>
    %215 = vector.multi_reduction <add>, %214, %cst_77 [1] : vector<1x256xf32> to vector<1xf32>
    %216 = vector.shape_cast %215 : vector<1xf32> to vector<1x1xf32>
    %cst_78 = arith.constant 2.560000e+02 : f32
    %217 = vector.broadcast %cst_78 : f32 to vector<1x1xf32>
    %218 = arith.divf %216, %217 : vector<1x1xf32>
    %219 = vector.broadcast %218 : vector<1x1xf32> to vector<1x256xf32>
    %220 = arith.subf %214, %219 : vector<1x256xf32>
    %221 = arith.mulf %220, %220 : vector<1x256xf32>
    %cst_79 = arith.constant dense<0.000000e+00> : vector<1xf32>
    %222 = vector.multi_reduction <add>, %221, %cst_79 [1] : vector<1x256xf32> to vector<1xf32>
    %223 = vector.shape_cast %222 : vector<1xf32> to vector<1x1xf32>
    %cst_80 = arith.constant 2.560000e+02 : f32
    %224 = vector.broadcast %cst_80 : f32 to vector<1x1xf32>
    %225 = arith.divf %223, %224 : vector<1x1xf32>
    %226 = vector.broadcast %218 : vector<1x1xf32> to vector<1x256xf32>
    %227 = arith.subf %214, %226 : vector<1x256xf32>
    %cst_81 = arith.constant 9.99999974E-6 : f32
    %228 = vector.broadcast %cst_81 : f32 to vector<1x1xf32>
    %229 = arith.addf %225, %228 : vector<1x1xf32>
    %230 = math.rsqrt %229 : vector<1x1xf32>
    %231 = vector.broadcast %230 : vector<1x1xf32> to vector<1x256xf32>
    %232 = arith.mulf %227, %231 : vector<1x256xf32>
    %233 = vector.broadcast %15 : vector<1x1xf32> to vector<1x256xf32>
    %234 = arith.mulf %232, %233 : vector<1x256xf32>
    %235 = vector.broadcast %16 : vector<1x1xf32> to vector<1x256xf32>
    %236 = arith.addf %234, %235 : vector<1x256xf32>
    %c0_82 = arith.constant 0 : index
    %c0_83 = arith.constant 0 : index
    %237 = vector.load %arg19[%c0_82, %c0_83] : memref<2x256xf32, #tpu.memory_space<vmem>>, vector<1x256xf32>
    tpu.vector_store %arg19[%c0_82, %c0_83], %236 {strides = array<i32>} : memref<2x256xf32, #tpu.memory_space<vmem>>, vector<1x256xf32>,
    %c1 = arith.constant 1 : index
    %c0_84 = arith.constant 0 : index
    %c0_85 = arith.constant 0 : index
    %238 = vector.load %arg1[%c1, %c0_84, %c0_85] : memref<2x4x256xf32, #tpu.memory_space<vmem>>, vector<1x4x256xf32>
    %239 = vector.shape_cast %238 : vector<1x4x256xf32> to vector<4x256xf32>
    %cst_86 = arith.constant dense<0.000000e+00> : vector<12x256xf32>
    %240 = tpu.matmul %1, %239, %cst_86 {dimension_numbers = #tpu.dot_dimension_numbers<[1], [0], [0], [1], [0, 0, 1, 1], [], []>} : vector<12x4xf32>, vector<4x256xf32>, vector<12x256xf32> -> vector<12x256xf32>
    %241 = vector.broadcast %2 : vector<12x1xf32> to vector<12x256xf32>
    %242 = arith.addf %240, %241 : vector<12x256xf32>
    %cst_87 = arith.constant 0.000000e+00 : f32
    %243 = vector.broadcast %cst_87 : f32 to vector<12x256xf32>
    %244 = arith.cmpf oge, %242, %243 : vector<12x256xf32>
    %cst_88 = arith.constant 0.00999999977 : f32
    %245 = vector.broadcast %cst_88 : f32 to vector<12x256xf32>
    %246 = arith.mulf %245, %242 : vector<12x256xf32>
    %247 = arith.select %244, %242, %246 : vector<12x256xi1>, vector<12x256xf32>
    %cst_89 = arith.constant dense<0.000000e+00> : vector<12xf32>
    %248 = vector.multi_reduction <add>, %247, %cst_89 [1] : vector<12x256xf32> to vector<12xf32>
    %249 = vector.shape_cast %248 : vector<12xf32> to vector<12x1xf32>
    %cst_90 = arith.constant 2.560000e+02 : f32
    %250 = vector.broadcast %cst_90 : f32 to vector<12x1xf32>
    %251 = arith.divf %249, %250 : vector<12x1xf32>
    %252 = vector.broadcast %251 : vector<12x1xf32> to vector<12x256xf32>
    %253 = arith.subf %247, %252 : vector<12x256xf32>
    %254 = arith.mulf %253, %253 : vector<12x256xf32>
    %cst_91 = arith.constant dense<0.000000e+00> : vector<12xf32>
    %255 = vector.multi_reduction <add>, %254, %cst_91 [1] : vector<12x256xf32> to vector<12xf32>
    %256 = vector.shape_cast %255 : vector<12xf32> to vector<12x1xf32>
    %cst_92 = arith.constant 2.560000e+02 : f32
    %257 = vector.broadcast %cst_92 : f32 to vector<12x1xf32>
    %258 = arith.divf %256, %257 : vector<12x1xf32>
    %259 = vector.broadcast %251 : vector<12x1xf32> to vector<12x256xf32>
    %260 = arith.subf %247, %259 : vector<12x256xf32>
    %cst_93 = arith.constant 9.99999974E-6 : f32
    %261 = vector.broadcast %cst_93 : f32 to vector<12x1xf32>
    %262 = arith.addf %258, %261 : vector<12x1xf32>
    %263 = math.rsqrt %262 : vector<12x1xf32>
    %264 = vector.broadcast %263 : vector<12x1xf32> to vector<12x256xf32>
    %265 = arith.mulf %260, %264 : vector<12x256xf32>
    %266 = vector.broadcast %9 : vector<12x1xf32> to vector<12x256xf32>
    %267 = arith.mulf %265, %266 : vector<12x256xf32>
    %268 = vector.broadcast %10 : vector<12x1xf32> to vector<12x256xf32>
    %269 = arith.addf %267, %268 : vector<12x256xf32>
    %c17_i32_94 = arith.constant 17 : i32
    %270 = tpu.dynamic_rotate %269 by %c17_i32_94 dim 1 : vector<12x256xf32>, i32 -> vector<12x256xf32>
    %271 = vector.extract_strided_slice %0 {offsets = [0, 0], sizes = [1, 256], strides = [1, 1]} : vector<8x256xf32> to vector<1x256xf32>
    %272 = vector.broadcast %271 : vector<1x256xf32> to vector<12x256xf32>
    %273 = arith.mulf %270, %272 : vector<12x256xf32>
    %c16_i32_95 = arith.constant 16 : i32
    %274 = tpu.dynamic_rotate %269 by %c16_i32_95 dim 1 : vector<12x256xf32>, i32 -> vector<12x256xf32>
    %275 = vector.extract_strided_slice %0 {offsets = [1, 0], sizes = [1, 256], strides = [1, 1]} : vector<8x256xf32> to vector<1x256xf32>
    %276 = vector.broadcast %275 : vector<1x256xf32> to vector<12x256xf32>
    %277 = arith.mulf %274, %276 : vector<12x256xf32>
    %c15_i32_96 = arith.constant 15 : i32
    %278 = tpu.dynamic_rotate %269 by %c15_i32_96 dim 1 : vector<12x256xf32>, i32 -> vector<12x256xf32>
    %279 = vector.extract_strided_slice %0 {offsets = [2, 0], sizes = [1, 256], strides = [1, 1]} : vector<8x256xf32> to vector<1x256xf32>
    %280 = vector.broadcast %279 : vector<1x256xf32> to vector<12x256xf32>
    %281 = arith.mulf %278, %280 : vector<12x256xf32>
    %c1_i32_97 = arith.constant 1 : i32
    %282 = tpu.dynamic_rotate %269 by %c1_i32_97 dim 1 : vector<12x256xf32>, i32 -> vector<12x256xf32>
    %283 = vector.extract_strided_slice %0 {offsets = [3, 0], sizes = [1, 256], strides = [1, 1]} : vector<8x256xf32> to vector<1x256xf32>
    %284 = vector.broadcast %283 : vector<1x256xf32> to vector<12x256xf32>
    %285 = arith.mulf %282, %284 : vector<12x256xf32>
    %c255_i32_98 = arith.constant 255 : i32
    %286 = tpu.dynamic_rotate %269 by %c255_i32_98 dim 1 : vector<12x256xf32>, i32 -> vector<12x256xf32>
    %287 = vector.extract_strided_slice %0 {offsets = [4, 0], sizes = [1, 256], strides = [1, 1]} : vector<8x256xf32> to vector<1x256xf32>
    %288 = vector.broadcast %287 : vector<1x256xf32> to vector<12x256xf32>
    %289 = arith.mulf %286, %288 : vector<12x256xf32>
    %c241_i32_99 = arith.constant 241 : i32
    %290 = tpu.dynamic_rotate %269 by %c241_i32_99 dim 1 : vector<12x256xf32>, i32 -> vector<12x256xf32>
    %291 = vector.extract_strided_slice %0 {offsets = [5, 0], sizes = [1, 256], strides = [1, 1]} : vector<8x256xf32> to vector<1x256xf32>
    %292 = vector.broadcast %291 : vector<1x256xf32> to vector<12x256xf32>
    %293 = arith.mulf %290, %292 : vector<12x256xf32>
    %c240_i32_100 = arith.constant 240 : i32
    %294 = tpu.dynamic_rotate %269 by %c240_i32_100 dim 1 : vector<12x256xf32>, i32 -> vector<12x256xf32>
    %295 = vector.extract_strided_slice %0 {offsets = [6, 0], sizes = [1, 256], strides = [1, 1]} : vector<8x256xf32> to vector<1x256xf32>
    %296 = vector.broadcast %295 : vector<1x256xf32> to vector<12x256xf32>
    %297 = arith.mulf %294, %296 : vector<12x256xf32>
    %c239_i32_101 = arith.constant 239 : i32
    %298 = tpu.dynamic_rotate %269 by %c239_i32_101 dim 1 : vector<12x256xf32>, i32 -> vector<12x256xf32>
    %299 = vector.extract_strided_slice %0 {offsets = [7, 0], sizes = [1, 256], strides = [1, 1]} : vector<8x256xf32> to vector<1x256xf32>
    %300 = vector.broadcast %299 : vector<1x256xf32> to vector<12x256xf32>
    %301 = arith.mulf %298, %300 : vector<12x256xf32>
    %302 = tpu.concatenate %273, %277, %281, %285, %269, %289, %293, %297, %301 in 0 : vector<12x256xf32>, vector<12x256xf32>, vector<12x256xf32>, vector<12x256xf32>, vector<12x256xf32>, vector<12x256xf32>, vector<12x256xf32>, vector<12x256xf32>, vector<12x256xf32> -> vector<108x256xf32>
    %cst_102 = arith.constant dense<0.000000e+00> : vector<12x256xf32>
    %303 = tpu.matmul %3, %302, %cst_102 {dimension_numbers = #tpu.dot_dimension_numbers<[1], [0], [0], [1], [0, 0, 1, 1], [], []>} : vector<12x108xf32>, vector<108x256xf32>, vector<12x256xf32> -> vector<12x256xf32>
    %304 = vector.broadcast %4 : vector<12x1xf32> to vector<12x256xf32>
    %305 = arith.addf %303, %304 : vector<12x256xf32>
    %306 = arith.addf %269, %305 : vector<12x256xf32>
    %cst_103 = arith.constant 0.000000e+00 : f32
    %307 = vector.broadcast %cst_103 : f32 to vector<12x256xf32>
    %308 = arith.cmpf oge, %306, %307 : vector<12x256xf32>
    %cst_104 = arith.constant 0.00999999977 : f32
    %309 = vector.broadcast %cst_104 : f32 to vector<12x256xf32>
    %310 = arith.mulf %309, %306 : vector<12x256xf32>
    %311 = arith.select %308, %306, %310 : vector<12x256xi1>, vector<12x256xf32>
    %cst_105 = arith.constant dense<0.000000e+00> : vector<12xf32>
    %312 = vector.multi_reduction <add>, %311, %cst_105 [1] : vector<12x256xf32> to vector<12xf32>
    %313 = vector.shape_cast %312 : vector<12xf32> to vector<12x1xf32>
    %cst_106 = arith.constant 2.560000e+02 : f32
    %314 = vector.broadcast %cst_106 : f32 to vector<12x1xf32>
    %315 = arith.divf %313, %314 : vector<12x1xf32>
    %316 = vector.broadcast %315 : vector<12x1xf32> to vector<12x256xf32>
    %317 = arith.subf %311, %316 : vector<12x256xf32>
    %318 = arith.mulf %317, %317 : vector<12x256xf32>
    %cst_107 = arith.constant dense<0.000000e+00> : vector<12xf32>
    %319 = vector.multi_reduction <add>, %318, %cst_107 [1] : vector<12x256xf32> to vector<12xf32>
    %320 = vector.shape_cast %319 : vector<12xf32> to vector<12x1xf32>
    %cst_108 = arith.constant 2.560000e+02 : f32
    %321 = vector.broadcast %cst_108 : f32 to vector<12x1xf32>
    %322 = arith.divf %320, %321 : vector<12x1xf32>
    %323 = vector.broadcast %315 : vector<12x1xf32> to vector<12x256xf32>
    %324 = arith.subf %311, %323 : vector<12x256xf32>
    %cst_109 = arith.constant 9.99999974E-6 : f32
    %325 = vector.broadcast %cst_109 : f32 to vector<12x1xf32>
    %326 = arith.addf %322, %325 : vector<12x1xf32>
    %327 = math.rsqrt %326 : vector<12x1xf32>
    %328 = vector.broadcast %327 : vector<12x1xf32> to vector<12x256xf32>
    %329 = arith.mulf %324, %328 : vector<12x256xf32>
    %330 = vector.broadcast %11 : vector<12x1xf32> to vector<12x256xf32>
    %331 = arith.mulf %329, %330 : vector<12x256xf32>
    %332 = vector.broadcast %12 : vector<12x1xf32> to vector<12x256xf32>
    %333 = arith.addf %331, %332 : vector<12x256xf32>
    %c17_i32_110 = arith.constant 17 : i32
    %334 = tpu.dynamic_rotate %333 by %c17_i32_110 dim 1 : vector<12x256xf32>, i32 -> vector<12x256xf32>
    %335 = vector.extract_strided_slice %0 {offsets = [0, 0], sizes = [1, 256], strides = [1, 1]} : vector<8x256xf32> to vector<1x256xf32>
    %336 = vector.broadcast %335 : vector<1x256xf32> to vector<12x256xf32>
    %337 = arith.mulf %334, %336 : vector<12x256xf32>
    %c16_i32_111 = arith.constant 16 : i32
    %338 = tpu.dynamic_rotate %333 by %c16_i32_111 dim 1 : vector<12x256xf32>, i32 -> vector<12x256xf32>
    %339 = vector.extract_strided_slice %0 {offsets = [1, 0], sizes = [1, 256], strides = [1, 1]} : vector<8x256xf32> to vector<1x256xf32>
    %340 = vector.broadcast %339 : vector<1x256xf32> to vector<12x256xf32>
    %341 = arith.mulf %338, %340 : vector<12x256xf32>
    %c15_i32_112 = arith.constant 15 : i32
    %342 = tpu.dynamic_rotate %333 by %c15_i32_112 dim 1 : vector<12x256xf32>, i32 -> vector<12x256xf32>
    %343 = vector.extract_strided_slice %0 {offsets = [2, 0], sizes = [1, 256], strides = [1, 1]} : vector<8x256xf32> to vector<1x256xf32>
    %344 = vector.broadcast %343 : vector<1x256xf32> to vector<12x256xf32>
    %345 = arith.mulf %342, %344 : vector<12x256xf32>
    %c1_i32_113 = arith.constant 1 : i32
    %346 = tpu.dynamic_rotate %333 by %c1_i32_113 dim 1 : vector<12x256xf32>, i32 -> vector<12x256xf32>
    %347 = vector.extract_strided_slice %0 {offsets = [3, 0], sizes = [1, 256], strides = [1, 1]} : vector<8x256xf32> to vector<1x256xf32>
    %348 = vector.broadcast %347 : vector<1x256xf32> to vector<12x256xf32>
    %349 = arith.mulf %346, %348 : vector<12x256xf32>
    %c255_i32_114 = arith.constant 255 : i32
    %350 = tpu.dynamic_rotate %333 by %c255_i32_114 dim 1 : vector<12x256xf32>, i32 -> vector<12x256xf32>
    %351 = vector.extract_strided_slice %0 {offsets = [4, 0], sizes = [1, 256], strides = [1, 1]} : vector<8x256xf32> to vector<1x256xf32>
    %352 = vector.broadcast %351 : vector<1x256xf32> to vector<12x256xf32>
    %353 = arith.mulf %350, %352 : vector<12x256xf32>
    %c241_i32_115 = arith.constant 241 : i32
    %354 = tpu.dynamic_rotate %333 by %c241_i32_115 dim 1 : vector<12x256xf32>, i32 -> vector<12x256xf32>
    %355 = vector.extract_strided_slice %0 {offsets = [5, 0], sizes = [1, 256], strides = [1, 1]} : vector<8x256xf32> to vector<1x256xf32>
    %356 = vector.broadcast %355 : vector<1x256xf32> to vector<12x256xf32>
    %357 = arith.mulf %354, %356 : vector<12x256xf32>
    %c240_i32_116 = arith.constant 240 : i32
    %358 = tpu.dynamic_rotate %333 by %c240_i32_116 dim 1 : vector<12x256xf32>, i32 -> vector<12x256xf32>
    %359 = vector.extract_strided_slice %0 {offsets = [6, 0], sizes = [1, 256], strides = [1, 1]} : vector<8x256xf32> to vector<1x256xf32>
    %360 = vector.broadcast %359 : vector<1x256xf32> to vector<12x256xf32>
    %361 = arith.mulf %358, %360 : vector<12x256xf32>
    %c239_i32_117 = arith.constant 239 : i32
    %362 = tpu.dynamic_rotate %333 by %c239_i32_117 dim 1 : vector<12x256xf32>, i32 -> vector<12x256xf32>
    %363 = vector.extract_strided_slice %0 {offsets = [7, 0], sizes = [1, 256], strides = [1, 1]} : vector<8x256xf32> to vector<1x256xf32>
    %364 = vector.broadcast %363 : vector<1x256xf32> to vector<12x256xf32>
    %365 = arith.mulf %362, %364 : vector<12x256xf32>
    %366 = tpu.concatenate %337, %341, %345, %349, %333, %353, %357, %361, %365 in 0 : vector<12x256xf32>, vector<12x256xf32>, vector<12x256xf32>, vector<12x256xf32>, vector<12x256xf32>, vector<12x256xf32>, vector<12x256xf32>, vector<12x256xf32>, vector<12x256xf32> -> vector<108x256xf32>
    %cst_118 = arith.constant dense<0.000000e+00> : vector<12x256xf32>
    %367 = tpu.matmul %5, %366, %cst_118 {dimension_numbers = #tpu.dot_dimension_numbers<[1], [0], [0], [1], [0, 0, 1, 1], [], []>} : vector<12x108xf32>, vector<108x256xf32>, vector<12x256xf32> -> vector<12x256xf32>
    %368 = vector.broadcast %6 : vector<12x1xf32> to vector<12x256xf32>
    %369 = arith.addf %367, %368 : vector<12x256xf32>
    %370 = arith.addf %333, %369 : vector<12x256xf32>
    %cst_119 = arith.constant 0.000000e+00 : f32
    %371 = vector.broadcast %cst_119 : f32 to vector<12x256xf32>
    %372 = arith.cmpf oge, %370, %371 : vector<12x256xf32>
    %cst_120 = arith.constant 0.00999999977 : f32
    %373 = vector.broadcast %cst_120 : f32 to vector<12x256xf32>
    %374 = arith.mulf %373, %370 : vector<12x256xf32>
    %375 = arith.select %372, %370, %374 : vector<12x256xi1>, vector<12x256xf32>
    %cst_121 = arith.constant dense<0.000000e+00> : vector<12xf32>
    %376 = vector.multi_reduction <add>, %375, %cst_121 [1] : vector<12x256xf32> to vector<12xf32>
    %377 = vector.shape_cast %376 : vector<12xf32> to vector<12x1xf32>
    %cst_122 = arith.constant 2.560000e+02 : f32
    %378 = vector.broadcast %cst_122 : f32 to vector<12x1xf32>
    %379 = arith.divf %377, %378 : vector<12x1xf32>
    %380 = vector.broadcast %379 : vector<12x1xf32> to vector<12x256xf32>
    %381 = arith.subf %375, %380 : vector<12x256xf32>
    %382 = arith.mulf %381, %381 : vector<12x256xf32>
    %cst_123 = arith.constant dense<0.000000e+00> : vector<12xf32>
    %383 = vector.multi_reduction <add>, %382, %cst_123 [1] : vector<12x256xf32> to vector<12xf32>
    %384 = vector.shape_cast %383 : vector<12xf32> to vector<12x1xf32>
    %cst_124 = arith.constant 2.560000e+02 : f32
    %385 = vector.broadcast %cst_124 : f32 to vector<12x1xf32>
    %386 = arith.divf %384, %385 : vector<12x1xf32>
    %387 = vector.broadcast %379 : vector<12x1xf32> to vector<12x256xf32>
    %388 = arith.subf %375, %387 : vector<12x256xf32>
    %cst_125 = arith.constant 9.99999974E-6 : f32
    %389 = vector.broadcast %cst_125 : f32 to vector<12x1xf32>
    %390 = arith.addf %386, %389 : vector<12x1xf32>
    %391 = math.rsqrt %390 : vector<12x1xf32>
    %392 = vector.broadcast %391 : vector<12x1xf32> to vector<12x256xf32>
    %393 = arith.mulf %388, %392 : vector<12x256xf32>
    %394 = vector.broadcast %13 : vector<12x1xf32> to vector<12x256xf32>
    %395 = arith.mulf %393, %394 : vector<12x256xf32>
    %396 = vector.broadcast %14 : vector<12x1xf32> to vector<12x256xf32>
    %397 = arith.addf %395, %396 : vector<12x256xf32>
    %c17_i32_126 = arith.constant 17 : i32
    %398 = tpu.dynamic_rotate %397 by %c17_i32_126 dim 1 : vector<12x256xf32>, i32 -> vector<12x256xf32>
    %399 = vector.extract_strided_slice %0 {offsets = [0, 0], sizes = [1, 256], strides = [1, 1]} : vector<8x256xf32> to vector<1x256xf32>
    %400 = vector.broadcast %399 : vector<1x256xf32> to vector<12x256xf32>
    %401 = arith.mulf %398, %400 : vector<12x256xf32>
    %c16_i32_127 = arith.constant 16 : i32
    %402 = tpu.dynamic_rotate %397 by %c16_i32_127 dim 1 : vector<12x256xf32>, i32 -> vector<12x256xf32>
    %403 = vector.extract_strided_slice %0 {offsets = [1, 0], sizes = [1, 256], strides = [1, 1]} : vector<8x256xf32> to vector<1x256xf32>
    %404 = vector.broadcast %403 : vector<1x256xf32> to vector<12x256xf32>
    %405 = arith.mulf %402, %404 : vector<12x256xf32>
    %c15_i32_128 = arith.constant 15 : i32
    %406 = tpu.dynamic_rotate %397 by %c15_i32_128 dim 1 : vector<12x256xf32>, i32 -> vector<12x256xf32>
    %407 = vector.extract_strided_slice %0 {offsets = [2, 0], sizes = [1, 256], strides = [1, 1]} : vector<8x256xf32> to vector<1x256xf32>
    %408 = vector.broadcast %407 : vector<1x256xf32> to vector<12x256xf32>
    %409 = arith.mulf %406, %408 : vector<12x256xf32>
    %c1_i32_129 = arith.constant 1 : i32
    %410 = tpu.dynamic_rotate %397 by %c1_i32_129 dim 1 : vector<12x256xf32>, i32 -> vector<12x256xf32>
    %411 = vector.extract_strided_slice %0 {offsets = [3, 0], sizes = [1, 256], strides = [1, 1]} : vector<8x256xf32> to vector<1x256xf32>
    %412 = vector.broadcast %411 : vector<1x256xf32> to vector<12x256xf32>
    %413 = arith.mulf %410, %412 : vector<12x256xf32>
    %c255_i32_130 = arith.constant 255 : i32
    %414 = tpu.dynamic_rotate %397 by %c255_i32_130 dim 1 : vector<12x256xf32>, i32 -> vector<12x256xf32>
    %415 = vector.extract_strided_slice %0 {offsets = [4, 0], sizes = [1, 256], strides = [1, 1]} : vector<8x256xf32> to vector<1x256xf32>
    %416 = vector.broadcast %415 : vector<1x256xf32> to vector<12x256xf32>
    %417 = arith.mulf %414, %416 : vector<12x256xf32>
    %c241_i32_131 = arith.constant 241 : i32
    %418 = tpu.dynamic_rotate %397 by %c241_i32_131 dim 1 : vector<12x256xf32>, i32 -> vector<12x256xf32>
    %419 = vector.extract_strided_slice %0 {offsets = [5, 0], sizes = [1, 256], strides = [1, 1]} : vector<8x256xf32> to vector<1x256xf32>
    %420 = vector.broadcast %419 : vector<1x256xf32> to vector<12x256xf32>
    %421 = arith.mulf %418, %420 : vector<12x256xf32>
    %c240_i32_132 = arith.constant 240 : i32
    %422 = tpu.dynamic_rotate %397 by %c240_i32_132 dim 1 : vector<12x256xf32>, i32 -> vector<12x256xf32>
    %423 = vector.extract_strided_slice %0 {offsets = [6, 0], sizes = [1, 256], strides = [1, 1]} : vector<8x256xf32> to vector<1x256xf32>
    %424 = vector.broadcast %423 : vector<1x256xf32> to vector<12x256xf32>
    %425 = arith.mulf %422, %424 : vector<12x256xf32>
    %c239_i32_133 = arith.constant 239 : i32
    %426 = tpu.dynamic_rotate %397 by %c239_i32_133 dim 1 : vector<12x256xf32>, i32 -> vector<12x256xf32>
    %427 = vector.extract_strided_slice %0 {offsets = [7, 0], sizes = [1, 256], strides = [1, 1]} : vector<8x256xf32> to vector<1x256xf32>
    %428 = vector.broadcast %427 : vector<1x256xf32> to vector<12x256xf32>
    %429 = arith.mulf %426, %428 : vector<12x256xf32>
    %430 = tpu.concatenate %401, %405, %409, %413, %397, %417, %421, %425, %429 in 0 : vector<12x256xf32>, vector<12x256xf32>, vector<12x256xf32>, vector<12x256xf32>, vector<12x256xf32>, vector<12x256xf32>, vector<12x256xf32>, vector<12x256xf32>, vector<12x256xf32> -> vector<108x256xf32>
    %cst_134 = arith.constant dense<0.000000e+00> : vector<1x256xf32>
    %431 = tpu.matmul %7, %430, %cst_134 {dimension_numbers = #tpu.dot_dimension_numbers<[1], [0], [0], [1], [0, 0, 1, 1], [], []>} : vector<1x108xf32>, vector<108x256xf32>, vector<1x256xf32> -> vector<1x256xf32>
    %432 = vector.broadcast %8 : vector<1x1xf32> to vector<1x256xf32>
    %433 = arith.addf %431, %432 : vector<1x256xf32>
    %cst_135 = arith.constant 0.000000e+00 : f32
    %434 = vector.broadcast %cst_135 : f32 to vector<1x256xf32>
    %435 = arith.maximumf %433, %434 : vector<1x256xf32>
    %cst_136 = arith.constant dense<0.000000e+00> : vector<1xf32>
    %436 = vector.multi_reduction <add>, %435, %cst_136 [1] : vector<1x256xf32> to vector<1xf32>
    %437 = vector.shape_cast %436 : vector<1xf32> to vector<1x1xf32>
    %cst_137 = arith.constant 2.560000e+02 : f32
    %438 = vector.broadcast %cst_137 : f32 to vector<1x1xf32>
    %439 = arith.divf %437, %438 : vector<1x1xf32>
    %440 = vector.broadcast %439 : vector<1x1xf32> to vector<1x256xf32>
    %441 = arith.subf %435, %440 : vector<1x256xf32>
    %442 = arith.mulf %441, %441 : vector<1x256xf32>
    %cst_138 = arith.constant dense<0.000000e+00> : vector<1xf32>
    %443 = vector.multi_reduction <add>, %442, %cst_138 [1] : vector<1x256xf32> to vector<1xf32>
    %444 = vector.shape_cast %443 : vector<1xf32> to vector<1x1xf32>
    %cst_139 = arith.constant 2.560000e+02 : f32
    %445 = vector.broadcast %cst_139 : f32 to vector<1x1xf32>
    %446 = arith.divf %444, %445 : vector<1x1xf32>
    %447 = vector.broadcast %439 : vector<1x1xf32> to vector<1x256xf32>
    %448 = arith.subf %435, %447 : vector<1x256xf32>
    %cst_140 = arith.constant 9.99999974E-6 : f32
    %449 = vector.broadcast %cst_140 : f32 to vector<1x1xf32>
    %450 = arith.addf %446, %449 : vector<1x1xf32>
    %451 = math.rsqrt %450 : vector<1x1xf32>
    %452 = vector.broadcast %451 : vector<1x1xf32> to vector<1x256xf32>
    %453 = arith.mulf %448, %452 : vector<1x256xf32>
    %454 = vector.broadcast %15 : vector<1x1xf32> to vector<1x256xf32>
    %455 = arith.mulf %453, %454 : vector<1x256xf32>
    %456 = vector.broadcast %16 : vector<1x1xf32> to vector<1x256xf32>
    %457 = arith.addf %455, %456 : vector<1x256xf32>
    %c1_141 = arith.constant 1 : index
    %c0_142 = arith.constant 0 : index
    %458 = vector.load %arg19[%c1_141, %c0_142] : memref<2x256xf32, #tpu.memory_space<vmem>>, vector<1x256xf32>
    tpu.vector_store %arg19[%c1_141, %c0_142], %457 {strides = array<i32>} : memref<2x256xf32, #tpu.memory_space<vmem>>, vector<1x256xf32>,
    return
  }
  func.func @transform_0(%arg0: i32) -> (i32, i32, i32) {
    %c0_i32 = arith.constant 0 : i32
    %c0_i32_0 = arith.constant 0 : i32
    %c0_i32_1 = arith.constant 0 : i32
    return %arg0, %c0_i32, %c0_i32_0 : i32, i32, i32
  }
  func.func @transform_1(%arg0: i32) -> (i32, i32) {
    %c0_i32 = arith.constant 0 : i32
    %c0_i32_0 = arith.constant 0 : i32
    %c0_i32_1 = arith.constant 0 : i32
    return %c0_i32, %c0_i32_0 : i32, i32
  }
  func.func @transform_2(%arg0: i32) -> (i32, i32) {
    %c0_i32 = arith.constant 0 : i32
    %c0_i32_0 = arith.constant 0 : i32
    %c0_i32_1 = arith.constant 0 : i32
    return %c0_i32, %c0_i32_0 : i32, i32
  }
  func.func @transform_3(%arg0: i32) -> (i32, i32) {
    %c0_i32 = arith.constant 0 : i32
    %c0_i32_0 = arith.constant 0 : i32
    %c0_i32_1 = arith.constant 0 : i32
    return %c0_i32, %c0_i32_0 : i32, i32
  }
  func.func @transform_4(%arg0: i32) -> (i32, i32) {
    %c0_i32 = arith.constant 0 : i32
    %c0_i32_0 = arith.constant 0 : i32
    %c0_i32_1 = arith.constant 0 : i32
    return %c0_i32, %c0_i32_0 : i32, i32
  }
  func.func @transform_5(%arg0: i32) -> (i32, i32) {
    %c0_i32 = arith.constant 0 : i32
    %c0_i32_0 = arith.constant 0 : i32
    %c0_i32_1 = arith.constant 0 : i32
    return %c0_i32, %c0_i32_0 : i32, i32
  }
  func.func @transform_6(%arg0: i32) -> (i32, i32) {
    %c0_i32 = arith.constant 0 : i32
    %c0_i32_0 = arith.constant 0 : i32
    %c0_i32_1 = arith.constant 0 : i32
    return %c0_i32, %c0_i32_0 : i32, i32
  }
  func.func @transform_7(%arg0: i32) -> (i32, i32) {
    %c0_i32 = arith.constant 0 : i32
    %c0_i32_0 = arith.constant 0 : i32
    %c0_i32_1 = arith.constant 0 : i32
    return %c0_i32, %c0_i32_0 : i32, i32
  }
  func.func @transform_8(%arg0: i32) -> (i32, i32) {
    %c0_i32 = arith.constant 0 : i32
    %c0_i32_0 = arith.constant 0 : i32
    %c0_i32_1 = arith.constant 0 : i32
    return %c0_i32, %c0_i32_0 : i32, i32
  }
  func.func @transform_9(%arg0: i32) -> (i32, i32) {
    %c0_i32 = arith.constant 0 : i32
    %c0_i32_0 = arith.constant 0 : i32
    %c0_i32_1 = arith.constant 0 : i32
    return %c0_i32, %c0_i32_0 : i32, i32
  }
  func.func @transform_10(%arg0: i32) -> (i32, i32) {
    %c0_i32 = arith.constant 0 : i32
    %c0_i32_0 = arith.constant 0 : i32
    %c0_i32_1 = arith.constant 0 : i32
    return %c0_i32, %c0_i32_0 : i32, i32
  }
  func.func @transform_11(%arg0: i32) -> (i32, i32) {
    %c0_i32 = arith.constant 0 : i32
    %c0_i32_0 = arith.constant 0 : i32
    %c0_i32_1 = arith.constant 0 : i32
    return %c0_i32, %c0_i32_0 : i32, i32
  }
  func.func @transform_12(%arg0: i32) -> (i32, i32) {
    %c0_i32 = arith.constant 0 : i32
    %c0_i32_0 = arith.constant 0 : i32
    %c0_i32_1 = arith.constant 0 : i32
    return %c0_i32, %c0_i32_0 : i32, i32
  }
  func.func @transform_13(%arg0: i32) -> (i32, i32) {
    %c0_i32 = arith.constant 0 : i32
    %c0_i32_0 = arith.constant 0 : i32
    %c0_i32_1 = arith.constant 0 : i32
    return %c0_i32, %c0_i32_0 : i32, i32
  }
  func.func @transform_14(%arg0: i32) -> (i32, i32) {
    %c0_i32 = arith.constant 0 : i32
    %c0_i32_0 = arith.constant 0 : i32
    %c0_i32_1 = arith.constant 0 : i32
    return %c0_i32, %c0_i32_0 : i32, i32
  }
  func.func @transform_15(%arg0: i32) -> (i32, i32) {
    %c0_i32 = arith.constant 0 : i32
    %c0_i32_0 = arith.constant 0 : i32
    %c0_i32_1 = arith.constant 0 : i32
    return %c0_i32, %c0_i32_0 : i32, i32
  }
  func.func @transform_16(%arg0: i32) -> (i32, i32) {
    %c0_i32 = arith.constant 0 : i32
    %c0_i32_0 = arith.constant 0 : i32
    %c0_i32_1 = arith.constant 0 : i32
    return %c0_i32, %c0_i32_0 : i32, i32
  }
  func.func @transform_17(%arg0: i32) -> (i32, i32) {
    %c0_i32 = arith.constant 0 : i32
    %c0_i32_0 = arith.constant 0 : i32
    %c0_i32_1 = arith.constant 0 : i32
    return %c0_i32, %c0_i32_0 : i32, i32
  }
  func.func @transform_18(%arg0: i32) -> (i32, i32) {
    %c0_i32 = arith.constant 0 : i32
    %c0_i32_0 = arith.constant 0 : i32
    return %arg0, %c0_i32 : i32, i32
  }
}

</mosaic_0001>

<bundles_post_ra>
// kernel: tpu_custom_call.1
= control target key start
LH: loop header
LB: loop body
LE: loop exit
PB: predicated region body
PF: predicated region fallthrough
CT: control target
= control target key end

     0   :  { %s4382_s0 = inlined_call_operand.vmem [shape: f32[2,4,256], index: 0, kind: input, shape index: {}]   ;;  %s4383_s1 = inlined_call_operand.vmem [shape: f32[8,256], index: 1, kind: input, shape index: {}]   ;;  %s4384_s2 = inlined_call_operand.vmem [shape: f32[12,4], index: 2, kind: input, shape index: {}]   ;;  %s4385_s3 = inlined_call_operand.vmem [shape: f32[12,1], index: 3, kind: input, shape index: {}]   ;;  %s4386_s4 = inlined_call_operand.vmem [shape: f32[12,108], index: 4, kind: input, shape index: {}]   ;;  %s4387_s5 = inlined_call_operand.vmem [shape: f32[12,1], index: 5, kind: input, shape index: {}]   ;;  %s4388_s6 = inlined_call_operand.vmem [shape: f32[12,108], index: 6, kind: input, shape index: {}]   ;;  %s4389_s7 = inlined_call_operand.vmem [shape: f32[12,1], index: 7, kind: input, shape index: {}]   ;;  %s4390_s8 = inlined_call_operand.vmem [shape: f32[1,108], index: 8, kind: input, shape index: {}]   ;;  %s4391_s9 = inlined_call_operand.<no memory space> [shape: f32[1,1], index: 9, kind: input, shape index: {}]   ;;  %s4392_s10 = inlined_call_operand.vmem [shape: f32[12,1], index: 10, kind: input, shape index: {}]   ;;  %s4393_s11 = inlined_call_operand.vmem [shape: f32[12,1], index: 11, kind: input, shape index: {}]   ;;  %s4394_s12 = inlined_call_operand.vmem [shape: f32[12,1], index: 12, kind: input, shape index: {}]   ;;  %s4395_s13 = inlined_call_operand.vmem [shape: f32[12,1], index: 13, kind: input, shape index: {}]   ;;  %s4396_s14 = inlined_call_operand.vmem [shape: f32[12,1], index: 14, kind: input, shape index: {}]   ;;  %s4397_s15 = inlined_call_operand.vmem [shape: f32[12,1], index: 15, kind: input, shape index: {}]   ;;  %s4398_s18 = inlined_call_operand.hbm [shape: f32[2,256], index: 18, kind: output, shape index: {}]   ;;  %s4399_s16 = inlined_call_operand.<no memory space> [shape: f32[1,1], index: 16, kind: input, shape index: {}]   ;;  %s4400_s17 = inlined_call_operand.<no memory space> [shape: f32[1,1], index: 17, kind: input, shape index: {}]  }
   0x1   :  { %4413 = sst [smem:[#allocation12_spill]] %s4382_s0  ;;  %v23_v0 = vstv %s4391_s9  ;;  %v25_v1 = vstv %s4399_s16  ;;  %v27_v2 = vstv %s4400_s17 }
   0x2   :  { %4414 = sst [smem:[#allocation13_spill]] %s4383_s1  ;;  %24 = vst [vmem:[#allocation2] sm:$0x1] %v23_v0 }
   0x3   :  { %4415 = sst [smem:[#allocation14_spill]] %s4384_s2  ;;  %26 = vst [vmem:[#allocation3] sm:$0x1] %v25_v1 }
   0x4   :  { %28 = vst [vmem:[#allocation4] sm:$0x1] %v27_v2 }
   0x5   :  { %s4416_s21 = sld [smem:[#allocation12_spill]]  ;;  %v2509_v4 = vmov 0   ;;  %v71_v5 = vld [vmem:[%s4385_s3 + $0x8] sm:$0xf] }
   0x6   :  { %2444 = vset.pattern.permute.xlu0 %v2509_v4  ;;  %2446 = vset.pattern.permute.xlu2 %v2509_v4 }
   0x7   :  { %104 = vperm.xlu0 %2444, %v71_v5   ;;  %2445 = vset.pattern.permute.xlu1 %v2509_v4 }
   0xb   :  { %v96_v3 = vld [vmem:[%s4416_s21] sm:$0xff] }
   0xc   :  { %108 = vst [vmem:[#allocation1] ss:$2 sm:$0xff] %v96_v3 }
   0xd   :  { %29 = vsyncpa [#allocation6], 0  ;;  %vm118_vm0 = vcmask 1043456   ;;  %v2410_v6 = vld [vmem:[%s4416_s21 + $0x8] sm:$0xff]  ;;  %s4417_s24 = sld [smem:[#allocation14_spill]]  ;;  %vm111_vm1 = vcmask 31744  }
   0xe   :  { %v70_v8 = vld [vmem:[%s4385_s3] sm:$0xff]  ;;  %v83_v12 = vld [vmem:[%s4392_s10 + $0x8] sm:$0xf]  ;;  %v2510_v37 = vmov 256.0   ;;  %s2512_s21 = smov 111   ;;  %s2513_s22 = smov 127  }
   0xf   :  { %99 = vperm.xlu0 %2444, %v70_v8   ;;  %v84_v13 = vld [vmem:[%s4393_s11] sm:$0xff]  ;;  %v85_v14 = vld [vmem:[%s4393_s11 + $0x8] sm:$0xf]  ;;  %2447 = vrcp.f32 %v2510_v37  ;;  %s2514_s9 = smov 113   ;;  %s2515_s16 = smov 15  }
  0x10   :  { %263 = vperm.xlu2 %2446, %v85_v14   ;;  %v82_v41 = vld [vmem:[%s4392_s10] sm:$0xff]  ;;  %s2511_s10 = smov 112   ;;  %s2516_s17 = smov 1  }
  0x11   :  { %s2517_s2 = smov 16   ;;  %s2518_s23 = smov 17   ;;  %v86_v37 = vld [vmem:[%s4394_s12] sm:$0xff] }
  0x12   :  { %s4418_s0 = sld [smem:[#allocation13_spill]] }
  0x13   :  { %v68_v7 = vld [vmem:[%s4417_s24] sm:$0xff]  ;;  %v110_v10 = vld.sshfl [vmem:[#allocation1 + $0x8] sm:$0xff pattern:$0x75316420] }
  0x14   :  { %v109_v9 = vld.sshfl [vmem:[#allocation1] sm:$0xff pattern:$0x75316420]  ;;  %2391 = vmatpush.msk.msra.mxu3 %vm118_vm0, %v110_v10  ;;  %v69_v11 = vld [vmem:[%s4417_s24 + $0x8] sm:$0xf] }
  0x15   :  { %2388 = vmatpush.msk.msra.mxu2 %vm118_vm0, %v109_v9  ;;  %1321 = vst [vmem:[#allocation1] ss:$2 sm:$0xff] %v2410_v6  ;;  %2392 = vmatmul.msk.f32.vlgmr.msra.gmra.mxu3 %vm111_vm1, %v68_v7  ;;  %v2448_v38 = vpop.eup %2447 }
  0x16   :  { %2389 = vmatmul.msk.f32.vlgmr.msra.gmra.mxu2 %vm111_vm1, %v68_v7  ;;  %v190_v39 = vmul.f32 256.0, %v2448_v38  ;;  %vm194_vm6 = vweird.f32 %v2448_v38 }
  0x17   :  { %249 = vperm.xlu0 %2444, %v83_v12  }
  0x18   :  { %v191_v40 = vsub.f32 1.0, %v190_v39 }
  0x1a   :  { %v192_v42 = vmul.f32 %v2448_v38, %v191_v40 }
  0x1c   :  { %v193_v44 = vadd.f32 %v2448_v38, %v192_v42 }
  0x1d   :  { %2393 = vmatmul.msk.f32.gmra.mxu3 %vm111_vm1, %v69_v11 }
  0x1e   :  { %2390 = vmatmul.msk.f32.gmra.mxu2 %vm111_vm1, %v69_v11  ;;  %v2670_v45 = vsel %vm194_vm6, %v2448_v38, %v193_v44 }
  0x1f   :  { %258 = vperm.xlu0 %2444, %v84_v13  }
  0x6a   :  { %v2680_v61 = vpop.permute.xlu2 %263 }
  0x79   :  { %v2657_v17 = vpop.permute.xlu0 %104 }
  0x81   :  { %v2661_v22 = vpop.permute.xlu0 %99 }
  0x89   :  { %v2684_v7 = vpop.permute.xlu0 %249 }
  0x98   :  { %v163_v16 = vpop.f32.mrf.mxu3 }
  0x99   :  { %v140_v15 = vpop.f32.mrf.mxu2  ;;  %v164_v26 = vadd.f32 %v163_v16, %v2661_v22 }
  0x9a   :  { %v141_v25 = vadd.f32 %v140_v15, %v2661_v22 }
  0x9b   :  { %v174_v33 = vmul.f32 0.01, %v164_v26  ;;  %vm170_vm5 = vcmp.ge.f32.partialorder %v164_v26, 0.0 }
  0x9c   :  { %v173_v32 = vmul.f32 0.01, %v141_v25  ;;  %vm169_vm4 = vcmp.ge.f32.partialorder %v141_v25, 0.0 }
  0x9d   :  { %v178_v35 = vsel %vm170_vm5, %v164_v26, %v174_v33 }
  0x9e   :  { %v177_v34 = vsel %vm169_vm4, %v141_v25, %v173_v32 }
  0x9f   :  { %v181_v36 = vadd.f32 %v178_v35, %v177_v34 }
  0xa0   :  { %v166_v19 = vpop.f32.mrf.mxu3 }
  0xa1   :  { %v143_v18 = vpop.f32.mrf.mxu2  ;;  %v167_v21 = vadd.f32 %v166_v19, %v2657_v17 }
  0xa2   :  { %v144_v20 = vadd.f32 %v143_v18, %v2657_v17 }
  0xa3   :  { %v176_v24 = vmul.f32 0.01, %v167_v21  ;;  %vm172_vm3 = vcmp.ge.f32.partialorder %v167_v21, 0.0 }
  0xa4   :  { %v175_v23 = vmul.f32 0.01, %v144_v20  ;;  %vm171_vm2 = vcmp.ge.f32.partialorder %v144_v20, 0.0 }
  0xa5   :  { %v180_v28 = vsel %vm172_vm3, %v167_v21, %v176_v24  ;;  %v2690_v21 = vpop.permute.xlu0 %258 }
  0xa6   :  { %v179_v27 = vsel %vm171_vm2, %v144_v20, %v175_v23  ;;  %v185_v30 = vsel %vm118_vm0, %v180_v28, 0.0 }
  0xa7   :  { %v184_v29 = vsel %vm118_vm0, %v179_v27, 0.0 }
  0xa8   :  { %v186_v31 = vadd.f32 %v185_v30, %v184_v29 }
  0xaa   :  { %187 = vadd.xlane.f32.xlu1 %v186_v31 }
  0xb2   :  { %182 = vadd.xlane.f32.xlu1 %v181_v36  ;;  %v75_v36 = vld [vmem:[%s4387_s5 + $0x8] sm:$0xf] }
  0xcb   :  { %244 = vperm.xlu1 %2445, %v82_v41  }
 0x11d   :  { %v188_v43 = vpop.xlane.xlu1 %187 }
 0x11e   :  { %v197_v46 = vmul.f32 %v2670_v45, %v188_v43 }
 0x120   :  { %v2674_v51 = vsub.f32 %v179_v27, %v197_v46  ;;  %v201_v52 = vsub.f32 %v180_v28, %v197_v46 }
 0x122   :  { %v204_v56 = vmul.f32 %v2674_v51, %v2674_v51  ;;  %v205_v57 = vmul.f32 %v201_v52, %v201_v52 }
 0x124   :  { %v209_v58 = vsel %vm118_vm0, %v204_v56, 0.0  ;;  %v210_v59 = vsel %vm118_vm0, %v205_v57, 0.0 }
 0x125   :  { %v183_v47 = vpop.xlane.xlu1 %182  ;;  %v211_v60 = vadd.f32 %v210_v59, %v209_v58  ;;  %v2802_v59 = vld [vmem:[%s4418_s0] sm:$0xff] }
 0x126   :  { %v196_v48 = vmul.f32 %v2670_v45, %v183_v47 }
 0x128   :  { %v198_v49 = vsub.f32 %v177_v34, %v196_v48  ;;  %v199_v50 = vsub.f32 %v178_v35, %v196_v48  ;;  %v74_v35 = vld [vmem:[%s4387_s5] sm:$0xff] }
 0x12a   :  { %v202_v53 = vmul.f32 %v198_v49, %v198_v49  ;;  %v203_v54 = vmul.f32 %v199_v50, %v199_v50 }
 0x12c   :  { %v206_v55 = vadd.f32 %v203_v54, %v202_v53  ;;  %v4404_v54 = vlaneseq }
 0x12e   :  { %207 = vadd.xlane.f32.xlu2 %v206_v55  ;;  %v2795_v55 = vand.u32 127, %v4404_v54 }
 0x130   :  { %vm394_vm13 = vcmp.lt.s32.totalorder %v2795_v55, 112  ;;  %vm413_vm14 = vcmp.lt.s32.totalorder %v2795_v55, 111  ;;  %vm356_vm15 = vcmp.lt.s32.totalorder %v2795_v55, 127  ;;  %vm375_vm2 = vcmp.lt.s32.totalorder %v2795_v55, 113 }
 0x131   :  { %vm337_vm3 = vcmp.lt.s32.totalorder %v2795_v55, 1  ;;  %vm318_vm4 = vcmp.lt.s32.totalorder %v2795_v55, 15  ;;  %vm299_vm5 = vcmp.lt.s32.totalorder %v2795_v55, 16  ;;  %vm280_vm6 = vcmp.lt.s32.totalorder %v2795_v55, 17 }
 0x136   :  { %212 = vadd.xlane.f32.xlu2 %v211_v60  ;;  %v2808_v60 = vld [vmem:[%s4418_s0 + $0x8] sm:$0xff] }
 0x13d   :  { %v2686_v14 = vpop.permute.xlu1 %244 }
 0x1a1   :  { %v208_v62 = vpop.xlane.xlu2 %207 }
 0x1a2   :  { %v214_v63 = vmul.f32 %v208_v62, %v2670_v45  ;;  %v2811_v62 = vperm.slane %v2802_v59, 6 }
 0x1a4   :  { %v216_v0 = vadd.f32 1e-05, %v214_v63 }
 0x1a6   :  { %2449 = vrsqrt.f32 %v216_v0  ;;  %vm224_vm8 = vweird.f32 %v216_v0 }
 0x1a9   :  { %v213_v1 = vpop.xlane.xlu2 %212 }
 0x1aa   :  { %v215_v2 = vmul.f32 %v213_v1, %v2670_v45 }
 0x1ac   :  { %v2450_v3 = vpop.eup %2449  ;;  %v217_v4 = vadd.f32 1e-05, %v215_v2  ;;  %v2820_v2 = vperm.slane %v2808_v60, 6 }
 0x1ad   :  { %v219_v5 = vmul.f32 %v2450_v3, %v216_v0  ;;  %vm225_vm7 = vweird.f32 %v2450_v3 }
 0x1ae   :  { %2451 = vrsqrt.f32 %v217_v4  ;;  %vm226_vm9 = vmor %vm224_vm8, %vm225_vm7  ;;  %vm234_vm11 = vweird.f32 %v217_v4  ;;  %vm498_vm7 = vcmask 883712  }
 0x1af   :  { %v220_v6 = vmul.f32 %v2450_v3, %v219_v5  ;;  %v2830_v5 = vperm.slane %v2802_v59, 4 }
 0x1b1   :  { %v221_v8 = vmul.f32 0.5, %v220_v6 }
 0x1b3   :  { %v222_v9 = vsub.f32 1.5, %v221_v8 }
 0x1b4   :  { %v2452_v10 = vpop.eup %2451 }
 0x1b5   :  { %v223_v11 = vmul.f32 %v2450_v3, %v222_v9  ;;  %v229_v12 = vmul.f32 %v2452_v10, %v217_v4  ;;  %vm235_vm10 = vweird.f32 %v2452_v10  ;;  %v2827_v4 = vperm.slane %v2802_v59, 7 }
 0x1b6   :  { %vm236_vm12 = vmor %vm234_vm11, %vm235_vm10  ;;  %v2835_v9 = vperm.slane %v2808_v60, 7 }
 0x1b7   :  { %v227_v13 = vsel %vm226_vm9, %v2450_v3, %v223_v11  ;;  %v230_v18 = vmul.f32 %v2452_v10, %v229_v12  ;;  %v2839_v11 = vperm.slane %v2808_v60, 4 }
 0x1b8   :  { %v238_v15 = vmul.f32 %v227_v13, %v198_v49  ;;  %v239_v16 = vmul.f32 %v227_v13, %v199_v50 }
 0x1b9   :  { %v231_v25 = vmul.f32 0.5, %v230_v18 }
 0x1ba   :  { %v252_v19 = vmul.f32 %v2686_v14, %v238_v15  ;;  %v253_v20 = vmul.f32 %v2686_v14, %v239_v16 }
 0x1bb   :  { %v232_v26 = vsub.f32 1.5, %v231_v25 }
 0x1bc   :  { %v2693_v23 = vadd.f32 %v2690_v21, %v252_v19  ;;  %v2696_v24 = vadd.f32 %v2690_v21, %v253_v20 }
 0x1bd   :  { %v233_v27 = vmul.f32 %v2452_v10, %v232_v26 }
 0x1be   :  { %390 = vrot.lane.b32.xlu0 %v2696_v24, %s2511_s10  ;;  %405 = vrot.lane.b32.xlu1 %v2693_v23, %s2512_s21 }
 0x1bf   :  { %386 = vrot.lane.b32.xlu2 %v2693_v23, %s2511_s10  ;;  %v237_v28 = vsel %vm236_vm12, %v2452_v10, %v233_v27  ;;  %v2856_v27 = vperm.slane %v2802_v59, 5 }
 0x1c0   :  { %v241_v29 = vmul.f32 %v237_v28, %v201_v52  ;;  %v240_v31 = vmul.f32 %v237_v28, %v2674_v51 }
 0x1c2   :  { %v255_v30 = vmul.f32 %v2684_v7, %v241_v29  ;;  %v254_v33 = vmul.f32 %v2684_v7, %v240_v31 }
 0x1c4   :  { %v2719_v32 = vadd.f32 %v2680_v61, %v255_v30  ;;  %v2729_v34 = vadd.f32 %v2680_v61, %v254_v33 }
 0x1c6   :  { %409 = vrot.lane.b32.xlu0 %v2696_v24, %s2512_s21  ;;  %352 = vrot.lane.b32.xlu1 %v2696_v24, %s2513_s22 }
 0x1c7   :  { %367 = vrot.lane.b32.xlu2 %v2693_v23, %s2514_s9 }
 0x1ce   :  { %348 = vrot.lane.b32.xlu0 %v2693_v23, %s2513_s22  ;;  %371 = vrot.lane.b32.xlu1 %v2696_v24, %s2514_s9 }
 0x1cf   :  { %310 = vrot.lane.b32.xlu2 %v2693_v23, %s2515_s16 }
 0x1d6   :  { %329 = vrot.lane.b32.xlu0 %v2693_v23, %s2516_s17  ;;  %333 = vrot.lane.b32.xlu1 %v2696_v24, %s2516_s17 }
 0x1d7   :  { %392 = vrot.lane.b32.xlu2 %v2719_v32, %s2511_s10 }
 0x1de   :  { %291 = vrot.lane.b32.xlu0 %v2693_v23, %s2517_s2  ;;  %295 = vrot.lane.b32.xlu1 %v2696_v24, %s2517_s2 }
 0x1df   :  { %369 = vrot.lane.b32.xlu2 %v2729_v34, %s2514_s9 }
 0x1e6   :  { %407 = vrot.lane.b32.xlu0 %v2729_v34, %s2512_s21  ;;  %388 = vrot.lane.b32.xlu1 %v2729_v34, %s2511_s10 }
 0x1e7   :  { %350 = vrot.lane.b32.xlu2 %v2729_v34, %s2513_s22 }
 0x1ee   :  { %411 = vrot.lane.b32.xlu0 %v2719_v32, %s2512_s21  ;;  %373 = vrot.lane.b32.xlu1 %v2719_v32, %s2514_s9 }
 0x1ef   :  { %331 = vrot.lane.b32.xlu2 %v2729_v34, %s2516_s17 }
 0x1f6   :  { %354 = vrot.lane.b32.xlu0 %v2719_v32, %s2513_s22  ;;  %316 = vrot.lane.b32.xlu1 %v2719_v32, %s2515_s16 }
 0x1f7   :  { %312 = vrot.lane.b32.xlu2 %v2729_v34, %s2515_s16 }
 0x1fe   :  { %335 = vrot.lane.b32.xlu0 %v2719_v32, %s2516_s17  ;;  %314 = vrot.lane.b32.xlu1 %v2696_v24, %s2515_s16 }
 0x1ff   :  { %293 = vrot.lane.b32.xlu2 %v2729_v34, %s2517_s2 }
 0x206   :  { %297 = vrot.lane.b32.xlu0 %v2719_v32, %s2517_s2  ;;  %270 = vrot.lane.b32.xlu1 %v2693_v23, %s2518_s23 }
 0x207   :  { %276 = vrot.lane.b32.xlu2 %v2719_v32, %s2518_s23 }
 0x20e   :  { %272 = vrot.lane.b32.xlu0 %v2729_v34, %s2518_s23  ;;  %490 = vperm.xlu1 %2445, %v74_v35  }
 0x20f   :  { %495 = vperm.xlu2 %2446, %v75_v36  }
 0x216   :  { %274 = vrot.lane.b32.xlu0 %v2696_v24, %s2518_s23  ;;  %629 = vperm.xlu1 %2445, %v86_v37  }
 0x219   :  { %v387_v38 = vpop.permute.xlu2 %386 }
 0x221   :  { %v2780_v39 = vpop.permute.xlu2 %367 }
 0x229   :  { %v2782_v44 = vpop.permute.xlu2 %310 }
 0x230   :  { %v391_v40 = vpop.permute.xlu0 %390  ;;  %v406_v41 = vpop.permute.xlu1 %405 }
 0x231   :  { %v393_v48 = vpop.permute.xlu2 %392  ;;  %v395_v1 = vsel %vm394_vm13, %v387_v38, %v391_v40  ;;  %v397_v3 = vsel %vm394_vm13, %v391_v40, %v387_v38  ;;  %v2868_v38 = vperm.slane %v2808_v60, 5 }
 0x232   :  { %v401_v10 = vmul.f32 %v2811_v62, %v395_v1  ;;  %v402_v16 = vmul.f32 %v2820_v2, %v397_v3 }
 0x238   :  { %v410_v42 = vpop.permute.xlu0 %409  ;;  %v353_v43 = vpop.permute.xlu1 %352 }
 0x239   :  { %v370_v51 = vpop.permute.xlu2 %369  ;;  %v414_v15 = vsel %vm413_vm14, %v406_v41, %v410_v42  ;;  %v416_v20 = vsel %vm413_vm14, %v410_v42, %v406_v41  ;;  %v470_v42 = vrot.slane %v401_v10, 4 }
 0x23a   :  { %v420_v31 = vmul.f32 %v2827_v4, %v414_v15  ;;  %v421_v40 = vmul.f32 %v2835_v9, %v416_v20 }
 0x240   :  { %v349_v46 = vpop.permute.xlu0 %348  ;;  %v2784_v47 = vpop.permute.xlu1 %371 }
 0x241   :  { %v2797_v56 = vpop.permute.xlu2 %350  ;;  %v357_v36 = vsel %vm356_vm15, %v349_v46, %v353_v43  ;;  %v359_v37 = vsel %vm356_vm15, %v353_v43, %v349_v46  ;;  %v376_v43 = vsel %vm375_vm2, %v2780_v39, %v2784_v47  ;;  %v378_v3 = vsel %vm375_vm2, %v2784_v47, %v2780_v39 }
 0x242   :  { %v363_v46 = vmul.f32 %v2830_v5, %v357_v36  ;;  %v382_v47 = vmul.f32 %v2856_v27, %v376_v43 }
 0x248   :  { %v2786_v49 = vpop.permute.xlu0 %329  ;;  %v2788_v50 = vpop.permute.xlu1 %333 }
 0x249   :  { %v2851_v25 = vpop.permute.xlu2 %331 }
 0x250   :  { %v2790_v52 = vpop.permute.xlu0 %291  ;;  %v2792_v53 = vpop.permute.xlu1 %295 }
 0x258   :  { %v408_v57 = vpop.permute.xlu0 %407  ;;  %v389_v58 = vpop.permute.xlu1 %388 }
 0x259   :  { %v396_v63 = vsel %vm394_vm13, %v389_v58, %v393_v48  ;;  %v398_v0 = vsel %vm394_vm13, %v393_v48, %v389_v58  ;;  %v471_v48 = vrot.slane %v402_v16, 4  ;;  %v2903_v16 = vperm.slane %v2808_v60, 3 }
 0x25a   :  { %v403_v6 = vmul.f32 %v2811_v62, %v396_v63  ;;  %v404_v8 = vmul.f32 %v2820_v2, %v398_v0 }
 0x25c   :  { %v472_v33 = vrot.slane %v403_v6, 4  ;;  %v474_v35 = vrot.slane %v404_v8, 4  ;;  %v2889_v6 = vperm.slane %v2802_v59, 3 }
 0x25e   :  { %v473_v58 = vsel %vm118_vm0, %v470_v42, %v472_v33  ;;  %v475_v63 = vsel %vm118_vm0, %v471_v48, %v474_v35 }
 0x260   :  { %v412_v12 = vpop.permute.xlu0 %411  ;;  %v374_v13 = vpop.permute.xlu1 %373 }
 0x261   :  { %v415_v18 = vsel %vm413_vm14, %v408_v57, %v412_v12  ;;  %v417_v19 = vsel %vm413_vm14, %v412_v12, %v408_v57  ;;  %v377_v26 = vsel %vm375_vm2, %v370_v51, %v374_v13  ;;  %v379_v30 = vsel %vm375_vm2, %v374_v13, %v370_v51 }
 0x262   :  { %v422_v28 = vmul.f32 %v2827_v4, %v415_v18  ;;  %v423_v29 = vmul.f32 %v2835_v9, %v417_v19  ;;  %v384_v41 = vmul.f32 %v2856_v27, %v377_v26  ;;  %v385_v51 = vmul.f32 %v2868_v38, %v379_v30 }
 0x263   :  { %v364_v57 = vmul.f32 %v2839_v11, %v359_v37  ;;  %v383_v18 = vmul.f32 %v2868_v38, %v378_v3  ;;  %v456_v19 = vrot.slane %v363_v46, 4  ;;  %v340_v26 = vsel %vm337_vm3, %v2788_v50, %v2786_v49 }
 0x264   :  { %2394 = vmatpush.msk.msrb.mxu2 %vm118_vm0, %v422_v28  ;;  %2397 = vmatpush.msk.msrb.mxu3 %vm118_vm0, %v423_v29  ;;  %v486_v12 = vsel %vm118_vm0, %v384_v41, %v470_v42  ;;  %v487_v39 = vsel %vm118_vm0, %v385_v51, %v471_v48  ;;  %v313_v28 = vpop.permute.xlu2 %312  ;;  %v344_v35 = vmul.f32 %v2889_v6, %v340_v26  ;;  %v2925_v37 = vperm.slane %v2802_v59, 2 }
 0x265   :  { %v457_v20 = vrot.slane %v364_v57, 4  ;;  %v2941_v46 = vperm.slane %v2802_v59, 1 }
 0x266   :  { %514 = vmatpush.msrb.mxu2 %v420_v31  ;;  %537 = vmatpush.msrb.mxu3 %v421_v40  ;;  %v2928_v40 = vperm.slane %v2808_v60, 2 }
 0x267   :  { %v485_v42 = vsel %vm118_vm0, %v2719_v32, %v457_v20 }
 0x268   :  { %v355_v0 = vpop.permute.xlu0 %354  ;;  %v317_v1 = vpop.permute.xlu1 %316  ;;  %515 = vmatpush.msrb.mxu2 %v473_v58  ;;  %538 = vmatpush.msrb.mxu3 %v475_v63 }
 0x269   :  { %v358_v8 = vsel %vm356_vm15, %v2797_v56, %v355_v0  ;;  %v360_v10 = vsel %vm356_vm15, %v355_v0, %v2797_v56  ;;  %v338_v56 = vsel %vm337_vm3, %v2786_v49, %v2788_v50  ;;  %v484_v49 = vsel %vm118_vm0, %v2729_v34, %v456_v19 }
 0x26a   :  { %v365_v13 = vmul.f32 %v2830_v5, %v358_v8  ;;  %v366_v15 = vmul.f32 %v2839_v11, %v360_v10  ;;  %516 = vmatpush.msrb.mxu2 %v486_v12  ;;  %539 = vmatpush.msrb.mxu3 %v487_v39  ;;  %v345_v36 = vmul.f32 %v2903_v16, %v338_v56 }
 0x26b   :  { %v320_v50 = vsel %vm318_vm4, %v313_v28, %v317_v1  ;;  %v322_v48 = vsel %vm318_vm4, %v317_v1, %v313_v28  ;;  %v302_v0 = vsel %vm299_vm5, %v2792_v53, %v2790_v52  ;;  %v2950_v1 = vperm.slane %v2808_v60, 1 }
 0x26c   :  { %517 = vmatpush.msrb.mxu2 %v382_v47  ;;  %v458_v29 = vrot.slane %v365_v13, 4  ;;  %v460_v30 = vrot.slane %v366_v15, 4  ;;  %540 = vmatpush.msrb.mxu3 %v383_v18  ;;  %v443_v3 = vrot.slane %v345_v36, 4  ;;  %v327_v8 = vmul.f32 %v2925_v37, %v322_v48  ;;  %v294_v47 = vpop.permute.xlu2 %293 }
 0x26d   :  { %v328_v10 = vmul.f32 %v2928_v40, %v320_v50  ;;  %v300_v15 = vsel %vm299_vm5, %v2790_v52, %v2792_v53  ;;  %v306_v56 = vmul.f32 %v2941_v46, %v302_v0 }
 0x26e   :  { %v459_v31 = vsel %vm118_vm0, %v456_v19, %v458_v29  ;;  %v461_v33 = vsel %vm118_vm0, %v457_v20, %v460_v30  ;;  %v307_v26 = vmul.f32 %v2950_v1, %v300_v15 }
 0x26f   :  { %518 = vmatpush.msrb.mxu2 %v459_v31  ;;  %541 = vmatpush.msrb.mxu3 %v461_v33  ;;  %v483_v28 = vsel %vm118_vm0, %v328_v10, %v443_v3  ;;  %v428_v36 = vrot.slane %v306_v56, 4 }
 0x270   :  { %v336_v41 = vpop.permute.xlu0 %335  ;;  %v315_v63 = vpop.permute.xlu1 %314  ;;  %v429_v50 = vrot.slane %v307_v26, 4 }
 0x271   :  { %v339_v51 = vsel %vm337_vm3, %v2851_v25, %v336_v41  ;;  %v341_v43 = vsel %vm337_vm3, %v336_v41, %v2851_v25  ;;  %519 = vmatpush.msrb.mxu2 %v484_v49  ;;  %542 = vmatpush.msrb.mxu3 %v485_v42  ;;  %v442_v25 = vrot.slane %v344_v35, 4  ;;  %v321_v39 = vsel %vm318_vm4, %v315_v63, %v2782_v44 }
 0x272   :  { %v346_v57 = vmul.f32 %v2889_v6, %v341_v43  ;;  %v347_v58 = vmul.f32 %v2903_v16, %v339_v51  ;;  %v319_v20 = vsel %vm318_vm4, %v2782_v44, %v315_v63  ;;  %v325_v29 = vmul.f32 %v2925_v37, %v321_v39 }
 0x273   :  { %520 = vmatpush.msrb.mxu2 %v2693_v23  ;;  %543 = vmatpush.msrb.mxu3 %v2696_v24  ;;  %v482_v53 = vsel %vm118_vm0, %v327_v8, %v442_v25  ;;  %v326_v44 = vmul.f32 %v2928_v40, %v319_v20  ;;  %v2984_v51 = vperm.slane %v2802_v59, 0  ;;  %v2987_v43 = vperm.slane %v2808_v60, 0 }
 0x274   :  { %v444_v12 = vrot.slane %v346_v57, 4  ;;  %v446_v13 = vrot.slane %v347_v58, 4  ;;  %v277_v57 = vpop.permute.xlu2 %276 }
 0x276   :  { %v445_v18 = vsel %vm118_vm0, %v442_v25, %v444_v12  ;;  %v447_v19 = vsel %vm118_vm0, %v443_v3, %v446_v13 }
 0x277   :  { %521 = vmatpush.msrb.mxu2 %v445_v18  ;;  %544 = vmatpush.msrb.mxu3 %v447_v19  ;;  %v73_v18 = vld [vmem:[%s4386_s4 + $0x8] sm:$0xf] }
 0x278   :  { %v298_v52 = vpop.permute.xlu0 %297  ;;  %v271_v60 = vpop.permute.xlu1 %270 }
 0x279   :  { %v301_v30 = vsel %vm299_vm5, %v294_v47, %v298_v52  ;;  %v303_v31 = vsel %vm299_vm5, %v298_v52, %v294_v47  ;;  %522 = vmatpush.msrb.mxu2 %v482_v53  ;;  %545 = vmatpush.msrb.mxu3 %v483_v28  ;;  %v72_v47 = vld [vmem:[%s4386_s4] sm:$0xff] }
 0x27a   :  { %v308_v33 = vmul.f32 %v2941_v46, %v303_v31  ;;  %v309_v35 = vmul.f32 %v2950_v1, %v301_v30 }
 0x27b   :  { %523 = vmatpush.msrb.mxu2 %v325_v29  ;;  %546 = vmatpush.msrb.mxu3 %v326_v44 }
 0x27c   :  { %v430_v49 = vrot.slane %v308_v33, 4  ;;  %v432_v41 = vrot.slane %v309_v35, 4  ;;  %v3019_v31 = vpop.permute.xlu2 %495 }
 0x27e   :  { %v431_v42 = vsel %vm118_vm0, %v428_v36, %v430_v49  ;;  %v433_v48 = vsel %vm118_vm0, %v429_v50, %v432_v41 }
 0x27f   :  { %524 = vmatpush.msrb.mxu2 %v431_v42  ;;  %547 = vmatpush.msrb.mxu3 %v433_v48 }
 0x280   :  { %v273_v58 = vpop.permute.xlu0 %272  ;;  %v3013_v19 = vpop.permute.xlu1 %490 }
 0x281   :  { %v282_v63 = vsel %vm280_vm6, %v273_v58, %v277_v57  ;;  %v284_v0 = vsel %vm280_vm6, %v277_v57, %v273_v58 }
 0x282   :  { %v289_v25 = vmul.f32 %v2984_v51, %v284_v0  ;;  %v290_v3 = vmul.f32 %v2987_v43, %v282_v63 }
 0x284   :  { %v480_v59 = vsel %vm118_vm0, %v289_v25, %v428_v36  ;;  %v481_v8 = vsel %vm118_vm0, %v290_v3, %v429_v50  ;;  %v89_v3 = vld [vmem:[%s4395_s13 + $0x8] sm:$0xf] }
 0x285   :  { %525 = vmatpush.msrb.mxu2 %v480_v59  ;;  %548 = vmatpush.msrb.mxu3 %v481_v8 }
 0x288   :  { %v275_v10 = vpop.permute.xlu0 %274 }
 0x289   :  { %v283_v12 = vsel %vm280_vm6, %v275_v10, %v271_v60  ;;  %v281_v13 = vsel %vm280_vm6, %v271_v60, %v275_v10 }
 0x28a   :  { %v287_v15 = vmul.f32 %v2984_v51, %v283_v12  ;;  %v288_v39 = vmul.f32 %v2987_v43, %v281_v13 }
 0x28c   :  { %526 = vmatpush.msrb.mxu2 %v287_v15  ;;  %549 = vmatpush.msrb.mxu3 %v288_v39 }
 0x28d   :  { %2395 = vmatmul.msk.f32.vlgmr.msrb.gmra.mxu2 %vm498_vm7, %v72_v47  ;;  %2398 = vmatmul.msk.f32.vlgmr.msrb.gmra.mxu3 %vm498_vm7, %v72_v47 }
 0x295   :  { %2396 = vmatmul.msk.f32.gmra.mxu2 %vm498_vm7, %v73_v18  ;;  %2399 = vmatmul.msk.f32.gmra.mxu3 %vm498_vm7, %v73_v18 }
 0x310   :  { %v528_v20 = vpop.f32.mrf.mxu2  ;;  %v551_v56 = vpop.f32.mrf.mxu3 }
 0x311   :  { %v529_v26 = vadd.f32 %v528_v20, %v3013_v19  ;;  %v552_v52 = vadd.f32 %v551_v56, %v3013_v19 }
 0x313   :  { %v557_v53 = vadd.f32 %v529_v26, %v2693_v23  ;;  %v558_v28 = vadd.f32 %v552_v52, %v2696_v24 }
 0x315   :  { %vm561_vm8 = vcmp.ge.f32.partialorder %v557_v53, 0.0  ;;  %vm562_vm9 = vcmp.ge.f32.partialorder %v558_v28, 0.0  ;;  %v565_v29 = vmul.f32 0.01, %v557_v53  ;;  %v566_v30 = vmul.f32 0.01, %v558_v28 }
 0x317   :  { %v569_v44 = vsel %vm561_vm8, %v557_v53, %v565_v29  ;;  %v570_v33 = vsel %vm562_vm9, %v558_v28, %v566_v30 }
 0x318   :  { %v531_v35 = vpop.f32.mrf.mxu2  ;;  %v554_v36 = vpop.f32.mrf.mxu3  ;;  %v573_v49 = vadd.f32 %v570_v33, %v569_v44 }
 0x319   :  { %v532_v50 = vadd.f32 %v531_v35, %v3019_v31  ;;  %v555_v41 = vadd.f32 %v554_v36, %v3019_v31 }
 0x31a   :  { %574 = vadd.xlane.f32.xlu2 %v573_v49 }
 0x31b   :  { %v559_v23 = vadd.f32 %v532_v50, %v2729_v34  ;;  %v560_v24 = vadd.f32 %v555_v41, %v2719_v32  ;;  %v87_v32 = vld [vmem:[%s4394_s12 + $0x8] sm:$0xf]  ;;  %v88_v34 = vld [vmem:[%s4395_s13] sm:$0xff] }
 0x31d   :  { %v567_v42 = vmul.f32 0.01, %v559_v23  ;;  %v568_v48 = vmul.f32 0.01, %v560_v24  ;;  %vm563_vm10 = vcmp.ge.f32.partialorder %v559_v23, 0.0  ;;  %vm564_vm11 = vcmp.ge.f32.partialorder %v560_v24, 0.0 }
 0x31f   :  { %v571_v57 = vsel %vm563_vm10, %v559_v23, %v567_v42  ;;  %v572_v58 = vsel %vm564_vm11, %v560_v24, %v568_v48 }
 0x320   :  { %v576_v63 = vsel %vm118_vm0, %v571_v57, 0.0  ;;  %v577_v0 = vsel %vm118_vm0, %v572_v58, 0.0 }
 0x321   :  { %v578_v25 = vadd.f32 %v577_v0, %v576_v63 }
 0x323   :  { %579 = vadd.xlane.f32.xlu0 %v578_v25 }
 0x332   :  { %648 = vperm.xlu2 %2446, %v89_v3  }
 0x337   :  { %634 = vperm.xlu0 %2444, %v87_v32  }
 0x33f   :  { %643 = vperm.xlu0 %2444, %v88_v34  }
 0x38d   :  { %v575_v59 = vpop.xlane.xlu2 %574 }
 0x38e   :  { %v581_v8 = vmul.f32 %v575_v59, %v2670_v45 }
 0x390   :  { %v583_v60 = vsub.f32 %v569_v44, %v581_v8  ;;  %v584_v10 = vsub.f32 %v570_v33, %v581_v8  ;;  %v3043_v33 = vpop.permute.xlu1 %629 }
 0x391   :  { %4420 = vst [vmem:[#allocation9_spill] sm:$0xff] %v3043_v33 }
 0x392   :  { %v587_v12 = vmul.f32 %v583_v60, %v583_v60  ;;  %v588_v13 = vmul.f32 %v584_v10, %v584_v10 }
 0x394   :  { %v591_v15 = vadd.f32 %v588_v13, %v587_v12 }
 0x395   :  { %v3040_v29 = vpop.permute.xlu2 %648 }
 0x396   :  { %v580_v39 = vpop.xlane.xlu0 %579  ;;  %592 = vadd.xlane.f32.xlu2 %v591_v15  ;;  %4419 = vst [vmem:[#allocation8_spill] sm:$0xff] %v3040_v29 }
 0x397   :  { %v582_v47 = vmul.f32 %v580_v39, %v2670_v45 }
 0x399   :  { %v585_v18 = vsub.f32 %v571_v57, %v582_v47  ;;  %v586_v20 = vsub.f32 %v572_v58, %v582_v47 }
 0x39b   :  { %v589_v56 = vmul.f32 %v585_v18, %v585_v18  ;;  %v590_v26 = vmul.f32 %v586_v20, %v586_v20 }
 0x39d   :  { %v594_v52 = vsel %vm118_vm0, %v589_v56, 0.0  ;;  %v595_v53 = vsel %vm118_vm0, %v590_v26, 0.0 }
 0x39e   :  { %v596_v28 = vadd.f32 %v595_v53, %v594_v52 }
 0x3a0   :  { %597 = vadd.xlane.f32.xlu1 %v596_v28 }
 0x3a9   :  { %v3046_v42 = vpop.permute.xlu0 %634 }
 0x3aa   :  { %4421 = vst [vmem:[#allocation10_spill] sm:$0xff] %v3046_v42 }
 0x3b1   :  { %v3050_v12 = vpop.permute.xlu0 %643 }
 0x3b2   :  { %4422 = vst [vmem:[#allocation11_spill] sm:$0xff] %v3050_v12 }
 0x409   :  { %v593_v30 = vpop.xlane.xlu2 %592 }
 0x40a   :  { %v599_v44 = vmul.f32 %v593_v30, %v2670_v45 }
 0x40c   :  { %v601_v35 = vadd.f32 1e-05, %v599_v44 }
 0x40e   :  { %2453 = vrsqrt.f32 %v601_v35  ;;  %vm609_vm8 = vweird.f32 %v601_v35 }
 0x413   :  { %v598_v36 = vpop.xlane.xlu1 %597 }
 0x414   :  { %v2454_v49 = vpop.eup %2453  ;;  %v600_v50 = vmul.f32 %v598_v36, %v2670_v45 }
 0x415   :  { %v604_v41 = vmul.f32 %v2454_v49, %v601_v35  ;;  %vm610_vm12 = vweird.f32 %v2454_v49 }
 0x416   :  { %v602_v23 = vadd.f32 1e-05, %v600_v50  ;;  %vm611_vm9 = vmor %vm609_vm8, %vm610_vm12 }
 0x417   :  { %v605_v24 = vmul.f32 %v2454_v49, %v604_v41 }
 0x418   :  { %2455 = vrsqrt.f32 %v602_v23  ;;  %vm619_vm11 = vweird.f32 %v602_v23 }
 0x419   :  { %v606_v48 = vmul.f32 0.5, %v605_v24 }
 0x41b   :  { %v607_v57 = vsub.f32 1.5, %v606_v48 }
 0x41d   :  { %v608_v58 = vmul.f32 %v2454_v49, %v607_v57 }
 0x41e   :  { %v2456_v63 = vpop.eup %2455 }
 0x41f   :  { %v612_v0 = vsel %vm611_vm9, %v2454_v49, %v608_v58  ;;  %v614_v25 = vmul.f32 %v2456_v63, %v602_v23  ;;  %vm620_vm10 = vweird.f32 %v2456_v63 }
 0x420   :  { %v623_v3 = vmul.f32 %v612_v0, %v583_v60  ;;  %v624_v32 = vmul.f32 %v612_v0, %v584_v10  ;;  %vm621_vm12 = vmor %vm619_vm11, %vm620_vm10 }
 0x421   :  { %v615_v8 = vmul.f32 %v2456_v63, %v614_v25 }
 0x422   :  { %v637_v34 = vmul.f32 %v3043_v33, %v623_v3  ;;  %v638_v59 = vmul.f32 %v3043_v33, %v624_v32 }
 0x423   :  { %v616_v39 = vmul.f32 0.5, %v615_v8 }
 0x424   :  { %v3053_v13 = vadd.f32 %v3050_v12, %v637_v34  ;;  %v3056_v15 = vadd.f32 %v3050_v12, %v638_v59 }
 0x425   :  { %v617_v60 = vsub.f32 1.5, %v616_v39 }
 0x426   :  { %755 = vrot.lane.b32.xlu0 %v3056_v15, %s2511_s10  ;;  %767 = vrot.lane.b32.xlu1 %v3053_v13, %s2512_s21 }
 0x427   :  { %751 = vrot.lane.b32.xlu2 %v3053_v13, %s2511_s10  ;;  %v618_v10 = vmul.f32 %v2456_v63, %v617_v60 }
 0x429   :  { %v622_v47 = vsel %vm621_vm12, %v2456_v63, %v618_v10 }
 0x42a   :  { %v626_v56 = vmul.f32 %v622_v47, %v586_v20  ;;  %v625_v52 = vmul.f32 %v622_v47, %v585_v18 }
 0x42c   :  { %v640_v26 = vmul.f32 %v3046_v42, %v626_v56  ;;  %v639_v20 = vmul.f32 %v3046_v42, %v625_v52 }
 0x42e   :  { %771 = vrot.lane.b32.xlu0 %v3056_v15, %s2512_s21  ;;  %723 = vrot.lane.b32.xlu1 %v3056_v15, %s2513_s22  ;;  %v3078_v53 = vadd.f32 %v3040_v29, %v640_v26  ;;  %v3088_v28 = vadd.f32 %v3040_v29, %v639_v20 }
 0x42f   :  { %735 = vrot.lane.b32.xlu2 %v3053_v13, %s2514_s9 }
 0x436   :  { %719 = vrot.lane.b32.xlu0 %v3053_v13, %s2513_s22  ;;  %739 = vrot.lane.b32.xlu1 %v3056_v15, %s2514_s9 }
 0x437   :  { %687 = vrot.lane.b32.xlu2 %v3053_v13, %s2515_s16 }
 0x43e   :  { %703 = vrot.lane.b32.xlu0 %v3053_v13, %s2516_s17  ;;  %707 = vrot.lane.b32.xlu1 %v3056_v15, %s2516_s17 }
 0x43f   :  { %757 = vrot.lane.b32.xlu2 %v3078_v53, %s2511_s10 }
 0x446   :  { %671 = vrot.lane.b32.xlu0 %v3053_v13, %s2517_s2  ;;  %675 = vrot.lane.b32.xlu1 %v3056_v15, %s2517_s2 }
 0x447   :  { %737 = vrot.lane.b32.xlu2 %v3088_v28, %s2514_s9 }
 0x44e   :  { %773 = vrot.lane.b32.xlu0 %v3078_v53, %s2512_s21  ;;  %769 = vrot.lane.b32.xlu1 %v3088_v28, %s2512_s21 }
 0x44f   :  { %721 = vrot.lane.b32.xlu2 %v3088_v28, %s2513_s22 }
 0x456   :  { %725 = vrot.lane.b32.xlu0 %v3078_v53, %s2513_s22  ;;  %753 = vrot.lane.b32.xlu1 %v3088_v28, %s2511_s10 }
 0x457   :  { %705 = vrot.lane.b32.xlu2 %v3088_v28, %s2516_s17 }
 0x45e   :  { %709 = vrot.lane.b32.xlu0 %v3078_v53, %s2516_s17  ;;  %741 = vrot.lane.b32.xlu1 %v3078_v53, %s2514_s9 }
 0x45f   :  { %689 = vrot.lane.b32.xlu2 %v3088_v28, %s2515_s16 }
 0x466   :  { %677 = vrot.lane.b32.xlu0 %v3078_v53, %s2517_s2  ;;  %693 = vrot.lane.b32.xlu1 %v3078_v53, %s2515_s16 }
 0x467   :  { %673 = vrot.lane.b32.xlu2 %v3088_v28, %s2517_s2 }
 0x46e   :  { %657 = vrot.lane.b32.xlu0 %v3088_v28, %s2518_s23  ;;  %691 = vrot.lane.b32.xlu1 %v3056_v15, %s2515_s16 }
 0x46f   :  { %661 = vrot.lane.b32.xlu2 %v3078_v53, %s2518_s23 }
 0x476   :  { %659 = vrot.lane.b32.xlu0 %v3056_v15, %s2518_s23  ;;  %655 = vrot.lane.b32.xlu1 %v3053_v13, %s2518_s23 }
 0x481   :  { %v752_v18 = vpop.permute.xlu2 %751 }
 0x489   :  { %v736_v30 = vpop.permute.xlu2 %735 }
 0x491   :  { %v3130_v36 = vpop.permute.xlu2 %687 }
 0x498   :  { %v756_v44 = vpop.permute.xlu0 %755  ;;  %v768_v35 = vpop.permute.xlu1 %767 }
 0x499   :  { %v758_v41 = vpop.permute.xlu2 %757  ;;  %v759_v56 = vsel %vm394_vm13, %v752_v18, %v756_v44  ;;  %v761_v20 = vsel %vm394_vm13, %v756_v44, %v752_v18 }
 0x4a0   :  { %v772_v49 = vpop.permute.xlu0 %771  ;;  %v724_v50 = vpop.permute.xlu1 %723 }
 0x4a1   :  { %v738_v48 = vpop.permute.xlu2 %737  ;;  %v775_v39 = vsel %vm413_vm14, %v768_v35, %v772_v49  ;;  %v777_v60 = vsel %vm413_vm14, %v772_v49, %v768_v35  ;;  %v763_v35 = vmul.f32 %v759_v56, %v2811_v62  ;;  %v764_v49 = vmul.f32 %v761_v20, %v2820_v2 }
 0x4a2   :  { %v779_v26 = vmul.f32 %v775_v39, %v2827_v4  ;;  %v780_v52 = vmul.f32 %v777_v60, %v2835_v9 }
 0x4a3   :  { %v829_v18 = vrot.slane %v763_v35, 4  ;;  %v830_v56 = vrot.slane %v764_v49, 4 }
 0x4a8   :  { %v720_v23 = vpop.permute.xlu0 %719  ;;  %v740_v24 = vpop.permute.xlu1 %739 }
 0x4a9   :  { %v722_v63 = vpop.permute.xlu2 %721 }
 0x4b0   :  { %v3132_v57 = vpop.permute.xlu0 %703  ;;  %v708_v58 = vpop.permute.xlu1 %707 }
 0x4b1   :  { %v706_v34 = vpop.permute.xlu2 %705 }
 0x4b8   :  { %v3134_v0 = vpop.permute.xlu0 %671  ;;  %v3136_v25 = vpop.permute.xlu1 %675 }
 0x4c0   :  { %v774_v3 = vpop.permute.xlu0 %773  ;;  %v770_v32 = vpop.permute.xlu1 %769 }
 0x4c1   :  { %v776_v59 = vsel %vm413_vm14, %v770_v32, %v774_v3  ;;  %v778_v8 = vsel %vm413_vm14, %v774_v3, %v770_v32 }
 0x4c2   :  { %v781_v10 = vmul.f32 %v776_v59, %v2827_v4  ;;  %v782_v47 = vmul.f32 %v778_v8, %v2835_v9 }
 0x4c4   :  { %2400 = vmatpush.msk.msra.mxu0 %vm118_vm0, %v781_v10  ;;  %2403 = vmatpush.msk.msra.mxu1 %vm118_vm0, %v782_v47  ;;  %v690_v10 = vpop.permute.xlu2 %689 }
 0x4c6   :  { %872 = vmatpush.msra.mxu0 %v779_v26  ;;  %895 = vmatpush.msra.mxu1 %v780_v52 }
 0x4c8   :  { %v726_v3 = vpop.permute.xlu0 %725  ;;  %v754_v32 = vpop.permute.xlu1 %753 }
 0x4c9   :  { %v760_v59 = vsel %vm394_vm13, %v754_v32, %v758_v41  ;;  %v762_v8 = vsel %vm394_vm13, %v758_v41, %v754_v32  ;;  %v728_v44 = vsel %vm356_vm15, %v722_v63, %v726_v3  ;;  %v730_v52 = vsel %vm356_vm15, %v726_v3, %v722_v63 }
 0x4ca   :  { %v765_v39 = vmul.f32 %v760_v59, %v2811_v62  ;;  %v766_v60 = vmul.f32 %v762_v8, %v2820_v2  ;;  %v727_v41 = vsel %vm356_vm15, %v720_v23, %v724_v50  ;;  %v729_v32 = vsel %vm356_vm15, %v724_v50, %v720_v23 }
 0x4cb   :  { %v733_v35 = vmul.f32 %v728_v44, %v2830_v5  ;;  %v734_v49 = vmul.f32 %v730_v52, %v2839_v11  ;;  %v745_v50 = vsel %vm375_vm2, %v740_v24, %v736_v30  ;;  %v731_v23 = vmul.f32 %v727_v41, %v2830_v5 }
 0x4cc   :  { %v831_v47 = vrot.slane %v765_v39, 4  ;;  %v833_v26 = vrot.slane %v766_v60, 4  ;;  %v743_v39 = vsel %vm375_vm2, %v736_v30, %v740_v24  ;;  %v711_v41 = vsel %vm337_vm3, %v3132_v57, %v708_v58 }
 0x4ce   :  { %v832_v20 = vsel %vm118_vm0, %v829_v18, %v831_v47  ;;  %v834_v54 = vsel %vm118_vm0, %v830_v56, %v833_v26  ;;  %v713_v47 = vsel %vm337_vm3, %v708_v58, %v3132_v57  ;;  %v817_v26 = vrot.slane %v733_v35, 4 }
 0x4cf   :  { %873 = vmatpush.msra.mxu0 %v832_v20  ;;  %896 = vmatpush.msra.mxu1 %v834_v54  ;;  %v732_v54 = vmul.f32 %v729_v32, %v2839_v11  ;;  %v819_v20 = vrot.slane %v734_v49, 4  ;;  %v674_v32 = vpop.permute.xlu2 %673  ;;  %v716_v49 = vmul.f32 %v711_v41, %v2903_v16 }
 0x4d0   :  { %v710_v59 = vpop.permute.xlu0 %709  ;;  %v742_v8 = vpop.permute.xlu1 %741 }
 0x4d1   :  { %v744_v63 = vsel %vm375_vm2, %v738_v48, %v742_v8  ;;  %v746_v3 = vsel %vm375_vm2, %v742_v8, %v738_v48  ;;  %v714_v48 = vsel %vm337_vm3, %v710_v59, %v706_v34  ;;  %v712_v52 = vsel %vm337_vm3, %v706_v34, %v710_v59 }
 0x4d2   :  { %v749_v60 = vmul.f32 %v744_v63, %v2856_v27  ;;  %v750_v44 = vmul.f32 %v746_v3, %v2868_v38  ;;  %v747_v8 = vmul.f32 %v743_v39, %v2856_v27  ;;  %v748_v63 = vmul.f32 %v745_v50, %v2868_v38 }
 0x4d3   :  { %v717_v35 = vmul.f32 %v714_v48, %v2889_v6  ;;  %v815_v3 = vrot.slane %v731_v23, 4  ;;  %v816_v34 = vrot.slane %v732_v54, 4 }
 0x4d4   :  { %v845_v30 = vsel %vm118_vm0, %v749_v60, %v829_v18  ;;  %v846_v24 = vsel %vm118_vm0, %v750_v44, %v830_v56  ;;  %v715_v18 = vmul.f32 %v713_v47, %v2889_v6  ;;  %v718_v56 = vmul.f32 %v712_v52, %v2903_v16 }
 0x4d5   :  { %874 = vmatpush.msra.mxu0 %v845_v30  ;;  %897 = vmatpush.msra.mxu1 %v846_v24  ;;  %v818_v59 = vsel %vm118_vm0, %v815_v3, %v817_v26  ;;  %v820_v39 = vsel %vm118_vm0, %v816_v34, %v819_v20  ;;  %v843_v44 = vsel %vm118_vm0, %v3088_v28, %v815_v3  ;;  %v803_v48 = vrot.slane %v717_v35, 4 }
 0x4d6   :  { %v844_v47 = vsel %vm118_vm0, %v3078_v53, %v816_v34  ;;  %v679_v26 = vsel %vm299_vm5, %v3134_v0, %v3136_v25  ;;  %v681_v52 = vsel %vm299_vm5, %v3136_v25, %v3134_v0  ;;  %v805_v30 = vrot.slane %v718_v56, 4 }
 0x4d7   :  { %875 = vmatpush.msra.mxu0 %v747_v8  ;;  %898 = vmatpush.msra.mxu1 %v748_v63  ;;  %v802_v8 = vrot.slane %v716_v49, 4  ;;  %v683_v0 = vmul.f32 %v681_v52, %v2941_v46  ;;  %v684_v25 = vmul.f32 %v679_v26, %v2950_v1  ;;  %v662_v35 = vpop.permute.xlu2 %661 }
 0x4d8   :  { %v678_v57 = vpop.permute.xlu0 %677  ;;  %v694_v58 = vpop.permute.xlu1 %693 }
 0x4d9   :  { %v680_v50 = vsel %vm299_vm5, %v674_v32, %v678_v57  ;;  %v682_v23 = vsel %vm299_vm5, %v678_v57, %v674_v32  ;;  %v696_v54 = vsel %vm318_vm4, %v690_v10, %v694_v58  ;;  %v698_v60 = vsel %vm318_vm4, %v694_v58, %v690_v10  ;;  %876 = vmatpush.msra.mxu0 %v818_v59 }
 0x4da   :  { %899 = vmatpush.msra.mxu1 %v820_v39  ;;  %v801_v10 = vrot.slane %v715_v18, 4  ;;  %v685_v24 = vmul.f32 %v682_v23, %v2941_v46  ;;  %v686_v20 = vmul.f32 %v680_v50, %v2950_v1  ;;  %v701_v41 = vmul.f32 %v698_v60, %v2925_v37 }
 0x4db   :  { %877 = vmatpush.msra.mxu0 %v843_v44  ;;  %v702_v32 = vmul.f32 %v696_v54, %v2928_v40  ;;  %v806_v3 = vsel %vm118_vm0, %v802_v8, %v805_v30  ;;  %v788_v26 = vrot.slane %v684_v25, 4  ;;  %v1322_v25 = vld.sshfl [vmem:[#allocation1] sm:$0xff pattern:$0x75316420] }
 0x4dc   :  { %900 = vmatpush.msra.mxu1 %v844_v47  ;;  %v804_v63 = vsel %vm118_vm0, %v801_v10, %v803_v48  ;;  %v841_v56 = vsel %vm118_vm0, %v701_v41, %v801_v10  ;;  %v789_v49 = vrot.slane %v685_v24, 4  ;;  %v791_v58 = vrot.slane %v686_v20, 4 }
 0x4dd   :  { %878 = vmatpush.msra.mxu0 %v3053_v13  ;;  %v842_v57 = vsel %vm118_vm0, %v702_v32, %v802_v8  ;;  %v787_v48 = vrot.slane %v683_v0, 4  ;;  %v76_v0 = vld [vmem:[%s4388_s6] sm:$0xff] }
 0x4de   :  { %901 = vmatpush.msra.mxu1 %v3056_v15  ;;  %v792_v10 = vsel %vm118_vm0, %v788_v26, %v791_v58 }
 0x4df   :  { %879 = vmatpush.msra.mxu0 %v804_v63  ;;  %v790_v52 = vsel %vm118_vm0, %v787_v48, %v789_v49 }
 0x4e0   :  { %902 = vmatpush.msra.mxu1 %v806_v3  ;;  %v658_v34 = vpop.permute.xlu0 %657  ;;  %v692_v18 = vpop.permute.xlu1 %691  ;;  %v77_v3 = vld [vmem:[%s4388_s6 + $0x8] sm:$0xf] }
 0x4e1   :  { %v664_v59 = vsel %vm280_vm6, %v658_v34, %v662_v35  ;;  %v666_v39 = vsel %vm280_vm6, %v662_v35, %v658_v34  ;;  %880 = vmatpush.msra.mxu0 %v841_v56  ;;  %v697_v50 = vsel %vm318_vm4, %v692_v18, %v3130_v36  ;;  %v695_v23 = vsel %vm318_vm4, %v3130_v36, %v692_v18  ;;  %v1323_v35 = vld.sshfl [vmem:[#allocation1 + $0x8] sm:$0xff pattern:$0x75316420]  ;;  %v2477_v34 = vld [vmem:[%s4417_s24] sm:$0xff] }
 0x4e2   :  { %903 = vmatpush.msra.mxu1 %v842_v57  ;;  %v699_v54 = vmul.f32 %v697_v50, %v2925_v37  ;;  %v700_v60 = vmul.f32 %v695_v23, %v2928_v40  ;;  %v669_v44 = vmul.f32 %v666_v39, %v2984_v51  ;;  %v670_v47 = vmul.f32 %v664_v59, %v2987_v43  ;;  %v2478_v18 = vld [vmem:[%s4417_s24 + $0x8] sm:$0xf] }
 0x4e4   :  { %881 = vmatpush.msra.mxu0 %v699_v54  ;;  %904 = vmatpush.msra.mxu1 %v700_v60  ;;  %v839_v36 = vsel %vm118_vm0, %v669_v44, %v787_v48  ;;  %v840_v30 = vsel %vm118_vm0, %v670_v47, %v788_v26 }
 0x4e6   :  { %882 = vmatpush.msra.mxu0 %v790_v52  ;;  %905 = vmatpush.msra.mxu1 %v792_v10 }
 0x4e8   :  { %v660_v24 = vpop.permute.xlu0 %659  ;;  %v656_v20 = vpop.permute.xlu1 %655  ;;  %883 = vmatpush.msra.mxu0 %v839_v36  ;;  %906 = vmatpush.msra.mxu1 %v840_v30 }
 0x4e9   :  { %v665_v41 = vsel %vm280_vm6, %v660_v24, %v656_v20  ;;  %v663_v32 = vsel %vm280_vm6, %v656_v20, %v660_v24 }
 0x4ea   :  { %v667_v8 = vmul.f32 %v665_v41, %v2984_v51  ;;  %v668_v63 = vmul.f32 %v663_v32, %v2987_v43 }
 0x4ec   :  { %884 = vmatpush.msra.mxu0 %v667_v8  ;;  %907 = vmatpush.msra.mxu1 %v668_v63 }
 0x4ed   :  { %2401 = vmatmul.msk.f32.vlgmr.msra.gmra.mxu0 %vm498_vm7, %v76_v0  ;;  %2404 = vmatmul.msk.f32.vlgmr.msra.gmra.mxu1 %vm498_vm7, %v76_v0 }
 0x4ee   :  { %2411 = vmatpush.msk.msrb.mxu0 %vm118_vm0, %v1322_v25  ;;  %2414 = vmatpush.msk.msrb.mxu1 %vm118_vm0, %v1323_v35 }
 0x4f5   :  { %2402 = vmatmul.msk.f32.gmra.mxu0 %vm498_vm7, %v77_v3  ;;  %2405 = vmatmul.msk.f32.gmra.mxu1 %vm498_vm7, %v77_v3 }
 0x4fd   :  { %2412 = vmatmul.msk.f32.vlgmr.msrb.gmra.mxu0 %vm111_vm1, %v2477_v34  ;;  %2415 = vmatmul.msk.f32.vlgmr.msrb.gmra.mxu1 %vm111_vm1, %v2477_v34 }
 0x505   :  { %2413 = vmatmul.msk.f32.gmra.mxu0 %vm111_vm1, %v2478_v18  ;;  %2416 = vmatmul.msk.f32.gmra.mxu1 %vm111_vm1, %v2478_v18 }
 0x56a   :  { %v3286_v56 = vpop.f32.mrf.mxu0  ;;  %v3288_v57 = vpop.f32.mrf.mxu1 }
 0x572   :  { %v3290_v49 = vpop.f32.mrf.mxu0  ;;  %v3292_v58 = vpop.f32.mrf.mxu1 }
 0x57a   :  { %v1345_v59 = vpop.f32.mrf.mxu0  ;;  %v1368_v39 = vpop.f32.mrf.mxu1 }
 0x57b   :  { %v1346_v50 = vadd.f32 %v1345_v59, %v2661_v22  ;;  %v1369_v23 = vadd.f32 %v1368_v39, %v2661_v22 }
 0x57d   :  { %v1378_v54 = vmul.f32 0.01, %v1346_v50  ;;  %v1379_v60 = vmul.f32 0.01, %v1369_v23  ;;  %vm1374_vm8 = vcmp.ge.f32.partialorder %v1346_v50, 0.0  ;;  %vm1375_vm9 = vcmp.ge.f32.partialorder %v1369_v23, 0.0 }
 0x57f   :  { %v1382_v44 = vsel %vm1374_vm8, %v1346_v50, %v1378_v54  ;;  %v1383_v47 = vsel %vm1375_vm9, %v1369_v23, %v1379_v60 }
 0x580   :  { %v1386_v48 = vadd.f32 %v1383_v47, %v1382_v44 }
 0x582   :  { %v1348_v26 = vpop.f32.mrf.mxu0  ;;  %v1371_v52 = vpop.f32.mrf.mxu1  ;;  %1387 = vadd.xlane.f32.xlu1 %v1386_v48 }
 0x583   :  { %v1349_v10 = vadd.f32 %v1348_v26, %v2657_v17  ;;  %v1372_v36 = vadd.f32 %v1371_v52, %v2657_v17 }
 0x585   :  { %vm1376_vm1 = vcmp.ge.f32.partialorder %v1349_v10, 0.0  ;;  %v1380_v30 = vmul.f32 0.01, %v1349_v10  ;;  %vm1377_vm10 = vcmp.ge.f32.partialorder %v1372_v36, 0.0  ;;  %v1381_v24 = vmul.f32 0.01, %v1372_v36 }
 0x587   :  { %v1384_v20 = vsel %vm1376_vm1, %v1349_v10, %v1380_v30  ;;  %v1385_v22 = vsel %vm1377_vm10, %v1372_v36, %v1381_v24 }
 0x588   :  { %v1389_v41 = vsel %vm118_vm0, %v1384_v20, 0.0  ;;  %v1390_v32 = vsel %vm118_vm0, %v1385_v22, 0.0 }
 0x589   :  { %v1391_v8 = vadd.f32 %v1390_v32, %v1389_v41 }
 0x58b   :  { %1392 = vadd.xlane.f32.xlu2 %v1391_v8 }
 0x5f5   :  { %v1388_v63 = vpop.xlane.xlu1 %1387 }
 0x5f6   :  { %v1394_v0 = vmul.f32 %v1388_v63, %v2670_v45 }
 0x5f8   :  { %v1396_v25 = vsub.f32 %v1382_v44, %v1394_v0  ;;  %v1397_v35 = vsub.f32 %v1383_v47, %v1394_v0 }
 0x5fa   :  { %v1400_v3 = vmul.f32 %v1396_v25, %v1396_v25  ;;  %v1401_v34 = vmul.f32 %v1397_v35, %v1397_v35 }
 0x5fc   :  { %v1404_v17 = vadd.f32 %v1401_v34, %v1400_v3 }
 0x5fe   :  { %v1393_v18 = vpop.xlane.xlu2 %1392  ;;  %1405 = vadd.xlane.f32.xlu2 %v1404_v17 }
 0x5ff   :  { %v1395_v59 = vmul.f32 %v1393_v18, %v2670_v45 }
 0x601   :  { %v1398_v39 = vsub.f32 %v1384_v20, %v1395_v59  ;;  %v1399_v50 = vsub.f32 %v1385_v22, %v1395_v59 }
 0x603   :  { %v1402_v23 = vmul.f32 %v1398_v39, %v1398_v39  ;;  %v1403_v54 = vmul.f32 %v1399_v50, %v1399_v50 }
 0x605   :  { %v1407_v60 = vsel %vm118_vm0, %v1402_v23, 0.0  ;;  %v1408_v48 = vsel %vm118_vm0, %v1403_v54, 0.0 }
 0x606   :  { %v1409_v26 = vadd.f32 %v1408_v48, %v1407_v60 }
 0x608   :  { %1410 = vadd.xlane.f32.xlu0 %v1409_v26 }
 0x671   :  { %v1406_v52 = vpop.xlane.xlu2 %1405 }
 0x672   :  { %v1412_v44 = vmul.f32 %v1406_v52, %v2670_v45 }
 0x674   :  { %v1414_v47 = vadd.f32 1e-05, %v1412_v44 }
 0x676   :  { %2457 = vrsqrt.f32 %v1414_v47  ;;  %vm1422_vm12 = vweird.f32 %v1414_v47 }
 0x67b   :  { %v1411_v10 = vpop.xlane.xlu0 %1410 }
 0x67c   :  { %v2458_v36 = vpop.eup %2457  ;;  %v1413_v30 = vmul.f32 %v1411_v10, %v2670_v45 }
 0x67d   :  { %v1417_v24 = vmul.f32 %v2458_v36, %v1414_v47  ;;  %vm1423_vm11 = vweird.f32 %v2458_v36 }
 0x67e   :  { %v1415_v20 = vadd.f32 1e-05, %v1413_v30  ;;  %vm1424_vm8 = vmor %vm1422_vm12, %vm1423_vm11 }
 0x67f   :  { %v1418_v22 = vmul.f32 %v2458_v36, %v1417_v24 }
 0x680   :  { %2459 = vrsqrt.f32 %v1415_v20  ;;  %vm1432_vm1 = vweird.f32 %v1415_v20 }
 0x681   :  { %v1419_v41 = vmul.f32 0.5, %v1418_v22 }
 0x683   :  { %v1420_v32 = vsub.f32 1.5, %v1419_v41 }
 0x685   :  { %v1421_v8 = vmul.f32 %v2458_v36, %v1420_v32 }
 0x686   :  { %v2460_v63 = vpop.eup %2459 }
 0x687   :  { %v1425_v0 = vsel %vm1424_vm8, %v2458_v36, %v1421_v8  ;;  %v1427_v3 = vmul.f32 %v2460_v63, %v1415_v20  ;;  %vm1433_vm9 = vweird.f32 %v2460_v63 }
 0x688   :  { %v1436_v34 = vmul.f32 %v1425_v0, %v1396_v25  ;;  %v1437_v17 = vmul.f32 %v1425_v0, %v1397_v35  ;;  %vm1434_vm10 = vmor %vm1432_vm1, %vm1433_vm9 }
 0x689   :  { %v1428_v23 = vmul.f32 %v2460_v63, %v1427_v3 }
 0x68a   :  { %v1440_v18 = vmul.f32 %v1436_v34, %v2686_v14  ;;  %v1441_v59 = vmul.f32 %v1437_v17, %v2686_v14 }
 0x68b   :  { %v1429_v48 = vmul.f32 0.5, %v1428_v23 }
 0x68c   :  { %v3309_v54 = vadd.f32 %v1440_v18, %v2690_v21  ;;  %v3312_v60 = vadd.f32 %v1441_v59, %v2690_v21 }
 0x68d   :  { %v1430_v25 = vsub.f32 1.5, %v1429_v48 }
 0x68e   :  { %1548 = vrot.lane.b32.xlu1 %v3312_v60, %s2511_s10  ;;  %1560 = vrot.lane.b32.xlu0 %v3309_v54, %s2512_s21 }
 0x68f   :  { %1544 = vrot.lane.b32.xlu2 %v3309_v54, %s2511_s10  ;;  %v1431_v35 = vmul.f32 %v2460_v63, %v1430_v25 }
 0x691   :  { %v1435_v14 = vsel %vm1434_vm10, %v2460_v63, %v1431_v35 }
 0x692   :  { %v1439_v21 = vmul.f32 %v1435_v14, %v1399_v50  ;;  %v1438_v52 = vmul.f32 %v1435_v14, %v1398_v39 }
 0x694   :  { %v1443_v26 = vmul.f32 %v1439_v21, %v2684_v7  ;;  %v1442_v50 = vmul.f32 %v1438_v52, %v2684_v7  ;;  %v78_v7 = vld [vmem:[%s4389_s7] sm:$0xff] }
 0x696   :  { %1564 = vrot.lane.b32.xlu1 %v3312_v60, %s2512_s21  ;;  %1516 = vrot.lane.b32.xlu0 %v3312_v60, %s2513_s22  ;;  %v3334_v44 = vadd.f32 %v1443_v26, %v2680_v61  ;;  %v3344_v47 = vadd.f32 %v1442_v50, %v2680_v61  ;;  %v79_v61 = vld [vmem:[%s4389_s7 + $0x8] sm:$0xf] }
 0x697   :  { %1528 = vrot.lane.b32.xlu2 %v3309_v54, %s2514_s9 }
 0x69e   :  { %1512 = vrot.lane.b32.xlu1 %v3309_v54, %s2513_s22  ;;  %1532 = vrot.lane.b32.xlu0 %v3312_v60, %s2514_s9 }
 0x69f   :  { %1480 = vrot.lane.b32.xlu2 %v3309_v54, %s2515_s16 }
 0x6a6   :  { %1496 = vrot.lane.b32.xlu1 %v3309_v54, %s2516_s17  ;;  %1500 = vrot.lane.b32.xlu0 %v3312_v60, %s2516_s17 }
 0x6a7   :  { %1550 = vrot.lane.b32.xlu2 %v3334_v44, %s2511_s10 }
 0x6ae   :  { %1464 = vrot.lane.b32.xlu1 %v3309_v54, %s2517_s2  ;;  %1468 = vrot.lane.b32.xlu0 %v3312_v60, %s2517_s2 }
 0x6af   :  { %1530 = vrot.lane.b32.xlu2 %v3344_v47, %s2514_s9 }
 0x6b6   :  { %1562 = vrot.lane.b32.xlu1 %v3344_v47, %s2512_s21  ;;  %1566 = vrot.lane.b32.xlu0 %v3334_v44, %s2512_s21 }
 0x6b7   :  { %1514 = vrot.lane.b32.xlu2 %v3344_v47, %s2513_s22 }
 0x6be   :  { %1518 = vrot.lane.b32.xlu1 %v3334_v44, %s2513_s22  ;;  %1546 = vrot.lane.b32.xlu0 %v3344_v47, %s2511_s10 }
 0x6bf   :  { %1498 = vrot.lane.b32.xlu2 %v3344_v47, %s2516_s17 }
 0x6c6   :  { %1502 = vrot.lane.b32.xlu1 %v3334_v44, %s2516_s17  ;;  %1534 = vrot.lane.b32.xlu0 %v3334_v44, %s2514_s9 }
 0x6c7   :  { %1482 = vrot.lane.b32.xlu2 %v3344_v47, %s2515_s16 }
 0x6ce   :  { %1470 = vrot.lane.b32.xlu1 %v3334_v44, %s2517_s2  ;;  %1486 = vrot.lane.b32.xlu0 %v3334_v44, %s2515_s16 }
 0x6cf   :  { %1466 = vrot.lane.b32.xlu2 %v3344_v47, %s2517_s2 }
 0x6d6   :  { %1450 = vrot.lane.b32.xlu1 %v3344_v47, %s2518_s23  ;;  %1484 = vrot.lane.b32.xlu0 %v3312_v60, %s2515_s16 }
 0x6d7   :  { %1454 = vrot.lane.b32.xlu2 %v3334_v44, %s2518_s23 }
 0x6de   :  { %1452 = vrot.lane.b32.xlu1 %v3312_v60, %s2518_s23  ;;  %1448 = vrot.lane.b32.xlu0 %v3309_v54, %s2518_s23 }
 0x6df   :  { %854 = vperm.xlu2 %2446, %v79_v61  }
 0x6e6   :  { %849 = vperm.xlu0 %2444, %v78_v7  }
 0x6e9   :  { %v1545_v39 = vpop.permute.xlu2 %1544 }
 0x6f1   :  { %v1529_v10 = vpop.permute.xlu2 %1528 }
 0x6f9   :  { %v3392_v36 = vpop.permute.xlu2 %1480 }
 0x700   :  { %v1549_v30 = vpop.permute.xlu1 %1548  ;;  %v1561_v24 = vpop.permute.xlu0 %1560 }
 0x701   :  { %v1551_v20 = vpop.permute.xlu2 %1550  ;;  %v1552_v7 = vsel %vm394_vm13, %v1545_v39, %v1549_v30 }
 0x708   :  { %v1565_v22 = vpop.permute.xlu1 %1564  ;;  %v1517_v41 = vpop.permute.xlu0 %1516 }
 0x709   :  { %v1531_v32 = vpop.permute.xlu2 %1530  ;;  %v1568_v35 = vsel %vm413_vm14, %v1561_v24, %v1565_v22  ;;  %v1570_v14 = vsel %vm413_vm14, %v1565_v22, %v1561_v24  ;;  %v1554_v24 = vsel %vm394_vm13, %v1549_v30, %v1545_v39  ;;  %v1556_v22 = vmul.f32 %v1552_v7, %v2811_v62 }
 0x70a   :  { %v1572_v29 = vmul.f32 %v1568_v35, %v2827_v4  ;;  %v1573_v42 = vmul.f32 %v1570_v14, %v2835_v9 }
 0x70b   :  { %v1622_v30 = vrot.slane %v1556_v22, 4 }
 0x710   :  { %v1513_v8 = vpop.permute.xlu1 %1512  ;;  %v1533_v63 = vpop.permute.xlu0 %1532 }
 0x711   :  { %v1515_v0 = vpop.permute.xlu2 %1514  ;;  %v1536_v7 = vsel %vm375_vm2, %v1529_v10, %v1533_v63 }
 0x718   :  { %v1497_v3 = vpop.permute.xlu1 %1496  ;;  %v1501_v34 = vpop.permute.xlu0 %1500 }
 0x719   :  { %v3394_v17 = vpop.permute.xlu2 %1498 }
 0x720   :  { %v3396_v18 = vpop.permute.xlu1 %1464  ;;  %v3398_v59 = vpop.permute.xlu0 %1468 }
 0x721   :  { %v3400_v23 = vpop.permute.xlu2 %1482 }
 0x728   :  { %v1563_v48 = vpop.permute.xlu1 %1562  ;;  %v1567_v25 = vpop.permute.xlu0 %1566 }
 0x729   :  { %v1569_v21 = vsel %vm413_vm14, %v1563_v48, %v1567_v25  ;;  %v1571_v26 = vsel %vm413_vm14, %v1567_v25, %v1563_v48  ;;  %v3410_v52 = vpop.permute.xlu2 %1466  ;;  %v1557_v48 = vmul.f32 %v1554_v24, %v2820_v2 }
 0x72a   :  { %v1574_v50 = vmul.f32 %v1569_v21, %v2827_v4  ;;  %v1575_v61 = vmul.f32 %v1571_v26, %v2835_v9 }
 0x72c   :  { %2417 = vmatpush.msk.msra.mxu0 %vm118_vm0, %v1574_v50  ;;  %2420 = vmatpush.msk.msra.mxu1 %vm118_vm0, %v1575_v61  ;;  %v1520_v50 = vsel %vm356_vm15, %v1513_v8, %v1517_v41  ;;  %v1623_v61 = vrot.slane %v1557_v48, 4  ;;  %v1506_v48 = vsel %vm337_vm3, %v1501_v34, %v1497_v3 }
 0x72e   :  { %1649 = vmatpush.msra.mxu0 %v1572_v29  ;;  %1672 = vmatpush.msra.mxu1 %v1573_v42  ;;  %v1522_v29 = vsel %vm356_vm15, %v1517_v41, %v1513_v8 }
 0x730   :  { %v1519_v25 = vpop.permute.xlu1 %1518  ;;  %v1547_v21 = vpop.permute.xlu0 %1546 }
 0x731   :  { %v1553_v35 = vsel %vm394_vm13, %v1547_v21, %v1551_v20  ;;  %v1555_v14 = vsel %vm394_vm13, %v1551_v20, %v1547_v21  ;;  %v3428_v26 = vpop.permute.xlu2 %1454  ;;  %v1524_v20 = vmul.f32 %v1520_v50, %v2830_v5  ;;  %v1525_v21 = vmul.f32 %v1522_v29, %v2839_v11 }
 0x732   :  { %v1558_v42 = vmul.f32 %v1553_v35, %v2811_v62  ;;  %v1559_v39 = vmul.f32 %v1555_v14, %v2820_v2  ;;  %v1521_v33 = vsel %vm356_vm15, %v1515_v0, %v1519_v25  ;;  %v1523_v41 = vsel %vm356_vm15, %v1519_v25, %v1515_v0 }
 0x733   :  { %v1538_v35 = vsel %vm375_vm2, %v1533_v63, %v1529_v10  ;;  %v1526_v14 = vmul.f32 %v1521_v33, %v2830_v5  ;;  %v1527_v50 = vmul.f32 %v1523_v41, %v2839_v11  ;;  %v1540_v0 = vmul.f32 %v1536_v7, %v2856_v27 }
 0x734   :  { %v1624_v24 = vrot.slane %v1558_v42, 4  ;;  %v1626_v12 = vrot.slane %v1559_v39, 4  ;;  %v1608_v25 = vrot.slane %v1524_v20, 4  ;;  %v1609_v39 = vrot.slane %v1525_v21, 4 }
 0x735   :  { %v1504_v10 = vsel %vm337_vm3, %v1497_v3, %v1501_v34  ;;  %v3462_v33 = vmul.f32 %v1506_v48, %v2889_v6  ;;  %v1610_v34 = vrot.slane %v1526_v14, 4  ;;  %v1612_v41 = vrot.slane %v1527_v50, 4 }
 0x736   :  { %v1625_v8 = vsel %vm118_vm0, %v1622_v30, %v1624_v24  ;;  %v1627_v22 = vsel %vm118_vm0, %v1623_v61, %v1626_v12 }
 0x737   :  { %1650 = vmatpush.msra.mxu0 %v1625_v8  ;;  %1673 = vmatpush.msra.mxu1 %v1627_v22 }
 0x738   :  { %v1503_v29 = vpop.permute.xlu1 %1502  ;;  %v1535_v42 = vpop.permute.xlu0 %1534 }
 0x739   :  { %v1537_v12 = vsel %vm375_vm2, %v1531_v32, %v1535_v42  ;;  %v1539_v24 = vsel %vm375_vm2, %v1535_v42, %v1531_v32  ;;  %v3457_v8 = vpop.permute.xlu2 %854  ;;  %v1505_v20 = vsel %vm337_vm3, %v3394_v17, %v1503_v29  ;;  %v1507_v32 = vsel %vm337_vm3, %v1503_v29, %v3394_v17 }
 0x73a   :  { %v1542_v63 = vmul.f32 %v1537_v12, %v2856_v27  ;;  %v1543_v7 = vmul.f32 %v1539_v24, %v2868_v38  ;;  %v890_v21 = vadd.f32 %v3290_v49, %v3457_v8  ;;  %v913_v3 = vadd.f32 %v3292_v58, %v3457_v8 }
 0x73b   :  { %v1541_v17 = vmul.f32 %v1538_v35, %v2868_v38  ;;  %v1510_v29 = vmul.f32 %v1507_v32, %v2889_v6  ;;  %v1511_v49 = vmul.f32 %v1505_v20, %v2903_v16  ;;  %v1636_v58 = vsel %vm118_vm0, %v3344_v47, %v1608_v25 }
 0x73c   :  { %v1638_v22 = vsel %vm118_vm0, %v1542_v63, %v1622_v30  ;;  %v1639_v48 = vsel %vm118_vm0, %v1543_v7, %v1623_v61  ;;  %v917_v42 = vadd.f32 %v890_v21, %v3088_v28  ;;  %v918_v12 = vadd.f32 %v913_v3, %v3078_v53 }
 0x73d   :  { %1651 = vmatpush.msra.mxu0 %v1638_v22  ;;  %1674 = vmatpush.msra.mxu1 %v1639_v48  ;;  %v1637_v30 = vsel %vm118_vm0, %v3334_v44, %v1609_v39  ;;  %v1509_v61 = vmul.f32 %v1504_v10, %v2903_v16  ;;  %v1594_v28 = vrot.slane %v3462_v33, 4  ;;  %v1611_v24 = vsel %vm118_vm0, %v1608_v25, %v1610_v34 }
 0x73e   :  { %v925_v53 = vmul.f32 0.01, %v917_v42  ;;  %v926_v14 = vmul.f32 0.01, %v918_v12  ;;  %v1613_v63 = vsel %vm118_vm0, %v1609_v39, %v1612_v41  ;;  %vm921_vm11 = vcmp.ge.f32.partialorder %v917_v42, 0.0 }
 0x73f   :  { %1652 = vmatpush.msra.mxu0 %v1540_v0  ;;  %1675 = vmatpush.msra.mxu1 %v1541_v17  ;;  %vm922_vm12 = vcmp.ge.f32.partialorder %v918_v12, 0.0  ;;  %v1472_v39 = vsel %vm299_vm5, %v3396_v18, %v3398_v59  ;;  %v1474_v33 = vsel %vm299_vm5, %v3398_v59, %v3396_v18  ;;  %v1598_v20 = vrot.slane %v1511_v49, 4 }
 0x740   :  { %v1471_v50 = vpop.permute.xlu1 %1470  ;;  %v1487_v35 = vpop.permute.xlu0 %1486  ;;  %v3515_v3 = vsel %vm922_vm12, %v918_v12, %v926_v14  ;;  %v1595_v22 = vrot.slane %v1509_v61, 4  ;;  %v1476_v12 = vmul.f32 %v1474_v33, %v2941_v46  ;;  %v1477_v17 = vmul.f32 %v1472_v39, %v2950_v1 }
 0x741   :  { %v1473_v7 = vsel %vm299_vm5, %v3410_v52, %v1471_v50  ;;  %v1475_v10 = vsel %vm299_vm5, %v1471_v50, %v3410_v52  ;;  %v1489_v0 = vsel %vm318_vm4, %v3400_v23, %v1487_v35  ;;  %v1491_v25 = vsel %vm318_vm4, %v1487_v35, %v3400_v23  ;;  %1653 = vmatpush.msra.mxu0 %v1611_v24 }
 0x742   :  { %v1596_v52 = vrot.slane %v1510_v29, 4  ;;  %1676 = vmatpush.msra.mxu1 %v1613_v63  ;;  %v1478_v32 = vmul.f32 %v1475_v10, %v2941_v46  ;;  %v1479_v21 = vmul.f32 %v1473_v7, %v2950_v1  ;;  %v3513_v23 = vsel %vm921_vm11, %v917_v42, %v925_v53 }
 0x743   :  { %1654 = vmatpush.msra.mxu0 %v1636_v58  ;;  %v1494_v34 = vmul.f32 %v1491_v25, %v2925_v37  ;;  %v1495_v41 = vmul.f32 %v1489_v0, %v2928_v40  ;;  %v934_v18 = vsel %vm118_vm0, %v3513_v23, 0.0  ;;  %v935_v59 = vsel %vm118_vm0, %v3515_v3, 0.0 }
 0x744   :  { %1677 = vmatpush.msra.mxu1 %v1637_v30  ;;  %v936_v48 = vadd.f32 %v935_v59, %v934_v18  ;;  %v1597_v42 = vsel %vm118_vm0, %v1594_v28, %v1596_v52  ;;  %v1599_v29 = vsel %vm118_vm0, %v1595_v22, %v1598_v20  ;;  %v1582_v49 = vrot.slane %v1478_v32, 4  ;;  %v2479_v59 = vld [vmem:[%s4386_s4] sm:$0xff] }
 0x745   :  { %1655 = vmatpush.msra.mxu0 %v3309_v54  ;;  %v1584_v58 = vrot.slane %v1479_v21, 4  ;;  %v1634_v53 = vsel %vm118_vm0, %v1494_v34, %v1594_v28  ;;  %v1635_v14 = vsel %vm118_vm0, %v1495_v41, %v1595_v22  ;;  %v1580_v10 = vrot.slane %v1476_v12, 4 }
 0x746   :  { %1678 = vmatpush.msra.mxu1 %v3312_v60  ;;  %937 = vadd.xlane.f32.xlu1 %v936_v48  ;;  %v1581_v0 = vrot.slane %v1477_v17, 4 }
 0x747   :  { %1656 = vmatpush.msra.mxu0 %v1597_v42  ;;  %v1583_v39 = vsel %vm118_vm0, %v1580_v10, %v1582_v49  ;;  %v2480_v49 = vld [vmem:[%s4386_s4 + $0x8] sm:$0xf] }
 0x748   :  { %1679 = vmatpush.msra.mxu1 %v1599_v29  ;;  %v1451_v30 = vpop.permute.xlu1 %1450  ;;  %v1485_v61 = vpop.permute.xlu0 %1484  ;;  %v1585_v33 = vsel %vm118_vm0, %v1581_v0, %v1584_v58  ;;  %v90_v29 = vld [vmem:[%s4396_s14] sm:$0xff] }
 0x749   :  { %v1457_v50 = vsel %vm280_vm6, %v1451_v30, %v3428_v26  ;;  %v1459_v35 = vsel %vm280_vm6, %v3428_v26, %v1451_v30  ;;  %v1488_v24 = vsel %vm318_vm4, %v3392_v36, %v1485_v61  ;;  %v1490_v63 = vsel %vm318_vm4, %v1485_v61, %v3392_v36  ;;  %1657 = vmatpush.msra.mxu0 %v1634_v53 }
 0x74a   :  { %v1492_v28 = vmul.f32 %v1490_v63, %v2925_v37  ;;  %v1493_v7 = vmul.f32 %v1488_v24, %v2928_v40  ;;  %1680 = vmatpush.msra.mxu1 %v1635_v14  ;;  %v1462_v25 = vmul.f32 %v1459_v35, %v2984_v51  ;;  %v1463_v26 = vmul.f32 %v1457_v50, %v2987_v43 }
 0x74c   :  { %1658 = vmatpush.msra.mxu0 %v1492_v28  ;;  %1681 = vmatpush.msra.mxu1 %v1493_v7  ;;  %v1632_v36 = vsel %vm118_vm0, %v1462_v25, %v1580_v10  ;;  %v1633_v52 = vsel %vm118_vm0, %v1463_v26, %v1581_v0  ;;  %v93_v26 = vld [vmem:[%s4397_s15 + $0x8] sm:$0xf] }
 0x74e   :  { %1659 = vmatpush.msra.mxu0 %v1583_v39  ;;  %1682 = vmatpush.msra.mxu1 %v1585_v33  ;;  %v91_v33 = vld [vmem:[%s4396_s14 + $0x8] sm:$0xf] }
 0x750   :  { %v1453_v20 = vpop.permute.xlu1 %1452  ;;  %v1449_v32 = vpop.permute.xlu0 %1448  ;;  %1660 = vmatpush.msra.mxu0 %v1632_v36  ;;  %1683 = vmatpush.msra.mxu1 %v1633_v52  ;;  %v92_v36 = vld [vmem:[%s4397_s15] sm:$0xff] }
 0x751   :  { %v1456_v21 = vsel %vm280_vm6, %v1449_v32, %v1453_v20  ;;  %v1458_v34 = vsel %vm280_vm6, %v1453_v20, %v1449_v32 }
 0x752   :  { %v1460_v41 = vmul.f32 %v1458_v34, %v2984_v51  ;;  %v1461_v18 = vmul.f32 %v1456_v21, %v2987_v43 }
 0x754   :  { %1661 = vmatpush.msra.mxu0 %v1460_v41  ;;  %1684 = vmatpush.msra.mxu1 %v1461_v18 }
 0x755   :  { %2418 = vmatmul.msk.f32.vlgmr.msra.gmra.mxu0 %vm498_vm7, %v2479_v59  ;;  %2421 = vmatmul.msk.f32.vlgmr.msra.gmra.mxu1 %vm498_vm7, %v2479_v59 }
 0x758   :  { %v3562_v22 = vpop.permute.xlu0 %849 }
 0x759   :  { %v887_v48 = vadd.f32 %v3286_v56, %v3562_v22  ;;  %v910_v42 = vadd.f32 %v3288_v57, %v3562_v22 }
 0x75b   :  { %v915_v12 = vadd.f32 %v887_v48, %v3053_v13  ;;  %v916_v17 = vadd.f32 %v910_v42, %v3056_v15 }
 0x75d   :  { %2419 = vmatmul.msk.f32.gmra.mxu0 %vm498_vm7, %v2480_v49  ;;  %2422 = vmatmul.msk.f32.gmra.mxu1 %vm498_vm7, %v2480_v49  ;;  %vm919_vm8 = vcmp.ge.f32.partialorder %v915_v12, 0.0  ;;  %vm920_vm9 = vcmp.ge.f32.partialorder %v916_v17, 0.0  ;;  %v923_v56 = vmul.f32 0.01, %v915_v12  ;;  %v924_v57 = vmul.f32 0.01, %v916_v17 }
 0x75f   :  { %v927_v58 = vsel %vm919_vm8, %v915_v12, %v923_v56  ;;  %v928_v13 = vsel %vm920_vm9, %v916_v17, %v924_v57  ;;  %987 = vperm.xlu1 %2445, %v90_v29  }
 0x760   :  { %v931_v15 = vadd.f32 %v928_v13, %v927_v58 }
 0x762   :  { %932 = vadd.xlane.f32.xlu2 %v931_v15 }
 0x7b9   :  { %v938_v30 = vpop.xlane.xlu1 %937 }
 0x7ba   :  { %v940_v61 = vmul.f32 %v938_v30, %v2670_v45 }
 0x7bc   :  { %v943_v53 = vsub.f32 %v3513_v23, %v940_v61  ;;  %v944_v14 = vsub.f32 %v3515_v3, %v940_v61 }
 0x7be   :  { %v947_v50 = vmul.f32 %v943_v53, %v943_v53  ;;  %v948_v35 = vmul.f32 %v944_v14, %v944_v14 }
 0x7c0   :  { %v952_v24 = vsel %vm118_vm0, %v947_v50, 0.0  ;;  %v953_v63 = vsel %vm118_vm0, %v948_v35, 0.0 }
 0x7c1   :  { %v954_v28 = vadd.f32 %v953_v63, %v952_v24 }
 0x7c3   :  { %955 = vadd.xlane.f32.xlu2 %v954_v28 }
 0x7d5   :  { %v933_v7 = vpop.xlane.xlu2 %932 }
 0x7d6   :  { %v939_v10 = vmul.f32 %v933_v7, %v2670_v45 }
 0x7d8   :  { %v941_v0 = vsub.f32 %v927_v58, %v939_v10  ;;  %v942_v25 = vsub.f32 %v928_v13, %v939_v10 }
 0x7da   :  { %v945_v23 = vmul.f32 %v941_v0, %v941_v0  ;;  %v946_v39 = vmul.f32 %v942_v25, %v942_v25 }
 0x7db   :  { %1006 = vperm.xlu2 %2446, %v93_v26   ;;  %v3607_v26 = vpop.permute.xlu1 %987 }
 0x7dc   :  { %v949_v3 = vadd.f32 %v946_v39, %v945_v23 }
 0x7de   :  { %950 = vadd.xlane.f32.xlu0 %v949_v3 }
 0x7f2   :  { %992 = vperm.xlu0 %2444, %v91_v33  }
 0x7fa   :  { %1001 = vperm.xlu0 %2444, %v92_v36   ;;  %v1686_v36 = vpop.f32.mrf.mxu1 }
 0x836   :  { %v956_v52 = vpop.xlane.xlu2 %955 }
 0x837   :  { %v958_v20 = vmul.f32 %v956_v52, %v2670_v45 }
 0x839   :  { %v960_v32 = vadd.f32 1e-05, %v958_v20  ;;  %v1687_v20 = vadd.f32 %v1686_v36, %v3013_v19 }
 0x83b   :  { %2461 = vrsqrt.f32 %v960_v32  ;;  %vm977_vm10 = vweird.f32 %v960_v32 }
 0x83e   :  { %v3599_v63 = vpop.permute.xlu2 %1006 }
 0x841   :  { %v2462_v21 = vpop.eup %2461 }
 0x842   :  { %v972_v34 = vmul.f32 %v2462_v21, %v960_v32  ;;  %vm978_vm1 = vweird.f32 %v2462_v21 }
 0x843   :  { %vm979_vm11 = vmor %vm977_vm10, %vm978_vm1 }
 0x844   :  { %v973_v41 = vmul.f32 %v2462_v21, %v972_v34 }
 0x846   :  { %v974_v48 = vmul.f32 0.5, %v973_v41 }
 0x848   :  { %v975_v12 = vsub.f32 1.5, %v974_v48 }
 0x84a   :  { %v976_v29 = vmul.f32 %v2462_v21, %v975_v12 }
 0x84c   :  { %v980_v57 = vsel %vm979_vm11, %v2462_v21, %v976_v29  ;;  %v1693_v21 = vadd.f32 %v1687_v20, %v3312_v60 }
 0x84d   :  { %v983_v15 = vmul.f32 %v980_v57, %v943_v53  ;;  %v984_v30 = vmul.f32 %v980_v57, %v944_v14 }
 0x84e   :  { %v1701_v41 = vmul.f32 0.01, %v1693_v21  ;;  %vm1697_vm10 = vcmp.ge.f32.partialorder %v1693_v21, 0.0 }
 0x851   :  { %v951_v18 = vpop.xlane.xlu0 %950 }
 0x852   :  { %v957_v59 = vmul.f32 %v951_v18, %v2670_v45 }
 0x854   :  { %v959_v42 = vadd.f32 1e-05, %v957_v59  ;;  %v1689_v59 = vpop.f32.mrf.mxu1 }
 0x856   :  { %2463 = vrsqrt.f32 %v959_v42  ;;  %vm967_vm8 = vweird.f32 %v959_v42 }
 0x85c   :  { %v2464_v17 = vpop.eup %2463 }
 0x85d   :  { %v962_v49 = vmul.f32 %v2464_v17, %v959_v42  ;;  %vm968_vm12 = vweird.f32 %v2464_v17  ;;  %v3671_v42 = vsel %vm1697_vm10, %v1693_v21, %v1701_v41 }
 0x85e   :  { %vm969_vm9 = vmor %vm967_vm8, %vm968_vm12 }
 0x85f   :  { %v963_v56 = vmul.f32 %v2464_v17, %v962_v49 }
 0x861   :  { %v964_v58 = vmul.f32 0.5, %v963_v56 }
 0x863   :  { %v965_v13 = vsub.f32 1.5, %v964_v58 }
 0x864   :  { %v3595_v61 = vpop.permute.xlu0 %992 }
 0x865   :  { %v966_v50 = vmul.f32 %v2464_v17, %v965_v13  ;;  %v997_v35 = vmul.f32 %v3595_v61, %v983_v15  ;;  %v998_v24 = vmul.f32 %v3595_v61, %v984_v30 }
 0x867   :  { %v970_v28 = vsel %vm969_vm9, %v2464_v17, %v966_v50  ;;  %v3602_v7 = vadd.f32 %v3599_v63, %v997_v35  ;;  %v3605_v10 = vadd.f32 %v3599_v63, %v998_v24 }
 0x868   :  { %v981_v53 = vmul.f32 %v970_v28, %v941_v0  ;;  %v982_v14 = vmul.f32 %v970_v28, %v942_v25  ;;  %v1663_v25 = vpop.f32.mrf.mxu0 }
 0x869   :  { %1131 = vrot.lane.b32.xlu1 %v3605_v10, %s2512_s21  ;;  %1127 = vrot.lane.b32.xlu0 %v3602_v7, %s2512_s21  ;;  %v1664_v52 = vadd.f32 %v1663_v25, %v3013_v19  ;;  %v1690_v19 = vadd.f32 %v1689_v59, %v3019_v31 }
 0x86a   :  { %v995_v23 = vmul.f32 %v3607_v26, %v981_v53  ;;  %v996_v39 = vmul.f32 %v3607_v26, %v982_v14 }
 0x86b   :  { %v1692_v32 = vadd.f32 %v1664_v52, %v3309_v54  ;;  %v1695_v17 = vadd.f32 %v1690_v19, %v3334_v44 }
 0x86c   :  { %v3615_v3 = vpop.permute.xlu0 %1001 }
 0x86d   :  { %v3618_v33 = vadd.f32 %v3615_v3, %v995_v23  ;;  %v3621_v0 = vadd.f32 %v3615_v3, %v996_v39  ;;  %v1700_v34 = vmul.f32 0.01, %v1692_v32  ;;  %vm1696_vm1 = vcmp.ge.f32.partialorder %v1692_v32, 0.0 }
 0x86e   :  { %v1703_v49 = vmul.f32 0.01, %v1695_v17  ;;  %vm1699_vm12 = vcmp.ge.f32.partialorder %v1695_v17, 0.0 }
 0x86f   :  { %1109 = vrot.lane.b32.xlu2 %v3618_v33, %s2511_s10  ;;  %v3669_v48 = vsel %vm1696_vm1, %v1692_v32, %v1700_v34 }
 0x870   :  { %v1666_v18 = vpop.f32.mrf.mxu0  ;;  %v1708_v54 = vadd.f32 %v3671_v42, %v3669_v48  ;;  %v3681_v57 = vsel %vm1699_vm12, %v1695_v17, %v1703_v49 }
 0x871   :  { %1113 = vrot.lane.b32.xlu1 %v3621_v0, %s2511_s10  ;;  %1111 = vrot.lane.b32.xlu0 %v3602_v7, %s2511_s10  ;;  %v1667_v12 = vadd.f32 %v1666_v18, %v3019_v31  ;;  %v1712_v31 = vsel %vm118_vm0, %v3681_v57, 0.0 }
 0x873   :  { %v1694_v60 = vadd.f32 %v1667_v12, %v3344_v47 }
 0x875   :  { %v1702_v29 = vmul.f32 0.01, %v1694_v60  ;;  %vm1698_vm11 = vcmp.ge.f32.partialorder %v1694_v60, 0.0 }
 0x877   :  { %1115 = vrot.lane.b32.xlu2 %v3605_v10, %s2511_s10  ;;  %v3679_v56 = vsel %vm1698_vm11, %v1694_v60, %v1702_v29 }
 0x878   :  { %v1711_v58 = vsel %vm118_vm0, %v3679_v56, 0.0 }
 0x879   :  { %1129 = vrot.lane.b32.xlu1 %v3621_v0, %s2512_s21  ;;  %1125 = vrot.lane.b32.xlu0 %v3618_v33, %s2512_s21  ;;  %v1713_v13 = vadd.f32 %v1712_v31, %v1711_v58 }
 0x87f   :  { %1095 = vrot.lane.b32.xlu2 %v3602_v7, %s2514_s9 }
 0x881   :  { %1077 = vrot.lane.b32.xlu1 %v3618_v33, %s2513_s22  ;;  %1099 = vrot.lane.b32.xlu0 %v3605_v10, %s2514_s9 }
 0x887   :  { %1079 = vrot.lane.b32.xlu2 %v3602_v7, %s2513_s22 }
 0x889   :  { %1083 = vrot.lane.b32.xlu1 %v3605_v10, %s2513_s22  ;;  %1081 = vrot.lane.b32.xlu0 %v3621_v0, %s2513_s22 }
 0x88f   :  { %1093 = vrot.lane.b32.xlu2 %v3618_v33, %s2514_s9 }
 0x891   :  { %1063 = vrot.lane.b32.xlu1 %v3602_v7, %s2516_s17  ;;  %1097 = vrot.lane.b32.xlu0 %v3621_v0, %s2514_s9 }
 0x897   :  { %1065 = vrot.lane.b32.xlu2 %v3621_v0, %s2516_s17 }
 0x899   :  { %1061 = vrot.lane.b32.xlu0 %v3618_v33, %s2516_s17 }
 0x89f   :  { %1029 = vrot.lane.b32.xlu2 %v3618_v33, %s2517_s2 }
 0x8a1   :  { %1067 = vrot.lane.b32.xlu0 %v3605_v10, %s2516_s17 }
 0x8a7   :  { %1035 = vrot.lane.b32.xlu2 %v3605_v10, %s2517_s2 }
 0x8af   :  { %1017 = vrot.lane.b32.xlu2 %v3621_v0, %s2518_s23 }
 0x8bb   :  { %1709 = vadd.xlane.f32.xlu1 %v1708_v54 }
 0x8c9   :  { %v1110_v44 = vpop.permute.xlu2 %1109 }
 0x8cb   :  { %1714 = vadd.xlane.f32.xlu0 %v1713_v13 }
 0x8d1   :  { %v1116_v14 = vpop.permute.xlu2 %1115 }
 0x8d4   :  { %1051 = vrot.lane.b32.xlu1 %v3605_v10, %s2515_s16 }
 0x8d9   :  { %v1096_v49 = vpop.permute.xlu2 %1095 }
 0x8db   :  { %v1132_v47 = vpop.permute.xlu1 %1131  ;;  %v1128_v15 = vpop.permute.xlu0 %1127 }
 0x8dc   :  { %v1134_v30 = vsel %vm413_vm14, %v1128_v15, %v1132_v47  ;;  %v1136_v50 = vsel %vm413_vm14, %v1132_v47, %v1128_v15  ;;  %1033 = vrot.lane.b32.xlu1 %v3621_v0, %s2517_s2 }
 0x8dd   :  { %v1139_v35 = vmul.f32 %v1134_v30, %v2827_v4  ;;  %v1140_v24 = vmul.f32 %v1136_v50, %v2835_v9 }
 0x8df   :  { %1047 = vrot.lane.b32.xlu0 %v3602_v7, %s2515_s16  ;;  %2406 = vmatpush.msk.msra.mxu2 %vm118_vm0, %v1139_v35 }
 0x8e0   :  { %2408 = vmatpush.msk.msra.mxu3 %vm118_vm0, %v1140_v24 }
 0x8e3   :  { %v1114_v28 = vpop.permute.xlu1 %1113  ;;  %v1112_v53 = vpop.permute.xlu0 %1111 }
 0x8e4   :  { %1049 = vrot.lane.b32.xlu1 %v3621_v0, %s2515_s16  ;;  %v1117_v23 = vsel %vm394_vm13, %v1110_v44, %v1114_v28  ;;  %v1118_v39 = vsel %vm394_vm13, %v1112_v53, %v1116_v14  ;;  %v1119_v25 = vsel %vm394_vm13, %v1114_v28, %v1110_v44  ;;  %v1120_v36 = vsel %vm394_vm13, %v1116_v14, %v1112_v53  ;;  %v1080_v28 = vpop.permute.xlu2 %1079 }
 0x8e5   :  { %v1121_v52 = vmul.f32 %v1117_v23, %v2811_v62  ;;  %v1123_v20 = vmul.f32 %v1118_v39, %v2811_v62  ;;  %v1122_v32 = vmul.f32 %v1119_v25, %v2820_v2  ;;  %v1124_v21 = vmul.f32 %v1120_v36, %v2820_v2 }
 0x8e7   :  { %1031 = vrot.lane.b32.xlu0 %v3602_v7, %s2517_s2  ;;  %v1187_v18 = vrot.slane %v1121_v52, 4  ;;  %v1189_v59 = vrot.slane %v1123_v20, 4  ;;  %v1188_v54 = vrot.slane %v1122_v32, 4  ;;  %v1191_v60 = vrot.slane %v1124_v21, 4 }
 0x8e9   :  { %v1190_v58 = vsel %vm118_vm0, %v1187_v18, %v1189_v59  ;;  %v1192_v31 = vsel %vm118_vm0, %v1188_v54, %v1191_v60 }
 0x8eb   :  { %v1130_v34 = vpop.permute.xlu1 %1129  ;;  %v1126_v41 = vpop.permute.xlu0 %1125 }
 0x8ec   :  { %v1133_v12 = vsel %vm413_vm14, %v1126_v41, %v1130_v34  ;;  %v1135_v19 = vsel %vm413_vm14, %v1130_v34, %v1126_v41  ;;  %1019 = vrot.lane.b32.xlu1 %v3605_v10, %s2518_s23  ;;  %v1094_v34 = vpop.permute.xlu2 %1093 }
 0x8ed   :  { %v1137_v17 = vmul.f32 %v1133_v12, %v2827_v4  ;;  %v1138_v29 = vmul.f32 %v1135_v19, %v2835_v9 }
 0x8ef   :  { %1045 = vrot.lane.b32.xlu0 %v3618_v33, %s2515_s16  ;;  %1223 = vmatpush.msra.mxu2 %v1137_v17 }
 0x8f0   :  { %1243 = vmatpush.msra.mxu3 %v1138_v29 }
 0x8f1   :  { %1224 = vmatpush.msra.mxu2 %v1190_v58 }
 0x8f2   :  { %1244 = vmatpush.msra.mxu3 %v1192_v31 }
 0x8f3   :  { %v1078_v13 = vpop.permute.xlu1 %1077  ;;  %v1100_v44 = vpop.permute.xlu0 %1099 }
 0x8f4   :  { %v1102_v47 = vsel %vm375_vm2, %v1096_v49, %v1100_v44  ;;  %v1104_v15 = vsel %vm375_vm2, %v1100_v44, %v1096_v49  ;;  %1013 = vrot.lane.b32.xlu1 %v3618_v33, %s2518_s23 }
 0x8f5   :  { %v1107_v30 = vmul.f32 %v1102_v47, %v2856_v27  ;;  %v1108_v50 = vmul.f32 %v1104_v15, %v2868_v38  ;;  %v1066_v47 = vpop.permute.xlu2 %1065 }
 0x8f7   :  { %1015 = vrot.lane.b32.xlu0 %v3602_v7, %s2518_s23  ;;  %v1203_v35 = vsel %vm118_vm0, %v1107_v30, %v1187_v18  ;;  %v1204_v24 = vsel %vm118_vm0, %v1108_v50, %v1188_v54 }
 0x8f8   :  { %1225 = vmatpush.msra.mxu2 %v1203_v35  ;;  %1245 = vmatpush.msra.mxu3 %v1204_v24 }
 0x8fb   :  { %v1084_v53 = vpop.permute.xlu1 %1083  ;;  %v1082_v14 = vpop.permute.xlu0 %1081 }
 0x8fc   :  { %v1086_v23 = vsel %vm356_vm15, %v1080_v28, %v1084_v53  ;;  %v1088_v39 = vsel %vm356_vm15, %v1084_v53, %v1080_v28  ;;  %v1085_v25 = vsel %vm356_vm15, %v1078_v13, %v1082_v14  ;;  %v1087_v36 = vsel %vm356_vm15, %v1082_v14, %v1078_v13 }
 0x8fd   :  { %v1091_v52 = vmul.f32 %v1086_v23, %v2830_v5  ;;  %v1092_v20 = vmul.f32 %v1088_v39, %v2839_v11  ;;  %v1089_v32 = vmul.f32 %v1085_v25, %v2830_v5  ;;  %v1090_v21 = vmul.f32 %v1087_v36, %v2839_v11 }
 0x8ff   :  { %v1175_v41 = vrot.slane %v1091_v52, 4  ;;  %v1177_v18 = vrot.slane %v1092_v20, 4  ;;  %v1173_v12 = vrot.slane %v1089_v32, 4  ;;  %v1174_v19 = vrot.slane %v1090_v21, 4 }
 0x901   :  { %v1176_v49 = vsel %vm118_vm0, %v1173_v12, %v1175_v41  ;;  %v1178_v58 = vsel %vm118_vm0, %v1174_v19, %v1177_v18  ;;  %v1201_v31 = vsel %vm118_vm0, %v3602_v7, %v1173_v12  ;;  %v1202_v13 = vsel %vm118_vm0, %v3605_v10, %v1174_v19 }
 0x903   :  { %v1098_v59 = vpop.permute.xlu0 %1097  ;;  %v1064_v50 = vpop.permute.xlu1 %1063 }
 0x904   :  { %v1101_v54 = vsel %vm375_vm2, %v1094_v34, %v1098_v59  ;;  %v1103_v60 = vsel %vm375_vm2, %v1098_v59, %v1094_v34 }
 0x905   :  { %v1105_v17 = vmul.f32 %v1101_v54, %v2856_v27  ;;  %v1106_v29 = vmul.f32 %v1103_v60, %v2868_v38 }
 0x907   :  { %1226 = vmatpush.msra.mxu2 %v1105_v17  ;;  %1246 = vmatpush.msra.mxu3 %v1106_v29 }
 0x909   :  { %1227 = vmatpush.msra.mxu2 %v1176_v49  ;;  %1247 = vmatpush.msra.mxu3 %v1178_v58 }
 0x90b   :  { %v1062_v44 = vpop.permute.xlu0 %1061  ;;  %1228 = vmatpush.msra.mxu2 %v1201_v31  ;;  %1248 = vmatpush.msra.mxu3 %v1202_v13  ;;  %v1030_v31 = vpop.permute.xlu2 %1029 }
 0x90c   :  { %v1069_v15 = vsel %vm337_vm3, %v1062_v44, %v1066_v47  ;;  %v1071_v30 = vsel %vm337_vm3, %v1066_v47, %v1062_v44 }
 0x90d   :  { %1229 = vmatpush.msra.mxu2 %v3618_v33  ;;  %1249 = vmatpush.msra.mxu3 %v3621_v0  ;;  %v1073_v7 = vmul.f32 %v1071_v30, %v2889_v6  ;;  %v1074_v35 = vmul.f32 %v1069_v15, %v2903_v16 }
 0x90f   :  { %v1159_v53 = vrot.slane %v1073_v7, 4  ;;  %v1160_v14 = vrot.slane %v1074_v35, 4 }
 0x913   :  { %v1068_v10 = vpop.permute.xlu0 %1067  ;;  %v1036_v35 = vpop.permute.xlu2 %1035 }
 0x914   :  { %v1070_v24 = vsel %vm337_vm3, %v1064_v50, %v1068_v10  ;;  %v1072_v33 = vsel %vm337_vm3, %v1068_v10, %v1064_v50 }
 0x915   :  { %v1075_v0 = vmul.f32 %v1072_v33, %v2889_v6  ;;  %v1076_v28 = vmul.f32 %v1070_v24, %v2903_v16 }
 0x917   :  { %v1161_v23 = vrot.slane %v1075_v0, 4  ;;  %v1163_v39 = vrot.slane %v1076_v28, 4 }
 0x919   :  { %v1162_v25 = vsel %vm118_vm0, %v1159_v53, %v1161_v23  ;;  %v1164_v36 = vsel %vm118_vm0, %v1160_v14, %v1163_v39 }
 0x91a   :  { %1230 = vmatpush.msra.mxu2 %v1162_v25  ;;  %1250 = vmatpush.msra.mxu3 %v1164_v36 }
 0x92e   :  { %v1710_v52 = vpop.xlane.xlu1 %1709 }
 0x92f   :  { %v1716_v20 = vmul.f32 %v1710_v52, %v2670_v45 }
 0x931   :  { %v3783_v32 = vsub.f32 %v3669_v48, %v1716_v20  ;;  %v3786_v21 = vsub.f32 %v3671_v42, %v1716_v20 }
 0x933   :  { %v1722_v34 = vmul.f32 %v3783_v32, %v3783_v32  ;;  %v1723_v41 = vmul.f32 %v3786_v21, %v3786_v21 }
 0x935   :  { %v1726_v18 = vadd.f32 %v1723_v41, %v1722_v34 }
 0x937   :  { %1727 = vadd.xlane.f32.xlu2 %v1726_v18 }
 0x93e   :  { %v1715_v59 = vpop.xlane.xlu0 %1714 }
 0x93f   :  { %v1717_v12 = vmul.f32 %v1715_v59, %v2670_v45 }
 0x941   :  { %v3794_v19 = vsub.f32 %v3679_v56, %v1717_v12  ;;  %v3797_v48 = vsub.f32 %v3681_v57, %v1717_v12 }
 0x943   :  { %v1724_v42 = vmul.f32 %v3794_v19, %v3794_v19  ;;  %v1725_v54 = vmul.f32 %v3797_v48, %v3797_v48 }
 0x945   :  { %v1729_v60 = vsel %vm118_vm0, %v1724_v42, 0.0  ;;  %v1730_v17 = vsel %vm118_vm0, %v1725_v54, 0.0 }
 0x946   :  { %v1052_v29 = vpop.permute.xlu1 %1051  ;;  %v1731_v49 = vadd.f32 %v1730_v17, %v1729_v60 }
 0x948   :  { %1732 = vadd.xlane.f32.xlu1 %v1731_v49 }
 0x94e   :  { %v1034_v58 = vpop.permute.xlu1 %1033 }
 0x94f   :  { %v1037_v33 = vsel %vm299_vm5, %v1030_v31, %v1034_v58  ;;  %v1039_v0 = vsel %vm299_vm5, %v1034_v58, %v1030_v31 }
 0x950   :  { %v1041_v23 = vmul.f32 %v1039_v0, %v2941_v46  ;;  %v1042_v39 = vmul.f32 %v1037_v33, %v2950_v1 }
 0x951   :  { %v1048_v56 = vpop.permute.xlu0 %1047 }
 0x952   :  { %v1054_v57 = vsel %vm318_vm4, %v1048_v56, %v1052_v29  ;;  %v1056_v13 = vsel %vm318_vm4, %v1052_v29, %v1048_v56  ;;  %v1145_v59 = vrot.slane %v1041_v23, 4  ;;  %v1146_v12 = vrot.slane %v1042_v39, 4  ;;  %v1018_v29 = vpop.permute.xlu2 %1017 }
 0x953   :  { %v1059_v44 = vmul.f32 %v1056_v13, %v2925_v37  ;;  %v1060_v47 = vmul.f32 %v1054_v57, %v2928_v40 }
 0x955   :  { %v1199_v15 = vsel %vm118_vm0, %v1059_v44, %v1159_v53  ;;  %v1200_v30 = vsel %vm118_vm0, %v1060_v47, %v1160_v14 }
 0x956   :  { %v1050_v50 = vpop.permute.xlu1 %1049  ;;  %1231 = vmatpush.msra.mxu2 %v1199_v15  ;;  %1251 = vmatpush.msra.mxu3 %v1200_v30 }
 0x959   :  { %v1032_v7 = vpop.permute.xlu0 %1031 }
 0x95a   :  { %v1038_v10 = vsel %vm299_vm5, %v1032_v7, %v1036_v35  ;;  %v1040_v24 = vsel %vm299_vm5, %v1036_v35, %v1032_v7 }
 0x95b   :  { %v1043_v28 = vmul.f32 %v1040_v24, %v2941_v46  ;;  %v1044_v53 = vmul.f32 %v1038_v10, %v2950_v1 }
 0x95d   :  { %v1147_v36 = vrot.slane %v1043_v28, 4  ;;  %v1149_v52 = vrot.slane %v1044_v53, 4 }
 0x95e   :  { %v1020_v14 = vpop.permute.xlu1 %1019 }
 0x95f   :  { %v1148_v42 = vsel %vm118_vm0, %v1145_v59, %v1147_v36  ;;  %v1150_v54 = vsel %vm118_vm0, %v1146_v12, %v1149_v52 }
 0x961   :  { %v1046_v25 = vpop.permute.xlu0 %1045 }
 0x962   :  { %v1053_v20 = vsel %vm318_vm4, %v1046_v25, %v1050_v50  ;;  %v1055_v34 = vsel %vm318_vm4, %v1050_v50, %v1046_v25 }
 0x963   :  { %v1057_v41 = vmul.f32 %v1055_v34, %v2925_v37  ;;  %v1058_v18 = vmul.f32 %v1053_v20, %v2928_v40  ;;  %v4423_v20 = vld [vmem:[#allocation9_spill] sm:$0xff] }
 0x965   :  { %1232 = vmatpush.msra.mxu2 %v1057_v41  ;;  %1252 = vmatpush.msra.mxu3 %v1058_v18  ;;  %v4424_v18 = vld [vmem:[#allocation11_spill] sm:$0xff] }
 0x966   :  { %v1014_v60 = vpop.permute.xlu1 %1013 }
 0x967   :  { %1233 = vmatpush.msra.mxu2 %v1148_v42  ;;  %1253 = vmatpush.msra.mxu3 %v1150_v54  ;;  %v1021_v31 = vsel %vm280_vm6, %v1014_v60, %v1018_v29  ;;  %v1023_v56 = vsel %vm280_vm6, %v1018_v29, %v1014_v60 }
 0x968   :  { %v1025_v15 = vmul.f32 %v1023_v56, %v2984_v51  ;;  %v1026_v30 = vmul.f32 %v1021_v31, %v2987_v43 }
 0x969   :  { %v1016_v17 = vpop.permute.xlu0 %1015 }
 0x96a   :  { %v1022_v49 = vsel %vm280_vm6, %v1016_v17, %v1020_v14  ;;  %v1024_v58 = vsel %vm280_vm6, %v1020_v14, %v1016_v17 }
 0x96b   :  { %v1027_v57 = vmul.f32 %v1024_v58, %v2984_v51  ;;  %v1028_v13 = vmul.f32 %v1022_v49, %v2987_v43  ;;  %v4425_v58 = vld [vmem:[#allocation10_spill] sm:$0xff] }
 0x96d   :  { %v1197_v44 = vsel %vm118_vm0, %v1027_v57, %v1145_v59  ;;  %v1198_v47 = vsel %vm118_vm0, %v1028_v13, %v1146_v12  ;;  %v4426_v57 = vld [vmem:[#allocation8_spill] sm:$0xff] }
 0x96e   :  { %1234 = vmatpush.msra.mxu2 %v1197_v44  ;;  %1254 = vmatpush.msra.mxu3 %v1198_v47 }
 0x970   :  { %1235 = vmatpush.msra.mxu2 %v1025_v15  ;;  %1255 = vmatpush.msra.mxu3 %v1026_v30 }
 0x9aa   :  { %v1728_v50 = vpop.xlane.xlu2 %1727 }
 0x9ab   :  { %v1734_v7 = vmul.f32 %v1728_v50, %v2670_v45 }
 0x9ad   :  { %v1736_v35 = vadd.f32 1e-05, %v1734_v7 }
 0x9af   :  { %2465 = vrsqrt.f32 %v1736_v35  ;;  %vm1744_vm9 = vweird.f32 %v1736_v35 }
 0x9b5   :  { %v2466_v10 = vpop.eup %2465 }
 0x9b6   :  { %v1739_v24 = vmul.f32 %v2466_v10, %v1736_v35  ;;  %vm1745_vm8 = vweird.f32 %v2466_v10 }
 0x9b7   :  { %vm1746_vm1 = vmor %vm1744_vm9, %vm1745_vm8 }
 0x9b8   :  { %v1740_v33 = vmul.f32 %v2466_v10, %v1739_v24 }
 0x9ba   :  { %v1741_v0 = vmul.f32 0.5, %v1740_v33 }
 0x9bb   :  { %v1733_v28 = vpop.xlane.xlu1 %1732 }
 0x9bc   :  { %v1742_v53 = vsub.f32 1.5, %v1741_v0  ;;  %v1735_v14 = vmul.f32 %v1733_v28, %v2670_v45 }
 0x9be   :  { %v1743_v23 = vmul.f32 %v2466_v10, %v1742_v53  ;;  %v1737_v39 = vadd.f32 1e-05, %v1735_v14 }
 0x9c0   :  { %v1747_v25 = vsel %vm1746_vm1, %v2466_v10, %v1743_v23  ;;  %2467 = vrsqrt.f32 %v1737_v39  ;;  %vm1754_vm11 = vweird.f32 %v1737_v39 }
 0x9c1   :  { %v1758_v36 = vmul.f32 %v1747_v25, %v3783_v32  ;;  %v1759_v52 = vmul.f32 %v1747_v25, %v3786_v21 }
 0x9c3   :  { %v1762_v34 = vmul.f32 %v1758_v36, %v4423_v20  ;;  %v1763_v41 = vmul.f32 %v1759_v52, %v4423_v20 }
 0x9c5   :  { %v3854_v59 = vadd.f32 %v1762_v34, %v4424_v18  ;;  %v3857_v12 = vadd.f32 %v1763_v41, %v4424_v18 }
 0x9c6   :  { %v2468_v42 = vpop.eup %2467 }
 0x9c7   :  { %v1749_v54 = vmul.f32 %v2468_v42, %v1737_v39  ;;  %1870 = vrot.lane.b32.xlu2 %v3857_v12, %s2511_s10  ;;  %1882 = vrot.lane.b32.xlu1 %v3854_v59, %s2512_s21  ;;  %vm1755_vm10 = vweird.f32 %v2468_v42 }
 0x9c8   :  { %1866 = vrot.lane.b32.xlu0 %v3854_v59, %s2511_s10  ;;  %vm1756_vm12 = vmor %vm1754_vm11, %vm1755_vm10 }
 0x9c9   :  { %v1750_v32 = vmul.f32 %v2468_v42, %v1749_v54 }
 0x9cb   :  { %v1751_v21 = vmul.f32 0.5, %v1750_v32 }
 0x9cd   :  { %v1752_v60 = vsub.f32 1.5, %v1751_v21 }
 0x9cf   :  { %v1753_v17 = vmul.f32 %v2468_v42, %v1752_v60  ;;  %1886 = vrot.lane.b32.xlu2 %v3857_v12, %s2512_s21  ;;  %1850 = vrot.lane.b32.xlu1 %v3854_v59, %s2514_s9 }
 0x9d0   :  { %1834 = vrot.lane.b32.xlu0 %v3854_v59, %s2513_s22 }
 0x9d1   :  { %v1757_v29 = vsel %vm1756_vm12, %v2468_v42, %v1753_v17  ;;  %v3966_v17 = vld [vmem:[%s4390_s8] sm:$0x1] }
 0x9d2   :  { %v1761_v49 = vmul.f32 %v1757_v29, %v3797_v48  ;;  %v1760_v56 = vmul.f32 %v1757_v29, %v3794_v19  ;;  %2407 = vmatmul.msk.f32.vlgmr.msra.gmra.mxu2 %vm498_vm7, %v3966_v17  ;;  %2409 = vmatmul.msk.f32.vlgmr.msra.gmra.mxu3 %vm498_vm7, %v3966_v17 }
 0x9d4   :  { %v1765_v31 = vmul.f32 %v1761_v49, %v4425_v58  ;;  %v1764_v48 = vmul.f32 %v1760_v56, %v4425_v58 }
 0x9d6   :  { %v3881_v13 = vadd.f32 %v1765_v31, %v4426_v57  ;;  %v3891_v44 = vadd.f32 %v1764_v48, %v4426_v57 }
 0x9d7   :  { %1838 = vrot.lane.b32.xlu2 %v3857_v12, %s2513_s22  ;;  %1822 = vrot.lane.b32.xlu1 %v3857_v12, %s2516_s17 }
 0x9d8   :  { %1786 = vrot.lane.b32.xlu0 %v3854_v59, %s2517_s2 }
 0x9df   :  { %1854 = vrot.lane.b32.xlu2 %v3857_v12, %s2514_s9  ;;  %1802 = vrot.lane.b32.xlu1 %v3854_v59, %s2515_s16 }
 0x9e0   :  { %1872 = vrot.lane.b32.xlu0 %v3881_v13, %s2511_s10 }
 0x9e7   :  { %1818 = vrot.lane.b32.xlu2 %v3854_v59, %s2516_s17  ;;  %1884 = vrot.lane.b32.xlu1 %v3891_v44, %s2512_s21 }
 0x9e8   :  { %1840 = vrot.lane.b32.xlu0 %v3881_v13, %s2513_s22 }
 0x9ef   :  { %1790 = vrot.lane.b32.xlu2 %v3857_v12, %s2517_s2  ;;  %1868 = vrot.lane.b32.xlu1 %v3891_v44, %s2511_s10 }
 0x9f0   :  { %1820 = vrot.lane.b32.xlu0 %v3891_v44, %s2516_s17 }
 0x9f7   :  { %1888 = vrot.lane.b32.xlu2 %v3881_v13, %s2512_s21  ;;  %1852 = vrot.lane.b32.xlu1 %v3891_v44, %s2514_s9 }
 0x9f8   :  { %1808 = vrot.lane.b32.xlu0 %v3881_v13, %s2515_s16 }
 0x9ff   :  { %1856 = vrot.lane.b32.xlu2 %v3881_v13, %s2514_s9  ;;  %1836 = vrot.lane.b32.xlu1 %v3891_v44, %s2513_s22 }
 0xa00   :  { %1792 = vrot.lane.b32.xlu0 %v3881_v13, %s2517_s2 }
 0xa07   :  { %1824 = vrot.lane.b32.xlu2 %v3881_v13, %s2516_s17  ;;  %1788 = vrot.lane.b32.xlu1 %v3891_v44, %s2517_s2 }
 0xa08   :  { %1772 = vrot.lane.b32.xlu0 %v3891_v44, %s2518_s23 }
 0xa0f   :  { %1804 = vrot.lane.b32.xlu2 %v3891_v44, %s2515_s16  ;;  %1776 = vrot.lane.b32.xlu1 %v3881_v13, %s2518_s23 }
 0xa10   :  { %1774 = vrot.lane.b32.xlu0 %v3857_v12, %s2518_s23 }
 0xa17   :  { %1806 = vrot.lane.b32.xlu2 %v3857_v12, %s2515_s16 }
 0xa1f   :  { %1770 = vrot.lane.b32.xlu2 %v3854_v59, %s2518_s23 }
 0xa21   :  { %v1871_v19 = vpop.permute.xlu2 %1870 }
 0xa29   :  { %v1887_v47 = vpop.permute.xlu2 %1886 }
 0xa31   :  { %v3933_v15 = vpop.permute.xlu2 %1838 }
 0xa39   :  { %v1855_v30 = vpop.permute.xlu2 %1854  ;;  %v1883_v50 = vpop.permute.xlu1 %1882 }
 0xa3a   :  { %v1867_v7 = vpop.permute.xlu0 %1866  ;;  %v1890_v25 = vsel %vm413_vm14, %v1883_v50, %v1887_v47  ;;  %v1892_v36 = vsel %vm413_vm14, %v1887_v47, %v1883_v50 }
 0xa3b   :  { %v1894_v54 = vmul.f32 %v1890_v25, %v2827_v4  ;;  %v1895_v32 = vmul.f32 %v1892_v36, %v2835_v9  ;;  %v1874_v21 = vsel %vm394_vm13, %v1867_v7, %v1871_v19  ;;  %v1876_v60 = vsel %vm394_vm13, %v1871_v19, %v1867_v7 }
 0xa3c   :  { %v1878_v29 = vmul.f32 %v1874_v21, %v2811_v62  ;;  %v1879_v49 = vmul.f32 %v1876_v60, %v2820_v2 }
 0xa3e   :  { %v1944_v50 = vrot.slane %v1878_v29, 4  ;;  %v1945_v7 = vrot.slane %v1879_v49, 4 }
 0xa41   :  { %v3935_v35 = vpop.permute.xlu2 %1818  ;;  %v1851_v10 = vpop.permute.xlu1 %1850 }
 0xa42   :  { %v1835_v24 = vpop.permute.xlu0 %1834 }
 0xa43   :  { %v1842_v60 = vsel %vm356_vm15, %v1835_v24, %v3933_v15 }
 0xa49   :  { %v3937_v33 = vpop.permute.xlu2 %1790  ;;  %v3939_v0 = vpop.permute.xlu1 %1822 }
 0xa4a   :  { %v3941_v28 = vpop.permute.xlu0 %1786 }
 0xa51   :  { %v1889_v53 = vpop.permute.xlu2 %1888  ;;  %v3943_v14 = vpop.permute.xlu1 %1802 }
 0xa52   :  { %v1873_v23 = vpop.permute.xlu0 %1872 }
 0xa59   :  { %v1885_v39 = vpop.permute.xlu1 %1884  ;;  %v1857_v52 = vpop.permute.xlu2 %1856 }
 0xa5a   :  { %v1891_v20 = vsel %vm413_vm14, %v1885_v39, %v1889_v53  ;;  %v1893_v34 = vsel %vm413_vm14, %v1889_v53, %v1885_v39  ;;  %v1841_v41 = vpop.permute.xlu0 %1840 }
 0xa5b   :  { %v1896_v18 = vmul.f32 %v1891_v20, %v2827_v4  ;;  %v1897_v42 = vmul.f32 %v1893_v34, %v2835_v9 }
 0xa5d   :  { %2423 = vmatpush.msk.msrb.mxu2 %vm118_vm0, %v1896_v18  ;;  %2426 = vmatpush.msk.msrb.mxu3 %vm118_vm0, %v1897_v42  ;;  %v1858_v42 = vsel %vm375_vm2, %v1851_v10, %v1855_v30 }
 0xa5f   :  { %1971 = vmatpush.msrb.mxu2 %v1894_v54  ;;  %1994 = vmatpush.msrb.mxu3 %v1895_v32  ;;  %v1860_v54 = vsel %vm375_vm2, %v1855_v30, %v1851_v10  ;;  %v1844_v30 = vsel %vm356_vm15, %v3933_v15, %v1835_v24 }
 0xa61   :  { %v1869_v58 = vpop.permute.xlu1 %1868  ;;  %v1825_v47 = vpop.permute.xlu2 %1824 }
 0xa62   :  { %v1875_v31 = vsel %vm394_vm13, %v1869_v58, %v1873_v23  ;;  %v1877_v56 = vsel %vm394_vm13, %v1873_v23, %v1869_v58  ;;  %v1821_v57 = vpop.permute.xlu0 %1820  ;;  %v1863_v58 = vmul.f32 %v1860_v54, %v2868_v38 }
 0xa63   :  { %v1880_v48 = vmul.f32 %v1875_v31, %v2811_v62  ;;  %v1881_v19 = vmul.f32 %v1877_v56, %v2820_v2  ;;  %v1846_v31 = vmul.f32 %v1842_v60, %v2830_v5  ;;  %v1847_v56 = vmul.f32 %v1844_v30, %v2839_v11 }
 0xa65   :  { %v1946_v53 = vrot.slane %v1880_v48, 4  ;;  %v1948_v39 = vrot.slane %v1881_v19, 4  ;;  %v1829_v48 = vsel %vm337_vm3, %v1825_v47, %v1821_v57 }
 0xa67   :  { %v1947_v25 = vsel %vm118_vm0, %v1944_v50, %v1946_v53  ;;  %v1949_v36 = vsel %vm118_vm0, %v1945_v7, %v1948_v39  ;;  %v1826_v53 = vsel %vm337_vm3, %v3935_v35, %v3939_v0  ;;  %v1828_v39 = vsel %vm337_vm3, %v3939_v0, %v3935_v35 }
 0xa68   :  { %1972 = vmatpush.msrb.mxu2 %v1947_v25  ;;  %1995 = vmatpush.msrb.mxu3 %v1949_v36  ;;  %v1832_v36 = vmul.f32 %v1829_v48, %v2889_v6  ;;  %v1831_v54 = vmul.f32 %v1826_v53, %v2903_v16  ;;  %v1796_v35 = vsel %vm299_vm5, %v3937_v33, %v3941_v28 }
 0xa69   :  { %v1853_v20 = vpop.permute.xlu1 %1852  ;;  %v1805_v10 = vpop.permute.xlu2 %1804  ;;  %v1798_v30 = vmul.f32 %v1796_v35, %v2941_v46 }
 0xa6a   :  { %v1859_v23 = vsel %vm375_vm2, %v1853_v20, %v1857_v52  ;;  %v1861_v34 = vsel %vm375_vm2, %v1857_v52, %v1853_v20  ;;  %v1809_v18 = vpop.permute.xlu0 %1808  ;;  %v1862_v52 = vmul.f32 %v1858_v42, %v2856_v27  ;;  %v1931_v20 = vrot.slane %v1847_v56, 4 }
 0xa6b   :  { %v1864_v32 = vmul.f32 %v1859_v23, %v2856_v27  ;;  %v1865_v21 = vmul.f32 %v1861_v34, %v2868_v38  ;;  %v1830_v42 = vmul.f32 %v1828_v39, %v2889_v6  ;;  %v1811_v60 = vsel %vm318_vm4, %v1805_v10, %v1809_v18 }
 0xa6c   :  { %v1959_v48 = vsel %vm118_vm0, %v3881_v13, %v1931_v20 }
 0xa6d   :  { %v1960_v29 = vsel %vm118_vm0, %v1864_v32, %v1944_v50  ;;  %v1961_v49 = vsel %vm118_vm0, %v1865_v21, %v1945_v7  ;;  %v1827_v50 = vsel %vm337_vm3, %v1821_v57, %v1825_v47  ;;  %v1930_v47 = vrot.slane %v1846_v31, 4 }
 0xa6e   :  { %1973 = vmatpush.msrb.mxu2 %v1960_v29  ;;  %1996 = vmatpush.msrb.mxu3 %v1961_v49  ;;  %v1918_v21 = vrot.slane %v1832_v36, 4  ;;  %v1813_v29 = vsel %vm318_vm4, %v1809_v18, %v1805_v10  ;;  %v1917_v18 = vrot.slane %v1831_v54, 4 }
 0xa70   :  { %1974 = vmatpush.msrb.mxu2 %v1862_v52  ;;  %1997 = vmatpush.msrb.mxu3 %v1863_v58  ;;  %v1958_v52 = vsel %vm118_vm0, %v3891_v44, %v1930_v47  ;;  %v1794_v58 = vsel %vm299_vm5, %v3941_v28, %v3937_v33  ;;  %v1816_v33 = vmul.f32 %v1813_v29, %v2925_v37 }
 0xa71   :  { %v1837_v19 = vpop.permute.xlu1 %1836  ;;  %v1807_v49 = vpop.permute.xlu2 %1806  ;;  %v1817_v28 = vmul.f32 %v1811_v60, %v2928_v40  ;;  %v1799_v39 = vmul.f32 %v1794_v58, %v2950_v1 }
 0xa72   :  { %v1843_v7 = vsel %vm356_vm15, %v1837_v19, %v1841_v41  ;;  %v1845_v15 = vsel %vm356_vm15, %v1841_v41, %v1837_v19  ;;  %v1793_v24 = vpop.permute.xlu0 %1792  ;;  %v1833_v41 = vmul.f32 %v1827_v50, %v2903_v16  ;;  %v1916_v19 = vrot.slane %v1830_v42, 4 }
 0xa73   :  { %v1848_v25 = vmul.f32 %v1843_v7, %v2830_v5  ;;  %v1849_v57 = vmul.f32 %v1845_v15, %v2839_v11  ;;  %v1903_v42 = vrot.slane %v1799_v39, 4 }
 0xa74   :  { %v1920_v31 = vrot.slane %v1833_v41, 4  ;;  %v1902_v41 = vrot.slane %v1798_v30, 4 }
 0xa75   :  { %v1932_v23 = vrot.slane %v1848_v25, 4  ;;  %v1934_v34 = vrot.slane %v1849_v57, 4  ;;  %v1919_v25 = vsel %vm118_vm0, %v1916_v19, %v1918_v21  ;;  %v1812_v57 = vsel %vm318_vm4, %v1807_v49, %v3943_v14 }
 0xa76   :  { %v1921_v36 = vsel %vm118_vm0, %v1917_v18, %v1920_v31  ;;  %v1814_v54 = vmul.f32 %v1812_v57, %v2925_v37 }
 0xa77   :  { %v1933_v0 = vsel %vm118_vm0, %v1930_v47, %v1932_v23  ;;  %v1935_v32 = vsel %vm118_vm0, %v1931_v20, %v1934_v34  ;;  %v1956_v23 = vsel %vm118_vm0, %v1816_v33, %v1916_v19  ;;  %v1957_v34 = vsel %vm118_vm0, %v1817_v28, %v1917_v18  ;;  %v4096_v33 = vpop.f32.mrf.mxu3 }
 0xa78   :  { %1975 = vmatpush.msrb.mxu2 %v1933_v0  ;;  %1998 = vmatpush.msrb.mxu3 %v1935_v32 }
 0xa79   :  { %v1789_v56 = vpop.permute.xlu1 %1788  ;;  %v1771_v32 = vpop.permute.xlu2 %1770 }
 0xa7a   :  { %v1795_v10 = vsel %vm299_vm5, %v1789_v56, %v1793_v24  ;;  %v1797_v50 = vsel %vm299_vm5, %v1793_v24, %v1789_v56  ;;  %v1773_v7 = vpop.permute.xlu0 %1772  ;;  %1976 = vmatpush.msrb.mxu2 %v1958_v52  ;;  %1999 = vmatpush.msrb.mxu3 %v1959_v48  ;;  %v1810_v24 = vsel %vm318_vm4, %v3943_v14, %v1807_v49 }
 0xa7b   :  { %v1800_v15 = vmul.f32 %v1797_v50, %v2941_v46  ;;  %v1801_v53 = vmul.f32 %v1795_v10, %v2950_v1  ;;  %v1815_v35 = vmul.f32 %v1810_v24, %v2928_v40  ;;  %v2481_v10 = vld [vmem:[%s4388_s6] sm:$0xff]  ;;  %v2482_v50 = vld [vmem:[%s4388_s6 + $0x8] sm:$0xf]  ;;  %s2519_s6 = smov [#allocation5]  }
 0xa7c   :  { %1977 = vmatpush.msrb.mxu2 %v3854_v59  ;;  %2000 = vmatpush.msrb.mxu3 %v3857_v12 }
 0xa7d   :  { %v1904_v47 = vrot.slane %v1800_v15, 4  ;;  %v1906_v20 = vrot.slane %v1801_v53, 4 }
 0xa7e   :  { %1978 = vmatpush.msrb.mxu2 %v1919_v25  ;;  %2001 = vmatpush.msrb.mxu3 %v1921_v36 }
 0xa7f   :  { %v1905_v14 = vsel %vm118_vm0, %v1902_v41, %v1904_v47  ;;  %v1907_v49 = vsel %vm118_vm0, %v1903_v42, %v1906_v20 }
 0xa80   :  { %1979 = vmatpush.msrb.mxu2 %v1956_v23  ;;  %2002 = vmatpush.msrb.mxu3 %v1957_v34 }
 0xa81   :  { %v1777_v0 = vpop.permute.xlu1 %1776 }
 0xa82   :  { %v1779_v21 = vsel %vm280_vm6, %v1773_v7, %v1777_v0  ;;  %v1781_v60 = vsel %vm280_vm6, %v1777_v0, %v1773_v7  ;;  %v1775_v29 = vpop.permute.xlu0 %1774  ;;  %1980 = vmatpush.msrb.mxu2 %v1814_v54  ;;  %2003 = vmatpush.msrb.mxu3 %v1815_v35  ;;  %v4094_v7 = vpop.f32.mrf.mxu2 }
 0xa83   :  { %v1784_v52 = vmul.f32 %v1781_v60, %v2984_v51  ;;  %v1785_v58 = vmul.f32 %v1779_v21, %v2987_v43  ;;  %v1778_v30 = vsel %vm280_vm6, %v1771_v32, %v1775_v29  ;;  %v1780_v31 = vsel %vm280_vm6, %v1775_v29, %v1771_v32 }
 0xa84   :  { %1981 = vmatpush.msrb.mxu2 %v1905_v14  ;;  %2004 = vmatpush.msrb.mxu3 %v1907_v49  ;;  %v1782_v19 = vmul.f32 %v1780_v31, %v2984_v51  ;;  %v1783_v18 = vmul.f32 %v1778_v30, %v2987_v43 }
 0xa85   :  { %v1954_v56 = vsel %vm118_vm0, %v1784_v52, %v1902_v41  ;;  %v1955_v48 = vsel %vm118_vm0, %v1785_v58, %v1903_v42 }
 0xa86   :  { %1982 = vmatpush.msrb.mxu2 %v1954_v56  ;;  %2005 = vmatpush.msrb.mxu3 %v1955_v48 }
 0xa88   :  { %1983 = vmatpush.msrb.mxu2 %v1782_v19  ;;  %2006 = vmatpush.msrb.mxu3 %v1783_v18 }
 0xa89   :  { %2424 = vmatmul.msk.f32.vlgmr.msrb.gmra.mxu2 %vm498_vm7, %v2481_v10  ;;  %2427 = vmatmul.msk.f32.vlgmr.msrb.gmra.mxu3 %vm498_vm7, %v2481_v10 }
 0xa91   :  { %2425 = vmatmul.msk.f32.gmra.mxu2 %vm498_vm7, %v2482_v50  ;;  %2428 = vmatmul.msk.f32.gmra.mxu3 %vm498_vm7, %v2482_v50 }
 0xb0c   :  { %v1985_v28 = vpop.f32.mrf.mxu2  ;;  %v2008_v15 = vpop.f32.mrf.mxu3 }
 0xb0d   :  { %v1986_v53 = vadd.f32 %v1985_v28, %v3562_v22  ;;  %v2009_v39 = vadd.f32 %v2008_v15, %v3562_v22 }
 0xb0f   :  { %v2014_v25 = vadd.f32 %v1986_v53, %v3854_v59  ;;  %v2015_v24 = vadd.f32 %v2009_v39, %v3857_v12 }
 0xb11   :  { %vm2018_vm8 = vcmp.ge.f32.partialorder %v2014_v25, 0.0  ;;  %v2022_v57 = vmul.f32 0.01, %v2014_v25  ;;  %vm2019_vm9 = vcmp.ge.f32.partialorder %v2015_v24, 0.0  ;;  %v2023_v47 = vmul.f32 0.01, %v2015_v24 }
 0xb13   :  { %v2026_v36 = vsel %vm2018_vm8, %v2014_v25, %v2022_v57  ;;  %v2027_v20 = vsel %vm2019_vm9, %v2015_v24, %v2023_v47 }
 0xb14   :  { %v1988_v41 = vpop.f32.mrf.mxu2  ;;  %v2011_v23 = vpop.f32.mrf.mxu3  ;;  %v2030_v34 = vadd.f32 %v2027_v20, %v2026_v36 }
 0xb15   :  { %v1989_v42 = vadd.f32 %v1988_v41, %v3457_v8  ;;  %v2012_v54 = vadd.f32 %v2011_v23, %v3457_v8 }
 0xb16   :  { %2031 = vadd.xlane.f32.xlu2 %v2030_v34 }
 0xb17   :  { %v2016_v22 = vadd.f32 %v1989_v42, %v3891_v44  ;;  %v2017_v59 = vadd.f32 %v2012_v54, %v3881_v13 }
 0xb19   :  { %vm2020_vm1 = vcmp.ge.f32.partialorder %v2016_v22, 0.0  ;;  %v2024_v12 = vmul.f32 0.01, %v2016_v22  ;;  %vm2021_vm10 = vcmp.ge.f32.partialorder %v2017_v59, 0.0  ;;  %v2025_v35 = vmul.f32 0.01, %v2017_v59 }
 0xb1b   :  { %v2028_v0 = vsel %vm2020_vm1, %v2016_v22, %v2024_v12  ;;  %v2029_v14 = vsel %vm2021_vm10, %v2017_v59, %v2025_v35 }
 0xb1c   :  { %v2033_v32 = vsel %vm118_vm0, %v2028_v0, 0.0  ;;  %v2034_v21 = vsel %vm118_vm0, %v2029_v14, 0.0 }
 0xb1d   :  { %v2035_v60 = vadd.f32 %v2034_v21, %v2033_v32 }
 0xb1f   :  { %2036 = vadd.xlane.f32.xlu1 %v2035_v60 }
 0xb89   :  { %v2032_v29 = vpop.xlane.xlu2 %2031 }
 0xb8a   :  { %v2038_v8 = vmul.f32 %v2032_v29, %v2670_v45 }
 0xb8c   :  { %v2040_v49 = vsub.f32 %v2026_v36, %v2038_v8  ;;  %v2041_v52 = vsub.f32 %v2027_v20, %v2038_v8 }
 0xb8e   :  { %v2044_v44 = vmul.f32 %v2040_v49, %v2040_v49  ;;  %v2045_v58 = vmul.f32 %v2041_v52, %v2041_v52 }
 0xb90   :  { %v2048_v13 = vadd.f32 %v2045_v58, %v2044_v44 }
 0xb92   :  { %v2037_v30 = vpop.xlane.xlu1 %2036  ;;  %2049 = vadd.xlane.f32.xlu1 %v2048_v13 }
 0xb93   :  { %v2039_v31 = vmul.f32 %v2037_v30, %v2670_v45 }
 0xb95   :  { %v2042_v56 = vsub.f32 %v2028_v0, %v2039_v31  ;;  %v2043_v48 = vsub.f32 %v2029_v14, %v2039_v31 }
 0xb97   :  { %v2046_v19 = vmul.f32 %v2042_v56, %v2042_v56  ;;  %v2047_v18 = vmul.f32 %v2043_v48, %v2043_v48 }
 0xb99   :  { %v2051_v10 = vsel %vm118_vm0, %v2046_v19, 0.0  ;;  %v2052_v50 = vsel %vm118_vm0, %v2047_v18, 0.0 }
 0xb9a   :  { %v2053_v28 = vadd.f32 %v2052_v50, %v2051_v10 }
 0xb9c   :  { %2054 = vadd.xlane.f32.xlu0 %v2053_v28 }
 0xc05   :  { %v2050_v15 = vpop.xlane.xlu1 %2049 }
 0xc06   :  { %v2056_v53 = vmul.f32 %v2050_v15, %v2670_v45 }
 0xc08   :  { %v2058_v39 = vadd.f32 1e-05, %v2056_v53 }
 0xc0a   :  { %2469 = vrsqrt.f32 %v2058_v39  ;;  %vm2066_vm12 = vweird.f32 %v2058_v39 }
 0xc0f   :  { %v2055_v25 = vpop.xlane.xlu0 %2054 }
 0xc10   :  { %v2470_v24 = vpop.eup %2469  ;;  %v2057_v57 = vmul.f32 %v2055_v25, %v2670_v45 }
 0xc11   :  { %v2061_v47 = vmul.f32 %v2470_v24, %v2058_v39  ;;  %vm2067_vm11 = vweird.f32 %v2470_v24 }
 0xc12   :  { %v2059_v36 = vadd.f32 1e-05, %v2057_v57  ;;  %vm2068_vm8 = vmor %vm2066_vm12, %vm2067_vm11 }
 0xc13   :  { %v2062_v20 = vmul.f32 %v2470_v24, %v2061_v47 }
 0xc14   :  { %2471 = vrsqrt.f32 %v2059_v36  ;;  %vm2076_vm1 = vweird.f32 %v2059_v36 }
 0xc15   :  { %v2063_v41 = vmul.f32 0.5, %v2062_v20 }
 0xc17   :  { %v2064_v23 = vsub.f32 1.5, %v2063_v41 }
 0xc19   :  { %v2065_v34 = vmul.f32 %v2470_v24, %v2064_v23 }
 0xc1a   :  { %v2472_v42 = vpop.eup %2471 }
 0xc1b   :  { %v2069_v54 = vsel %vm2068_vm8, %v2470_v24, %v2065_v34  ;;  %v2071_v22 = vmul.f32 %v2472_v42, %v2059_v36  ;;  %vm2077_vm9 = vweird.f32 %v2472_v42 }
 0xc1c   :  { %v2080_v59 = vmul.f32 %v2069_v54, %v2040_v49  ;;  %v2081_v12 = vmul.f32 %v2069_v54, %v2041_v52  ;;  %vm2078_vm10 = vmor %vm2076_vm1, %vm2077_vm9 }
 0xc1d   :  { %v2072_v35 = vmul.f32 %v2472_v42, %v2071_v22 }
 0xc1e   :  { %v2084_v0 = vmul.f32 %v2080_v59, %v3607_v26  ;;  %v2085_v14 = vmul.f32 %v2081_v12, %v3607_v26 }
 0xc1f   :  { %v2073_v32 = vmul.f32 0.5, %v2072_v35 }
 0xc20   :  { %v4117_v21 = vadd.f32 %v2084_v0, %v3615_v3  ;;  %v4120_v60 = vadd.f32 %v2085_v14, %v3615_v3 }
 0xc21   :  { %v2074_v29 = vsub.f32 1.5, %v2073_v32 }
 0xc22   :  { %2192 = vrot.lane.b32.xlu0 %v4120_v60, %s2511_s10  ;;  %2172 = vrot.lane.b32.xlu2 %v4117_v21, %s2514_s9 }
 0xc23   :  { %v2075_v8 = vmul.f32 %v2472_v42, %v2074_v29  ;;  %2188 = vrot.lane.b32.xlu1 %v4117_v21, %s2511_s10 }
 0xc25   :  { %v2079_v26 = vsel %vm2078_vm10, %v2472_v42, %v2075_v8 }
 0xc26   :  { %v2082_v49 = vmul.f32 %v2079_v26, %v2042_v56  ;;  %v2083_v44 = vmul.f32 %v2079_v26, %v2043_v48 }
 0xc28   :  { %v2086_v3 = vmul.f32 %v2082_v49, %v3595_v61  ;;  %v2087_v58 = vmul.f32 %v2083_v44, %v3595_v61  ;;  %v81_v61 = vld [vmem:[#allocation2] sm:$0x1] }
 0xc2a   :  { %2208 = vrot.lane.b32.xlu0 %v4120_v60, %s2512_s21  ;;  %2124 = vrot.lane.b32.xlu2 %v4117_v21, %s2515_s16  ;;  %v4136_v52 = vadd.f32 %v2086_v3, %v3599_v63  ;;  %v4152_v13 = vadd.f32 %v2087_v58, %v3599_v63 }
 0xc2b   :  { %2204 = vrot.lane.b32.xlu1 %v4117_v21, %s2512_s21 }
 0xc32   :  { %2206 = vrot.lane.b32.xlu2 %v4136_v52, %s2512_s21  ;;  %2156 = vrot.lane.b32.xlu0 %v4117_v21, %s2513_s22 }
 0xc33   :  { %2160 = vrot.lane.b32.xlu1 %v4120_v60, %s2513_s22 }
 0xc3a   :  { %2190 = vrot.lane.b32.xlu2 %v4136_v52, %s2511_s10  ;;  %2140 = vrot.lane.b32.xlu0 %v4117_v21, %s2516_s17 }
 0xc3b   :  { %2176 = vrot.lane.b32.xlu1 %v4120_v60, %s2514_s9 }
 0xc42   :  { %2194 = vrot.lane.b32.xlu2 %v4152_v13, %s2511_s10  ;;  %2108 = vrot.lane.b32.xlu0 %v4117_v21, %s2517_s2  ;;  %s2377_s10 = sshll.u32 %s2519_s6, 4  ;;  %s2378_s10 = int_to_ptr.vmem [resolvable:$true] %s2377_s10 }
 0xc43   :  { %2144 = vrot.lane.b32.xlu1 %v4120_v60, %s2516_s17 }
 0xc4a   :  { %2174 = vrot.lane.b32.xlu2 %v4136_v52, %s2514_s9  ;;  %2210 = vrot.lane.b32.xlu0 %v4152_v13, %s2512_s21 }
 0xc4b   :  { %2112 = vrot.lane.b32.xlu1 %v4120_v60, %s2517_s2 }
 0xc52   :  { %2158 = vrot.lane.b32.xlu2 %v4136_v52, %s2513_s22  ;;  %2162 = vrot.lane.b32.xlu0 %v4152_v13, %s2513_s22 }
 0xc53   :  { %2178 = vrot.lane.b32.xlu1 %v4152_v13, %s2514_s9  ;;  %s2379_s9 = sshll.u32 %s4398_s18, 4  ;;  %s2380_s9 = int_to_ptr.hbm [resolvable:$true] %s2379_s9 }
 0xc5a   :  { %2142 = vrot.lane.b32.xlu2 %v4136_v52, %s2516_s17  ;;  %2146 = vrot.lane.b32.xlu0 %v4152_v13, %s2516_s17 }
 0xc5b   :  { %2130 = vrot.lane.b32.xlu1 %v4152_v13, %s2515_s16 }
 0xc62   :  { %2126 = vrot.lane.b32.xlu2 %v4136_v52, %s2515_s16  ;;  %2114 = vrot.lane.b32.xlu0 %v4152_v13, %s2517_s2 }
 0xc63   :  { %2128 = vrot.lane.b32.xlu1 %v4120_v60, %s2515_s16 }
 0xc6a   :  { %2110 = vrot.lane.b32.xlu2 %v4136_v52, %s2517_s2  ;;  %2094 = vrot.lane.b32.xlu0 %v4136_v52, %s2518_s23 }
 0xc6b   :  { %2092 = vrot.lane.b32.xlu1 %v4117_v21, %s2518_s23 }
 0xc72   :  { %2098 = vrot.lane.b32.xlu2 %v4152_v13, %s2518_s23  ;;  %2096 = vrot.lane.b32.xlu0 %v4120_v60, %s2518_s23 }
 0xc7a   :  { %1207 = vperm.xlu2 %2446, %v81_v61  }
 0xc7c   :  { %v4194_v63 = vpop.permute.xlu2 %2172 }
 0xc84   :  { %v4196_v30 = vpop.permute.xlu2 %2124 }
 0xc8c   :  { %v2207_v31 = vpop.permute.xlu2 %2206 }
 0xc94   :  { %v2193_v56 = vpop.permute.xlu0 %2192  ;;  %v2191_v48 = vpop.permute.xlu2 %2190 }
 0xc95   :  { %v2189_v19 = vpop.permute.xlu1 %2188 }
 0xc96   :  { %v2196_v23 = vsel %vm394_vm13, %v2189_v19, %v2193_v56  ;;  %v2198_v34 = vsel %vm394_vm13, %v2193_v56, %v2189_v19 }
 0xc97   :  { %v2200_v22 = vmul.f32 %v2196_v23, %v2811_v62  ;;  %v2201_v59 = vmul.f32 %v2198_v34, %v2820_v2 }
 0xc99   :  { %v2266_v58 = vrot.slane %v2200_v22, 4  ;;  %v2267_v61 = vrot.slane %v2201_v59, 4 }
 0xc9c   :  { %v2209_v18 = vpop.permute.xlu0 %2208  ;;  %v2195_v10 = vpop.permute.xlu2 %2194 }
 0xc9d   :  { %v2205_v50 = vpop.permute.xlu1 %2204  ;;  %v2197_v20 = vsel %vm394_vm13, %v2191_v48, %v2195_v10  ;;  %v2199_v41 = vsel %vm394_vm13, %v2195_v10, %v2191_v48  ;;  %vm1262_vm13 = vcmask 1040384  }
 0xc9e   :  { %v2202_v42 = vmul.f32 %v2197_v20, %v2811_v62  ;;  %v2203_v54 = vmul.f32 %v2199_v41, %v2820_v2  ;;  %v2212_v0 = vsel %vm413_vm14, %v2205_v50, %v2209_v18  ;;  %v2214_v14 = vsel %vm413_vm14, %v2209_v18, %v2205_v50 }
 0xc9f   :  { %v2216_v3 = vmul.f32 %v2212_v0, %v2827_v4  ;;  %v2217_v44 = vmul.f32 %v2214_v14, %v2835_v9 }
 0xca0   :  { %v2268_v26 = vrot.slane %v2202_v42, 4  ;;  %v2270_v49 = vrot.slane %v2203_v54, 4 }
 0xca2   :  { %v2269_v48 = vsel %vm118_vm0, %v2266_v58, %v2268_v26 }
 0xca4   :  { %v2175_v28 = vpop.permute.xlu2 %2174  ;;  %v2157_v15 = vpop.permute.xlu0 %2156 }
 0xca5   :  { %v2161_v53 = vpop.permute.xlu1 %2160 }
 0xca6   :  { %v2166_v56 = vsel %vm356_vm15, %v2161_v53, %v2157_v15 }
 0xca7   :  { %v2169_v10 = vmul.f32 %v2166_v56, %v2839_v11 }
 0xcac   :  { %v2159_v39 = vpop.permute.xlu2 %2158  ;;  %v2141_v25 = vpop.permute.xlu0 %2140 }
 0xcad   :  { %v2177_v24 = vpop.permute.xlu1 %2176 }
 0xcae   :  { %v2180_v42 = vsel %vm375_vm2, %v4194_v63, %v2177_v24  ;;  %v2182_v54 = vsel %vm375_vm2, %v2177_v24, %v4194_v63 }
 0xcaf   :  { %v2184_v14 = vmul.f32 %v2180_v42, %v2856_v27  ;;  %v2185_v63 = vmul.f32 %v2182_v54, %v2868_v38 }
 0xcb4   :  { %v4198_v57 = vpop.permute.xlu2 %2142  ;;  %v4200_v47 = vpop.permute.xlu0 %2108 }
 0xcb5   :  { %v2145_v36 = vpop.permute.xlu1 %2144 }
 0xcb6   :  { %v2150_v22 = vsel %vm337_vm3, %v2145_v36, %v2141_v25 }
 0xcbc   :  { %v4214_v12 = vpop.permute.xlu2 %2126  ;;  %v2211_v35 = vpop.permute.xlu0 %2210 }
 0xcbd   :  { %v2213_v32 = vsel %vm413_vm14, %v2207_v31, %v2211_v35  ;;  %v2215_v29 = vsel %vm413_vm14, %v2211_v35, %v2207_v31  ;;  %v4224_v8 = vpop.permute.xlu1 %2112  ;;  %v2164_v31 = vsel %vm356_vm15, %v2157_v15, %v2161_v53 }
 0xcbe   :  { %v2218_v62 = vmul.f32 %v2213_v32, %v2827_v4  ;;  %v2219_v2 = vmul.f32 %v2215_v29, %v2835_v9  ;;  %v2271_v4 = vsel %vm118_vm0, %v2267_v61, %v2270_v49  ;;  %v2168_v18 = vmul.f32 %v2164_v31, %v2830_v5 }
 0xcbf   :  { %v2253_v32 = vrot.slane %v2169_v10, 4  ;;  %v2152_v29 = vmul.f32 %v2150_v22, %v2889_v6 }
 0xcc0   :  { %2429 = vmatpush.msk.msrb.mxu0 %vm118_vm0, %v2218_v62  ;;  %2431 = vmatpush.msk.msrb.mxu1 %vm118_vm0, %v2219_v2  ;;  %v2252_v24 = vrot.slane %v2168_v18, 4 }
 0xcc1   :  { %v2238_v31 = vrot.slane %v2152_v29, 4  ;;  %v2281_v56 = vsel %vm118_vm0, %v4152_v13, %v2253_v32 }
 0xcc2   :  { %2293 = vmatpush.msrb.mxu0 %v2216_v3  ;;  %2313 = vmatpush.msrb.mxu1 %v2217_v44 }
 0xcc4   :  { %v4238_v19 = vpop.permute.xlu2 %2110  ;;  %v2163_v9 = vpop.permute.xlu0 %2162  ;;  %2294 = vmatpush.msrb.mxu0 %v2269_v48  ;;  %2314 = vmatpush.msrb.mxu1 %v2271_v4 }
 0xcc5   :  { %v2165_v50 = vsel %vm356_vm15, %v2159_v39, %v2163_v9  ;;  %v2167_v15 = vsel %vm356_vm15, %v2163_v9, %v2159_v39  ;;  %v2179_v53 = vpop.permute.xlu1 %2178  ;;  %v2118_v9 = vsel %vm299_vm5, %v4224_v8, %v4200_v47 }
 0xcc6   :  { %v2170_v20 = vmul.f32 %v2165_v50, %v2830_v5  ;;  %v2171_v41 = vmul.f32 %v2167_v15, %v2839_v11  ;;  %v2181_v23 = vsel %vm375_vm2, %v2175_v28, %v2179_v53  ;;  %v2183_v34 = vsel %vm375_vm2, %v2179_v53, %v2175_v28 }
 0xcc7   :  { %v2186_v39 = vmul.f32 %v2181_v23, %v2856_v27  ;;  %v2187_v5 = vmul.f32 %v2183_v34, %v2868_v38  ;;  %v2148_v11 = vsel %vm337_vm3, %v2141_v25, %v2145_v36  ;;  %v2120_v10 = vmul.f32 %v2118_v9, %v2941_v46 }
 0xcc8   :  { %v2254_v59 = vrot.slane %v2170_v20, 4  ;;  %v2256_v28 = vrot.slane %v2171_v41, 4  ;;  %v2153_v62 = vmul.f32 %v2148_v11, %v2903_v16 }
 0xcc9   :  { %v2282_v35 = vsel %vm118_vm0, %v2186_v39, %v2266_v58  ;;  %v2283_v0 = vsel %vm118_vm0, %v2187_v5, %v2267_v61 }
 0xcca   :  { %2295 = vmatpush.msrb.mxu0 %v2282_v35  ;;  %2315 = vmatpush.msrb.mxu1 %v2283_v0  ;;  %v2255_v26 = vsel %vm118_vm0, %v2252_v24, %v2254_v59  ;;  %v2257_v49 = vsel %vm118_vm0, %v2253_v32, %v2256_v28 }
 0xccc   :  { %2296 = vmatpush.msrb.mxu0 %v2184_v14  ;;  %2316 = vmatpush.msrb.mxu1 %v2185_v63  ;;  %v4270_v25 = vpop.permute.xlu2 %2098  ;;  %v2147_v36 = vpop.permute.xlu0 %2146 }
 0xccd   :  { %v2149_v2 = vsel %vm337_vm3, %v4198_v57, %v2147_v36  ;;  %v2151_v27 = vsel %vm337_vm3, %v2147_v36, %v4198_v57  ;;  %v2131_v38 = vpop.permute.xlu1 %2130  ;;  %v2280_v57 = vsel %vm118_vm0, %v4136_v52, %v2252_v24 }
 0xcce   :  { %v2154_v3 = vmul.f32 %v2151_v27, %v2889_v6  ;;  %v2155_v44 = vmul.f32 %v2149_v2, %v2903_v16  ;;  %v2133_v58 = vsel %vm318_vm4, %v4214_v12, %v2131_v38  ;;  %v2135_v61 = vsel %vm318_vm4, %v2131_v38, %v4214_v12  ;;  %2297 = vmatpush.msrb.mxu0 %v2255_v26 }
 0xccf   :  { %2317 = vmatpush.msrb.mxu1 %v2257_v49  ;;  %v2239_v6 = vrot.slane %v2153_v62, 4  ;;  %v2138_v4 = vmul.f32 %v2135_v61, %v2925_v37  ;;  %v2116_v12 = vsel %vm299_vm5, %v4200_v47, %v4224_v8  ;;  %v2139_v52 = vmul.f32 %v2133_v58, %v2928_v40 }
 0xcd0   :  { %v2240_v48 = vrot.slane %v2154_v3, 4  ;;  %v2242_v16 = vrot.slane %v2155_v44, 4  ;;  %2298 = vmatpush.msrb.mxu0 %v2280_v57  ;;  %v2121_v50 = vmul.f32 %v2116_v12, %v2950_v1 }
 0xcd1   :  { %2318 = vmatpush.msrb.mxu1 %v2281_v56  ;;  %v2278_v47 = vsel %vm118_vm0, %v2138_v4, %v2238_v31  ;;  %v2279_v41 = vsel %vm118_vm0, %v2139_v52, %v2239_v6  ;;  %v95_v52 = vld [vmem:[#allocation4] sm:$0x1] }
 0xcd2   :  { %2299 = vmatpush.msrb.mxu0 %v4117_v21  ;;  %v2241_v13 = vsel %vm118_vm0, %v2238_v31, %v2240_v48  ;;  %v2243_v18 = vsel %vm118_vm0, %v2239_v6, %v2242_v16  ;;  %v2225_v11 = vrot.slane %v2121_v50, 4 }
 0xcd3   :  { %2319 = vmatpush.msrb.mxu1 %v4120_v60 }
 0xcd4   :  { %2300 = vmatpush.msrb.mxu0 %v2241_v13  ;;  %v1208_v15 = vpop.permute.xlu2 %1207  ;;  %v2115_v53 = vpop.permute.xlu0 %2114  ;;  %v94_v13 = vld [vmem:[#allocation3] sm:$0x1] }
 0xcd5   :  { %2320 = vmatpush.msrb.mxu1 %v2243_v18  ;;  %v4309_v8 = vperm.slane %v1208_v15, 0  ;;  %v2117_v21 = vsel %vm299_vm5, %v4238_v19, %v2115_v53  ;;  %v2119_v60 = vsel %vm299_vm5, %v2115_v53, %v4238_v19  ;;  %v2129_v20 = vpop.permute.xlu1 %2128 }
 0xcd6   :  { %v2122_v23 = vmul.f32 %v2119_v60, %v2941_v46  ;;  %v2123_v34 = vmul.f32 %v2117_v21, %v2950_v1  ;;  %v2132_v42 = vsel %vm318_vm4, %v4196_v30, %v2129_v20  ;;  %v2134_v54 = vsel %vm318_vm4, %v2129_v20, %v4196_v30  ;;  %2301 = vmatpush.msrb.mxu0 %v2278_v47 }
 0xcd7   :  { %v2136_v39 = vmul.f32 %v2134_v54, %v2925_v37  ;;  %v2137_v19 = vmul.f32 %v2132_v42, %v2928_v40  ;;  %2321 = vmatpush.msrb.mxu1 %v2279_v41  ;;  %v1238_v5 = vadd.f32 %v4094_v7, %v4309_v8  ;;  %v1258_v46 = vadd.f32 %v4096_v33, %v4309_v8 }
 0xcd8   :  { %v2224_v1 = vrot.slane %v2120_v10, 4  ;;  %v2226_v22 = vrot.slane %v2122_v23, 4  ;;  %v2228_v59 = vrot.slane %v2123_v34, 4 }
 0xcd9   :  { %2302 = vmatpush.msrb.mxu0 %v2136_v39  ;;  %2322 = vmatpush.msrb.mxu1 %v2137_v19  ;;  %v1260_v28 = vmax.f32 %v1238_v5, 0.0  ;;  %v1261_v30 = vmax.f32 %v1258_v46, 0.0 }
 0xcda   :  { %v2227_v35 = vsel %vm118_vm0, %v2224_v1, %v2226_v22  ;;  %v2229_v37 = vsel %vm118_vm0, %v2225_v11, %v2228_v59 }
 0xcdb   :  { %2303 = vmatpush.msrb.mxu0 %v2227_v35  ;;  %2323 = vmatpush.msrb.mxu1 %v2229_v37  ;;  %v1263_v40 = vsel %vm1262_vm13, %v1260_v28, 0.0  ;;  %v1264_v7 = vsel %vm1262_vm13, %v1261_v30, 0.0 }
 0xcdc   :  { %v2095_v0 = vpop.permute.xlu0 %2094  ;;  %v1265_v33 = vadd.f32 %v1264_v7, %v1263_v40 }
 0xcdd   :  { %v2101_v14 = vsel %vm280_vm6, %v2095_v0, %v4270_v25  ;;  %v2103_v63 = vsel %vm280_vm6, %v4270_v25, %v2095_v0  ;;  %v2093_v36 = vpop.permute.xlu1 %2092 }
 0xcde   :  { %v2106_v24 = vmul.f32 %v2103_v63, %v2984_v51  ;;  %v2107_v32 = vmul.f32 %v2101_v14, %v2987_v43  ;;  %1266 = vadd.xlane.f32.xlu1 %v1265_v33  ;;  %v4427_v33 = vlaneseq }
 0xce0   :  { %v2276_v29 = vsel %vm118_vm0, %v2106_v24, %v2224_v1  ;;  %v2277_v62 = vsel %vm118_vm0, %v2107_v32, %v2225_v11  ;;  %vm4368_vm2 = vcmp.lt.s32.totalorder %v4427_v33, 256 }
 0xce1   :  { %2304 = vmatpush.msrb.mxu0 %v2276_v29  ;;  %2324 = vmatpush.msrb.mxu1 %v2277_v62 }
 0xce4   :  { %v2097_v2 = vpop.permute.xlu0 %2096 }
 0xce5   :  { %v2100_v27 = vsel %vm280_vm6, %v2093_v36, %v2097_v2  ;;  %v2102_v38 = vsel %vm280_vm6, %v2097_v2, %v2093_v36 }
 0xce6   :  { %v2104_v25 = vmul.f32 %v2102_v38, %v2984_v51  ;;  %v2105_v26 = vmul.f32 %v2100_v27, %v2987_v43 }
 0xce8   :  { %2305 = vmatpush.msrb.mxu0 %v2104_v25  ;;  %2325 = vmatpush.msrb.mxu1 %v2105_v26 }
 0xce9   :  { %2430 = vmatmul.msk.f32.vlgmr.msrb.gmra.mxu0 %vm498_vm7, %v3966_v17  ;;  %2432 = vmatmul.msk.f32.vlgmr.msrb.gmra.mxu1 %vm498_vm7, %v3966_v17 }
 0xd51   :  { %v1267_v49 = vpop.xlane.xlu1 %1266 }
 0xd52   :  { %v1268_v3 = vmul.f32 %v1267_v49, %v2670_v45 }
 0xd54   :  { %v1269_v44 = vsub.f32 %v1260_v28, %v1268_v3  ;;  %v1270_v58 = vsub.f32 %v1261_v30, %v1268_v3 }
 0xd56   :  { %v1271_v61 = vmul.f32 %v1269_v44, %v1269_v44  ;;  %v1272_v55 = vmul.f32 %v1270_v58, %v1270_v58 }
 0xd58   :  { %v1273_v31 = vsel %vm1262_vm13, %v1271_v61, 0.0  ;;  %v1274_v51 = vsel %vm1262_vm13, %v1272_v55, 0.0 }
 0xd59   :  { %v1275_v43 = vadd.f32 %v1274_v51, %v1273_v31 }
 0xd5b   :  { %1276 = vadd.xlane.f32.xlu2 %v1275_v43 }
 0xd66   :  { %v2307_v57 = vpop.f32.mrf.mxu0  ;;  %v2327_v56 = vpop.f32.mrf.mxu1 }
 0xd67   :  { %v2308_v6 = vadd.f32 %v2307_v57, %v4309_v8  ;;  %v2328_v48 = vadd.f32 %v2327_v56, %v4309_v8 }
 0xd69   :  { %v2330_v17 = vmax.f32 %v2308_v6, 0.0  ;;  %v2331_v16 = vmax.f32 %v2328_v48, 0.0 }
 0xd6b   :  { %v2332_v4 = vsel %vm1262_vm13, %v2330_v17, 0.0  ;;  %v2333_v12 = vsel %vm1262_vm13, %v2331_v16, 0.0 }
 0xd6c   :  { %v2334_v9 = vadd.f32 %v2333_v12, %v2332_v4 }
 0xd6e   :  { %2335 = vadd.xlane.f32.xlu0 %v2334_v9 }
 0xd73   :  { %1302 = vperm.xlu2 %2446, %v95_v52  }
 0xd82   :  { %1294 = vperm.xlu0 %2444, %v94_v13  }
 0xdce   :  { %v1277_v18 = vpop.xlane.xlu2 %1276 }
 0xdcf   :  { %v1278_v10 = vmul.f32 %v1277_v18, %v2670_v45 }
 0xdd1   :  { %v1279_v50 = vadd.f32 1e-05, %v1278_v10 }
 0xdd3   :  { %2473 = vrsqrt.f32 %v1279_v50  ;;  %vm1286_vm14 = vweird.f32 %v1279_v50 }
 0xdd6   :  { %v1303_v1 = vpop.permute.xlu2 %1302 }
 0xdd7   :  { %v1305_v30 = vperm.slane %v1303_v1, 0 }
 0xdd9   :  { %v2474_v15 = vpop.eup %2473 }
 0xdda   :  { %v1281_v53 = vmul.f32 %v2474_v15, %v1279_v50  ;;  %vm1287_vm0 = vweird.f32 %v2474_v15 }
 0xddb   :  { %vm1288_vm15 = vmor %vm1286_vm14, %vm1287_vm0 }
 0xddc   :  { %v1282_v8 = vmul.f32 %v2474_v15, %v1281_v53 }
 0xdde   :  { %v1283_v41 = vmul.f32 0.5, %v1282_v8 }
 0xde0   :  { %v1284_v19 = vsub.f32 1.5, %v1283_v41 }
 0xde1   :  { %v2336_v47 = vpop.xlane.xlu0 %2335 }
 0xde2   :  { %v2337_v21 = vmul.f32 %v2336_v47, %v2670_v45  ;;  %v1285_v5 = vmul.f32 %v2474_v15, %v1284_v19 }
 0xde4   :  { %v2338_v60 = vsub.f32 %v2330_v17, %v2337_v21  ;;  %v2339_v20 = vsub.f32 %v2331_v16, %v2337_v21  ;;  %v1289_v46 = vsel %vm1288_vm15, %v2474_v15, %v1285_v5 }
 0xde5   :  { %v1290_v22 = vmul.f32 %v1289_v46, %v1269_v44  ;;  %v1291_v59 = vmul.f32 %v1289_v46, %v1270_v58 }
 0xde6   :  { %v2340_v23 = vmul.f32 %v2338_v60, %v2338_v60  ;;  %v2341_v34 = vmul.f32 %v2339_v20, %v2339_v20 }
 0xde8   :  { %v2342_v42 = vsel %vm1262_vm13, %v2340_v23, 0.0  ;;  %v2343_v54 = vsel %vm1262_vm13, %v2341_v34, 0.0 }
 0xde9   :  { %v2344_v39 = vadd.f32 %v2343_v54, %v2342_v42 }
 0xdeb   :  { %2345 = vadd.xlane.f32.xlu1 %v2344_v39 }
 0xdf4   :  { %v1295_v11 = vpop.permute.xlu0 %1294 }
 0xdf5   :  { %v1297_v28 = vperm.slane %v1295_v11, 0 }
 0xdf7   :  { %v1298_v35 = vmul.f32 %v1297_v28, %v1290_v22  ;;  %v1299_v37 = vmul.f32 %v1297_v28, %v1291_v59 }
 0xdf9   :  { %v1307_v40 = vadd.f32 %v1305_v30, %v1299_v37  ;;  %v1306_v7 = vadd.f32 %v1305_v30, %v1298_v35 }
 0xdfb   :  { %v1310_v0 = vrot.slane %v1307_v40, 7 }
 0xdfd   :  { %v1311_v63 = vsel %vm1262_vm13, %v1306_v7, %v1310_v0 }
 0xdfe   :  { %1317 = vst.msk [vmem:[#allocation5] ss:$2 sm:$0x3] %vm4368_vm2, %v1311_v63 }
 0xe5e   :  { %v2346_v24 = vpop.xlane.xlu1 %2345 }
 0xe5f   :  { %v2347_v32 = vmul.f32 %v2346_v24, %v2670_v45 }
 0xe61   :  { %v2348_v29 = vadd.f32 1e-05, %v2347_v32 }
 0xe63   :  { %2475 = vrsqrt.f32 %v2348_v29  ;;  %vm2355_vm4 = vweird.f32 %v2348_v29 }
 0xe69   :  { %v2476_v62 = vpop.eup %2475 }
 0xe6a   :  { %v2350_v36 = vmul.f32 %v2476_v62, %v2348_v29  ;;  %vm2356_vm3 = vweird.f32 %v2476_v62 }
 0xe6b   :  { %vm2357_vm5 = vmor %vm2355_vm4, %vm2356_vm3 }
 0xe6c   :  { %v2351_v2 = vmul.f32 %v2476_v62, %v2350_v36 }
 0xe6e   :  { %v2352_v27 = vmul.f32 0.5, %v2351_v2 }
 0xe70   :  { %v2353_v38 = vsub.f32 1.5, %v2352_v27 }
 0xe72   :  { %v2354_v25 = vmul.f32 %v2476_v62, %v2353_v38 }
 0xe74   :  { %v2358_v26 = vsel %vm2357_vm5, %v2476_v62, %v2354_v25 }
 0xe75   :  { %v2359_v49 = vmul.f32 %v2358_v26, %v2338_v60  ;;  %v2360_v3 = vmul.f32 %v2358_v26, %v2339_v20 }
 0xe77   :  { %v2361_v44 = vmul.f32 %v2359_v49, %v1297_v28  ;;  %v2362_v58 = vmul.f32 %v2360_v3, %v1297_v28 }
 0xe79   :  { %v2364_v61 = vadd.f32 %v2362_v58, %v1305_v30  ;;  %v2363_v45 = vadd.f32 %v2361_v44, %v1305_v30 }
 0xe7b   :  { %v2367_v55 = vrot.slane %v2364_v61, 7 }
 0xe7d   :  { %v2368_v31 = vsel %vm1262_vm13, %v2363_v45, %v2367_v55 }
 0xe7e   :  { %2371 = vst.msk [vmem:[#allocation5 + $0x1] ss:$2 sm:$0x3] %vm4368_vm2, %v2368_v31 }
 0xe7f   :  { %2382 = dma.vmem_to_hbm [thread:$0]  %s2378_s10, 64, %s2380_s9, [#allocation6]  }
 0xe80   :  { %2507 = dma.done.wait [#allocation6], 64  }
 0xe81   :  { %2508 = vsyncadd [#allocation6], 4294967232 }
 0xe82   :  { %2387 = vsyncpa [#allocation6], 1 }

</bundles_post_ra>
